<compile_context>
chip_gen: v7x
topology: tpu7x:2x2x1
jax: 0.10.0
libtpu: 0.0.40
codegen_flags: <defaults>
</compile_context>

<pallas_src>
import numpy as np
import jax
import jax.numpy as jnp
from jax.experimental import pallas as pl
from jax.experimental.pallas import tpu as pltpu


# ------------------------------ fused kernel --------------------------------

def _lenet_kernel(x_ref, m1_ref, b1_ref, m2_ref, b2_ref,
                  w3_ref, b3_ref, w4_ref, b4_ref, w5_ref, b5_ref,
                  o_ref, xp_s, p1_s, p2_s):
    f32 = jnp.float32
    n_batch = x_ref.shape[0]

    # Hoist loop-invariant bias loads out of the unrolled batch loop.
    b1v = b1_ref[...]          # (1, 256)
    b2v = b2_ref[...]          # (1, 256)

    # Zero the row-padded input scratch once; rows 6,7,36,37 provide conv1's
    # zero ROW padding (COLUMN padding is folded into the m1 band matrices).
    xp_s[...] = jnp.zeros_like(xp_s)

    for n in range(n_batch):
        # -- fold the input zero-pad into the kernel: raw 28x28 image goes to
        #    rows 8..35 (8-sublane aligned) of the 40-row scratch.
        xp_s[pl.ds(8, 28), :] = x_ref[n, 0]

        # -- conv1 (1->6, 5x5, pad=2) as banded MXU matmuls, split by output
        #    row parity so 2x2 max-pooling needs no per-row loop.
        #    output lane layout: (j//2)*6 + c + 128*(j%2)
        ae = ao = None
        for di in range(5):
            m = m1_ref[di]                                              # (28, 256)
            de = jnp.dot(xp_s[pl.ds(di + 6, 14, 2), :], m,
                         preferred_element_type=f32)                    # even rows
            do = jnp.dot(xp_s[pl.ds(di + 7, 14, 2), :], m,
                         preferred_element_type=f32)                    # odd rows
            ae = de if ae is None else ae + de
            ao = do if ao is None else ao + do
        ye = jnp.maximum(ae + b1v, 0.0)                                 # (14, 256)
        yo = jnp.maximum(ao + b1v, 0.0)                                 # (14, 256)
        rmax = jnp.maximum(ye, yo)                                      # row-pair max
        # column-pair max = max of the two 128-lane halves; lanes 84..127 stay 0.
        p1_s[...] = jnp.maximum(rmax[:, 0:128], rmax[:, 128:256])       # (14, 128)

        # -- conv2 (6->16, 5x5, valid), same banded / parity-split scheme.
        #    input lanes = jp*6 + ci (K padded to 128);
        #    output lanes = (jo//2)*16 + co + 128*(jo%2)
        ae2 = ao2 = None
        for di in range(5):
            m = m2_ref[di]                                              # (128, 256)
            de = jnp.dot(p1_s[pl.ds(di, 5, 2), :], m,
                         preferred_element_type=f32)
            do = jnp.dot(p1_s[pl.ds(di + 1, 5, 2), :], m,
                         preferred_element_type=f32)
            ae2 = de if ae2 is None else ae2 + de
            ao2 = do if ao2 is None else ao2 + do
        ye2 = jnp.maximum(ae2 + b2v, 0.0)                               # (5, 256)
        yo2 = jnp.maximum(ao2 + b2v, 0.0)                               # (5, 256)
        rmax2 = jnp.maximum(ye2, yo2)
        # pooled conv2 output for image n -> rows 8n..8n+4 (8-aligned), lanes
        # = j2*16 + co (lanes 80..127 are exactly zero: zero bands + zero bias + ReLU).
        p2_s[pl.ds(8 * n, 5), :] = jnp.maximum(rmax2[:, 0:128],
                                               rmax2[:, 128:256])       # (5, 128)

    # ---- fc1 / fc2 / fc3, batched across images (M = N) -------------------------
    h1 = None
    for i2 in range(5):
        lhs = p2_s[pl.ds(i2, n_batch, 8), :]                            # (N, 128)
        d = jnp.dot(lhs, w3_ref[i2], preferred_element_type=f32)        # (N, 120)
        h1 = d if h1 is None else h1 + d
    h1 = jnp.maximum(h1 + b3_ref[...], 0.0)                             # (N, 120)
    h2 = jnp.maximum(jnp.dot(h1, w4_ref[...], preferred_element_type=f32)
                     + b4_ref[...], 0.0)                                # (N, 84)
    logits = (jnp.dot(h2, w5_ref[...], preferred_element_type=f32)
              + b5_ref[...])                                            # (N, 10)

    # ---- LeNet5_pos rule: negate all logits if the TOTAL sum is <= 0 -------------
    sign = jnp.where(jnp.sum(logits) > 0, f32(1.0), f32(-1.0))
    o_ref[...] = logits * sign


# --------------------------- init-time weight packing ------------------------

def prepack_params(p):
    """Fold conv weights into band matrices (column padding / lane layouts /
    K-padding included), fold transposes and the CHW flatten into the fc
    weights.  Runs ONCE at init (host-side numpy)."""
    w1 = np.asarray(p["w1"], np.float32)   # (6, 1, 5, 5)
    b1 = np.asarray(p["b1"], np.float32)
    w2 = np.asarray(p["w2"], np.float32)   # (16, 6, 5, 5)
    b2 = np.asarray(p["b2"], np.float32)
    w3 = np.asarray(p["w3"], np.float32)   # (120, 400)
    b3 = np.asarray(p["b3"], np.float32)
    w4 = np.asarray(p["w4"], np.float32)   # (84, 120)
    b4 = np.asarray(p["b4"], np.float32)
    w5 = np.asarray(p["w5"], np.float32)   # (10, 84)
    b5 = np.asarray(p["b5"], np.float32)

    # conv1 band matrices over UNPADDED input columns (column pad folded in):
    #   m1[di, w, lane(j,c)] = w1[c, 0, di, w - j + 2]
    m1 = np.zeros((5, 28, 256), np.float32)
    b1r = np.zeros((1, 256), np.float32)
    for j in range(28):
        base = (j // 2) * 6 + 128 * (j % 2)
        b1r[0, base:base + 6] = b1
        for di in range(5):
            for dj in range(5):
                wp = j + dj - 2
                if 0 <= wp < 28:
                    m1[di, wp, base:base + 6] = w1[:, 0, di, dj]

    # conv2 band matrices: input lanes = jp*6+ci (K padded 84->128, extra rows zero),
    # output lanes = (jo//2)*16 + co + 128*(jo%2)
    m2 = np.zeros((5, 128, 256), np.float32)
    b2r = np.zeros((1, 256), np.float32)
    for jo in range(10):
        base = (jo // 2) * 16 + 128 * (jo % 2)
        b2r[0, base:base + 16] = b2
        for di in range(5):
            for dj in range(5):
                for ci in range(6):
                    m2[di, (jo + dj) * 6 + ci, base:base + 16] = w2[:, ci, di, dj]

    # fc1: p2 layout is (block i2, lane = j2*16+co), K padded 80->128 (zeros);
    # PyTorch CHW flat index = co*25 + i2*5 + j2.
    w3b = np.zeros((5, 128, 120), np.float32)
    for i2 in range(5):
        for j2 in range(5):
            for co in range(16):
                w3b[i2, j2 * 16 + co, :] = w3[:, co * 25 + i2 * 5 + j2]

    return {
        "m1": jnp.asarray(m1), "b1r": jnp.asarray(b1r),
        "m2": jnp.asarray(m2), "b2r": jnp.asarray(b2r),
        "w3b": jnp.asarray(w3b), "b3r": jnp.asarray(b3.reshape(1, 120)),
        "w4t": jnp.asarray(np.ascontiguousarray(w4.T)),
        "b4r": jnp.asarray(b4.reshape(1, 84)),
        "w5t": jnp.asarray(np.ascontiguousarray(w5.T)),
        "b5r": jnp.asarray(b5.reshape(1, 10)),
    }


# --------------------------------- forward -----------------------------------

def lenet5_pos_forward(x, packed):
    n = x.shape[0]

    def vmem():
        return pl.BlockSpec(memory_space=pltpu.MemorySpace.VMEM)

    return pl.pallas_call(
        _lenet_kernel,
        out_shape=jax.ShapeDtypeStruct((n, 10), jnp.float32),
        in_specs=[vmem() for _ in range(11)],
        out_specs=vmem(),
        scratch_shapes=[
            pltpu.VMEM((40, 28), jnp.float32),        # row-padded input image
            pltpu.VMEM((14, 128), jnp.float32),       # pool1 output (lane-padded)
            pltpu.VMEM((8 * n, 128), jnp.float32),    # pool2 outputs, 8-aligned per image
        ],
    )(x, packed["m1"], packed["b1r"], packed["m2"], packed["b2r"],
      packed["w3b"], packed["b3r"], packed["w4t"], packed["b4r"],
      packed["w5t"], packed["b5r"])


# ---------------------------- params / reference -----------------------------

def init_params(key):
    ks = jax.random.split(key, 10)

    def u(k, shape, scale):
        return jax.random.uniform(k, shape, jnp.float32, -scale, scale)

    return {
        "w1": u(ks[0], (6, 1, 5, 5), 0.2),    "b1": u(ks[1], (6,), 0.2),
        "w2": u(ks[2], (16, 6, 5, 5), 0.08),  "b2": u(ks[3], (16,), 0.08),
        "w3": u(ks[4], (120, 400), 0.05),     "b3": u(ks[5], (120,), 0.05),
        "w4": u(ks[6], (84, 120), 0.09),      "b4": u(ks[7], (84,), 0.09),
        "w5": u(ks[8], (10, 84), 0.1),        "b5": u(ks[9], (10,), 0.1),
    }


def ref_forward(x, p):
    dn = ("NCHW", "OIHW", "NCHW")
    y = jax.lax.conv_general_dilated(x, p["w1"], (1, 1), ((2, 2), (2, 2)),
                                     dimension_numbers=dn)
    y = jnp.maximum(y + p["b1"].reshape(1, 6, 1, 1), 0.0)
    y = jax.lax.reduce_window(y, -jnp.inf, jax.lax.max,
                              (1, 1, 2, 2), (1, 1, 2, 2), "VALID")
    y = jax.lax.conv_general_dilated(y, p["w2"], (1, 1), "VALID",
                                     dimension_numbers=dn)
    y = jnp.maximum(y + p["b2"].reshape(1, 16, 1, 1), 0.0)
    y = jax.lax.reduce_window(y, -jnp.inf, jax.lax.max,
                              (1, 1, 2, 2), (1, 1, 2, 2), "VALID")
    flat = y.reshape(y.shape[0], -1)
    h1 = jnp.maximum(flat @ p["w3"].T + p["b3"], 0.0)
    h2 = jnp.maximum(h1 @ p["w4"].T + p["b4"], 0.0)
    out = h2 @ p["w5"].T + p["b5"]
    return jnp.where(jnp.sum(out) > 0, out, -out)


if __name__ == "__main__":
    key = jax.random.PRNGKey(0)
    pkey, xkey = jax.random.split(key)
    params = init_params(pkey)
    packed = prepack_params(params)                              # once, at init
    x = jax.random.normal(xkey, (2, 1, 28, 28), jnp.float32)     # NCHW

    out = jax.block_until_ready(jax.jit(lenet5_pos_forward)(x, packed))
    assert out.shape == (2, 10) and out.dtype == jnp.float32

    ref = jax.block_until_ready(jax.jit(ref_forward)(x, params))
    assert jnp.allclose(out, ref, rtol=2e-3, atol=2e-3), (out, ref)
    print("KERNEL_OK")
</pallas_src>

<mosaic_0001>
module attributes {stable_mosaic.version = 11 : i64} {
  func.func @_lenet_kernel(%arg0: memref<2x1x28x28xf32, #tpu.memory_space<vmem>>, %arg1: memref<5x28x256xf32, #tpu.memory_space<vmem>>, %arg2: memref<1x256xf32, #tpu.memory_space<vmem>>, %arg3: memref<5x128x256xf32, #tpu.memory_space<vmem>>, %arg4: memref<1x256xf32, #tpu.memory_space<vmem>>, %arg5: memref<5x128x120xf32, #tpu.memory_space<vmem>>, %arg6: memref<1x120xf32, #tpu.memory_space<vmem>>, %arg7: memref<120x84xf32, #tpu.memory_space<vmem>>, %arg8: memref<1x84xf32, #tpu.memory_space<vmem>>, %arg9: memref<84x10xf32, #tpu.memory_space<vmem>>, %arg10: memref<1x10xf32, #tpu.memory_space<vmem>>, %arg11: memref<2x10xf32, #tpu.memory_space<vmem>>, %arg12: memref<40x28xf32, #tpu.memory_space<vmem>>, %arg13: memref<14x128xf32, #tpu.memory_space<vmem>>, %arg14: memref<16x128xf32, #tpu.memory_space<vmem>>) attributes {dimension_semantics = [], scalar_prefetch = 0 : i64, scratch_operands = 3 : i64, tpu.core_type = #tpu.core_type<tc>} {
    %c0 = arith.constant 0 : index
    %c0_0 = arith.constant 0 : index
    %0 = vector.load %arg2[%c0, %c0_0] : memref<1x256xf32, #tpu.memory_space<vmem>>, vector<1x256xf32>
    %c0_1 = arith.constant 0 : index
    %c0_2 = arith.constant 0 : index
    %1 = vector.load %arg4[%c0_1, %c0_2] : memref<1x256xf32, #tpu.memory_space<vmem>>, vector<1x256xf32>
    %cst = arith.constant 0.000000e+00 : f32
    %2 = vector.broadcast %cst : f32 to vector<40x28xf32>
    %c0_3 = arith.constant 0 : index
    %c0_4 = arith.constant 0 : index
    %3 = vector.load %arg12[%c0_3, %c0_4] : memref<40x28xf32, #tpu.memory_space<vmem>>, vector<40x28xf32>
    tpu.vector_store %arg12[%c0_3, %c0_4], %2 {strides = array<i32>} : memref<40x28xf32, #tpu.memory_space<vmem>>, vector<40x28xf32>,
    %c0_5 = arith.constant 0 : index
    %c0_6 = arith.constant 0 : index
    %c0_7 = arith.constant 0 : index
    %c0_8 = arith.constant 0 : index
    %4 = vector.load %arg0[%c0_5, %c0_6, %c0_7, %c0_8] : memref<2x1x28x28xf32, #tpu.memory_space<vmem>>, vector<1x1x28x28xf32>
    %5 = vector.shape_cast %4 : vector<1x1x28x28xf32> to vector<28x28xf32>
    %c8 = arith.constant 8 : index
    %c0_9 = arith.constant 0 : index
    %6 = vector.load %arg12[%c8, %c0_9] : memref<40x28xf32, #tpu.memory_space<vmem>>, vector<28x28xf32>
    tpu.vector_store %arg12[%c8, %c0_9], %5 {strides = array<i32>} : memref<40x28xf32, #tpu.memory_space<vmem>>, vector<28x28xf32>,
    %c0_10 = arith.constant 0 : index
    %c0_11 = arith.constant 0 : index
    %c0_12 = arith.constant 0 : index
    %7 = vector.load %arg1[%c0_10, %c0_11, %c0_12] : memref<5x28x256xf32, #tpu.memory_space<vmem>>, vector<1x28x256xf32>
    %8 = vector.shape_cast %7 : vector<1x28x256xf32> to vector<28x256xf32>
    %c6 = arith.constant 6 : index
    %c0_13 = arith.constant 0 : index
    %9 = tpu.strided_load %arg12[%c6, %c0_13] {strides = array<i32: 2, 1>} : memref<40x28xf32, #tpu.memory_space<vmem>>, vector<14x28xf32>
    %cst_14 = arith.constant dense<0.000000e+00> : vector<14x256xf32>
    %10 = tpu.matmul %9, %8, %cst_14 {dimension_numbers = #tpu.dot_dimension_numbers<[1], [0], [0], [1], [0, 0, 1, 1], [], []>} : vector<14x28xf32>, vector<28x256xf32>, vector<14x256xf32> -> vector<14x256xf32>
    %c7 = arith.constant 7 : index
    %c0_15 = arith.constant 0 : index
    %11 = tpu.strided_load %arg12[%c7, %c0_15] {strides = array<i32: 2, 1>} : memref<40x28xf32, #tpu.memory_space<vmem>>, vector<14x28xf32>
    %cst_16 = arith.constant dense<0.000000e+00> : vector<14x256xf32>
    %12 = tpu.matmul %11, %8, %cst_16 {dimension_numbers = #tpu.dot_dimension_numbers<[1], [0], [0], [1], [0, 0, 1, 1], [], []>} : vector<14x28xf32>, vector<28x256xf32>, vector<14x256xf32> -> vector<14x256xf32>
    %c1 = arith.constant 1 : index
    %c0_17 = arith.constant 0 : index
    %c0_18 = arith.constant 0 : index
    %13 = vector.load %arg1[%c1, %c0_17, %c0_18] : memref<5x28x256xf32, #tpu.memory_space<vmem>>, vector<1x28x256xf32>
    %14 = vector.shape_cast %13 : vector<1x28x256xf32> to vector<28x256xf32>
    %c7_19 = arith.constant 7 : index
    %c0_20 = arith.constant 0 : index
    %15 = tpu.strided_load %arg12[%c7_19, %c0_20] {strides = array<i32: 2, 1>} : memref<40x28xf32, #tpu.memory_space<vmem>>, vector<14x28xf32>
    %cst_21 = arith.constant dense<0.000000e+00> : vector<14x256xf32>
    %16 = tpu.matmul %15, %14, %cst_21 {dimension_numbers = #tpu.dot_dimension_numbers<[1], [0], [0], [1], [0, 0, 1, 1], [], []>} : vector<14x28xf32>, vector<28x256xf32>, vector<14x256xf32> -> vector<14x256xf32>
    %c8_22 = arith.constant 8 : index
    %c0_23 = arith.constant 0 : index
    %17 = tpu.strided_load %arg12[%c8_22, %c0_23] {strides = array<i32: 2, 1>} : memref<40x28xf32, #tpu.memory_space<vmem>>, vector<14x28xf32>
    %cst_24 = arith.constant dense<0.000000e+00> : vector<14x256xf32>
    %18 = tpu.matmul %17, %14, %cst_24 {dimension_numbers = #tpu.dot_dimension_numbers<[1], [0], [0], [1], [0, 0, 1, 1], [], []>} : vector<14x28xf32>, vector<28x256xf32>, vector<14x256xf32> -> vector<14x256xf32>
    %19 = arith.addf %10, %16 : vector<14x256xf32>
    %20 = arith.addf %12, %18 : vector<14x256xf32>
    %c2 = arith.constant 2 : index
    %c0_25 = arith.constant 0 : index
    %c0_26 = arith.constant 0 : index
    %21 = vector.load %arg1[%c2, %c0_25, %c0_26] : memref<5x28x256xf32, #tpu.memory_space<vmem>>, vector<1x28x256xf32>
    %22 = vector.shape_cast %21 : vector<1x28x256xf32> to vector<28x256xf32>
    %c8_27 = arith.constant 8 : index
    %c0_28 = arith.constant 0 : index
    %23 = tpu.strided_load %arg12[%c8_27, %c0_28] {strides = array<i32: 2, 1>} : memref<40x28xf32, #tpu.memory_space<vmem>>, vector<14x28xf32>
    %cst_29 = arith.constant dense<0.000000e+00> : vector<14x256xf32>
    %24 = tpu.matmul %23, %22, %cst_29 {dimension_numbers = #tpu.dot_dimension_numbers<[1], [0], [0], [1], [0, 0, 1, 1], [], []>} : vector<14x28xf32>, vector<28x256xf32>, vector<14x256xf32> -> vector<14x256xf32>
    %c9 = arith.constant 9 : index
    %c0_30 = arith.constant 0 : index
    %25 = tpu.strided_load %arg12[%c9, %c0_30] {strides = array<i32: 2, 1>} : memref<40x28xf32, #tpu.memory_space<vmem>>, vector<14x28xf32>
    %cst_31 = arith.constant dense<0.000000e+00> : vector<14x256xf32>
    %26 = tpu.matmul %25, %22, %cst_31 {dimension_numbers = #tpu.dot_dimension_numbers<[1], [0], [0], [1], [0, 0, 1, 1], [], []>} : vector<14x28xf32>, vector<28x256xf32>, vector<14x256xf32> -> vector<14x256xf32>
    %27 = arith.addf %19, %24 : vector<14x256xf32>
    %28 = arith.addf %20, %26 : vector<14x256xf32>
    %c3 = arith.constant 3 : index
    %c0_32 = arith.constant 0 : index
    %c0_33 = arith.constant 0 : index
    %29 = vector.load %arg1[%c3, %c0_32, %c0_33] : memref<5x28x256xf32, #tpu.memory_space<vmem>>, vector<1x28x256xf32>
    %30 = vector.shape_cast %29 : vector<1x28x256xf32> to vector<28x256xf32>
    %c9_34 = arith.constant 9 : index
    %c0_35 = arith.constant 0 : index
    %31 = tpu.strided_load %arg12[%c9_34, %c0_35] {strides = array<i32: 2, 1>} : memref<40x28xf32, #tpu.memory_space<vmem>>, vector<14x28xf32>
    %cst_36 = arith.constant dense<0.000000e+00> : vector<14x256xf32>
    %32 = tpu.matmul %31, %30, %cst_36 {dimension_numbers = #tpu.dot_dimension_numbers<[1], [0], [0], [1], [0, 0, 1, 1], [], []>} : vector<14x28xf32>, vector<28x256xf32>, vector<14x256xf32> -> vector<14x256xf32>
    %c10 = arith.constant 10 : index
    %c0_37 = arith.constant 0 : index
    %33 = tpu.strided_load %arg12[%c10, %c0_37] {strides = array<i32: 2, 1>} : memref<40x28xf32, #tpu.memory_space<vmem>>, vector<14x28xf32>
    %cst_38 = arith.constant dense<0.000000e+00> : vector<14x256xf32>
    %34 = tpu.matmul %33, %30, %cst_38 {dimension_numbers = #tpu.dot_dimension_numbers<[1], [0], [0], [1], [0, 0, 1, 1], [], []>} : vector<14x28xf32>, vector<28x256xf32>, vector<14x256xf32> -> vector<14x256xf32>
    %35 = arith.addf %27, %32 : vector<14x256xf32>
    %36 = arith.addf %28, %34 : vector<14x256xf32>
    %c4 = arith.constant 4 : index
    %c0_39 = arith.constant 0 : index
    %c0_40 = arith.constant 0 : index
    %37 = vector.load %arg1[%c4, %c0_39, %c0_40] : memref<5x28x256xf32, #tpu.memory_space<vmem>>, vector<1x28x256xf32>
    %38 = vector.shape_cast %37 : vector<1x28x256xf32> to vector<28x256xf32>
    %c10_41 = arith.constant 10 : index
    %c0_42 = arith.constant 0 : index
    %39 = tpu.strided_load %arg12[%c10_41, %c0_42] {strides = array<i32: 2, 1>} : memref<40x28xf32, #tpu.memory_space<vmem>>, vector<14x28xf32>
    %cst_43 = arith.constant dense<0.000000e+00> : vector<14x256xf32>
    %40 = tpu.matmul %39, %38, %cst_43 {dimension_numbers = #tpu.dot_dimension_numbers<[1], [0], [0], [1], [0, 0, 1, 1], [], []>} : vector<14x28xf32>, vector<28x256xf32>, vector<14x256xf32> -> vector<14x256xf32>
    %c11 = arith.constant 11 : index
    %c0_44 = arith.constant 0 : index
    %41 = tpu.strided_load %arg12[%c11, %c0_44] {strides = array<i32: 2, 1>} : memref<40x28xf32, #tpu.memory_space<vmem>>, vector<14x28xf32>
    %cst_45 = arith.constant dense<0.000000e+00> : vector<14x256xf32>
    %42 = tpu.matmul %41, %38, %cst_45 {dimension_numbers = #tpu.dot_dimension_numbers<[1], [0], [0], [1], [0, 0, 1, 1], [], []>} : vector<14x28xf32>, vector<28x256xf32>, vector<14x256xf32> -> vector<14x256xf32>
    %43 = arith.addf %35, %40 : vector<14x256xf32>
    %44 = arith.addf %36, %42 : vector<14x256xf32>
    %45 = vector.broadcast %0 : vector<1x256xf32> to vector<14x256xf32>
    %46 = arith.addf %43, %45 : vector<14x256xf32>
    %cst_46 = arith.constant 0.000000e+00 : f32
    %47 = vector.broadcast %cst_46 : f32 to vector<14x256xf32>
    %48 = arith.maximumf %46, %47 : vector<14x256xf32>
    %49 = vector.broadcast %0 : vector<1x256xf32> to vector<14x256xf32>
    %50 = arith.addf %44, %49 : vector<14x256xf32>
    %cst_47 = arith.constant 0.000000e+00 : f32
    %51 = vector.broadcast %cst_47 : f32 to vector<14x256xf32>
    %52 = arith.maximumf %50, %51 : vector<14x256xf32>
    %53 = arith.maximumf %48, %52 : vector<14x256xf32>
    %54 = vector.extract_strided_slice %53 {offsets = [0, 0], sizes = [14, 128], strides = [1, 1]} : vector<14x256xf32> to vector<14x128xf32>
    %55 = vector.extract_strided_slice %53 {offsets = [0, 128], sizes = [14, 128], strides = [1, 1]} : vector<14x256xf32> to vector<14x128xf32>
    %56 = arith.maximumf %54, %55 : vector<14x128xf32>
    %c0_48 = arith.constant 0 : index
    %c0_49 = arith.constant 0 : index
    %57 = vector.load %arg13[%c0_48, %c0_49] : memref<14x128xf32, #tpu.memory_space<vmem>>, vector<14x128xf32>
    tpu.vector_store %arg13[%c0_48, %c0_49], %56 {strides = array<i32>} : memref<14x128xf32, #tpu.memory_space<vmem>>, vector<14x128xf32>,
    %c0_50 = arith.constant 0 : index
    %c0_51 = arith.constant 0 : index
    %c0_52 = arith.constant 0 : index
    %58 = vector.load %arg3[%c0_50, %c0_51, %c0_52] : memref<5x128x256xf32, #tpu.memory_space<vmem>>, vector<1x128x256xf32>
    %59 = vector.shape_cast %58 : vector<1x128x256xf32> to vector<128x256xf32>
    %c0_53 = arith.constant 0 : index
    %c0_54 = arith.constant 0 : index
    %60 = tpu.strided_load %arg13[%c0_53, %c0_54] {strides = array<i32: 2, 1>} : memref<14x128xf32, #tpu.memory_space<vmem>>, vector<5x128xf32>
    %cst_55 = arith.constant dense<0.000000e+00> : vector<5x256xf32>
    %61 = tpu.matmul %60, %59, %cst_55 {dimension_numbers = #tpu.dot_dimension_numbers<[1], [0], [0], [1], [0, 0, 1, 1], [], []>} : vector<5x128xf32>, vector<128x256xf32>, vector<5x256xf32> -> vector<5x256xf32>
    %c1_56 = arith.constant 1 : index
    %c0_57 = arith.constant 0 : index
    %62 = tpu.strided_load %arg13[%c1_56, %c0_57] {strides = array<i32: 2, 1>} : memref<14x128xf32, #tpu.memory_space<vmem>>, vector<5x128xf32>
    %cst_58 = arith.constant dense<0.000000e+00> : vector<5x256xf32>
    %63 = tpu.matmul %62, %59, %cst_58 {dimension_numbers = #tpu.dot_dimension_numbers<[1], [0], [0], [1], [0, 0, 1, 1], [], []>} : vector<5x128xf32>, vector<128x256xf32>, vector<5x256xf32> -> vector<5x256xf32>
    %c1_59 = arith.constant 1 : index
    %c0_60 = arith.constant 0 : index
    %c0_61 = arith.constant 0 : index
    %64 = vector.load %arg3[%c1_59, %c0_60, %c0_61] : memref<5x128x256xf32, #tpu.memory_space<vmem>>, vector<1x128x256xf32>
    %65 = vector.shape_cast %64 : vector<1x128x256xf32> to vector<128x256xf32>
    %c1_62 = arith.constant 1 : index
    %c0_63 = arith.constant 0 : index
    %66 = tpu.strided_load %arg13[%c1_62, %c0_63] {strides = array<i32: 2, 1>} : memref<14x128xf32, #tpu.memory_space<vmem>>, vector<5x128xf32>
    %cst_64 = arith.constant dense<0.000000e+00> : vector<5x256xf32>
    %67 = tpu.matmul %66, %65, %cst_64 {dimension_numbers = #tpu.dot_dimension_numbers<[1], [0], [0], [1], [0, 0, 1, 1], [], []>} : vector<5x128xf32>, vector<128x256xf32>, vector<5x256xf32> -> vector<5x256xf32>
    %c2_65 = arith.constant 2 : index
    %c0_66 = arith.constant 0 : index
    %68 = tpu.strided_load %arg13[%c2_65, %c0_66] {strides = array<i32: 2, 1>} : memref<14x128xf32, #tpu.memory_space<vmem>>, vector<5x128xf32>
    %cst_67 = arith.constant dense<0.000000e+00> : vector<5x256xf32>
    %69 = tpu.matmul %68, %65, %cst_67 {dimension_numbers = #tpu.dot_dimension_numbers<[1], [0], [0], [1], [0, 0, 1, 1], [], []>} : vector<5x128xf32>, vector<128x256xf32>, vector<5x256xf32> -> vector<5x256xf32>
    %70 = arith.addf %61, %67 : vector<5x256xf32>
    %71 = arith.addf %63, %69 : vector<5x256xf32>
    %c2_68 = arith.constant 2 : index
    %c0_69 = arith.constant 0 : index
    %c0_70 = arith.constant 0 : index
    %72 = vector.load %arg3[%c2_68, %c0_69, %c0_70] : memref<5x128x256xf32, #tpu.memory_space<vmem>>, vector<1x128x256xf32>
    %73 = vector.shape_cast %72 : vector<1x128x256xf32> to vector<128x256xf32>
    %c2_71 = arith.constant 2 : index
    %c0_72 = arith.constant 0 : index
    %74 = tpu.strided_load %arg13[%c2_71, %c0_72] {strides = array<i32: 2, 1>} : memref<14x128xf32, #tpu.memory_space<vmem>>, vector<5x128xf32>
    %cst_73 = arith.constant dense<0.000000e+00> : vector<5x256xf32>
    %75 = tpu.matmul %74, %73, %cst_73 {dimension_numbers = #tpu.dot_dimension_numbers<[1], [0], [0], [1], [0, 0, 1, 1], [], []>} : vector<5x128xf32>, vector<128x256xf32>, vector<5x256xf32> -> vector<5x256xf32>
    %c3_74 = arith.constant 3 : index
    %c0_75 = arith.constant 0 : index
    %76 = tpu.strided_load %arg13[%c3_74, %c0_75] {strides = array<i32: 2, 1>} : memref<14x128xf32, #tpu.memory_space<vmem>>, vector<5x128xf32>
    %cst_76 = arith.constant dense<0.000000e+00> : vector<5x256xf32>
    %77 = tpu.matmul %76, %73, %cst_76 {dimension_numbers = #tpu.dot_dimension_numbers<[1], [0], [0], [1], [0, 0, 1, 1], [], []>} : vector<5x128xf32>, vector<128x256xf32>, vector<5x256xf32> -> vector<5x256xf32>
    %78 = arith.addf %70, %75 : vector<5x256xf32>
    %79 = arith.addf %71, %77 : vector<5x256xf32>
    %c3_77 = arith.constant 3 : index
    %c0_78 = arith.constant 0 : index
    %c0_79 = arith.constant 0 : index
    %80 = vector.load %arg3[%c3_77, %c0_78, %c0_79] : memref<5x128x256xf32, #tpu.memory_space<vmem>>, vector<1x128x256xf32>
    %81 = vector.shape_cast %80 : vector<1x128x256xf32> to vector<128x256xf32>
    %c3_80 = arith.constant 3 : index
    %c0_81 = arith.constant 0 : index
    %82 = tpu.strided_load %arg13[%c3_80, %c0_81] {strides = array<i32: 2, 1>} : memref<14x128xf32, #tpu.memory_space<vmem>>, vector<5x128xf32>
    %cst_82 = arith.constant dense<0.000000e+00> : vector<5x256xf32>
    %83 = tpu.matmul %82, %81, %cst_82 {dimension_numbers = #tpu.dot_dimension_numbers<[1], [0], [0], [1], [0, 0, 1, 1], [], []>} : vector<5x128xf32>, vector<128x256xf32>, vector<5x256xf32> -> vector<5x256xf32>
    %c4_83 = arith.constant 4 : index
    %c0_84 = arith.constant 0 : index
    %84 = tpu.strided_load %arg13[%c4_83, %c0_84] {strides = array<i32: 2, 1>} : memref<14x128xf32, #tpu.memory_space<vmem>>, vector<5x128xf32>
    %cst_85 = arith.constant dense<0.000000e+00> : vector<5x256xf32>
    %85 = tpu.matmul %84, %81, %cst_85 {dimension_numbers = #tpu.dot_dimension_numbers<[1], [0], [0], [1], [0, 0, 1, 1], [], []>} : vector<5x128xf32>, vector<128x256xf32>, vector<5x256xf32> -> vector<5x256xf32>
    %86 = arith.addf %78, %83 : vector<5x256xf32>
    %87 = arith.addf %79, %85 : vector<5x256xf32>
    %c4_86 = arith.constant 4 : index
    %c0_87 = arith.constant 0 : index
    %c0_88 = arith.constant 0 : index
    %88 = vector.load %arg3[%c4_86, %c0_87, %c0_88] : memref<5x128x256xf32, #tpu.memory_space<vmem>>, vector<1x128x256xf32>
    %89 = vector.shape_cast %88 : vector<1x128x256xf32> to vector<128x256xf32>
    %c4_89 = arith.constant 4 : index
    %c0_90 = arith.constant 0 : index
    %90 = tpu.strided_load %arg13[%c4_89, %c0_90] {strides = array<i32: 2, 1>} : memref<14x128xf32, #tpu.memory_space<vmem>>, vector<5x128xf32>
    %cst_91 = arith.constant dense<0.000000e+00> : vector<5x256xf32>
    %91 = tpu.matmul %90, %89, %cst_91 {dimension_numbers = #tpu.dot_dimension_numbers<[1], [0], [0], [1], [0, 0, 1, 1], [], []>} : vector<5x128xf32>, vector<128x256xf32>, vector<5x256xf32> -> vector<5x256xf32>
    %c5 = arith.constant 5 : index
    %c0_92 = arith.constant 0 : index
    %92 = tpu.strided_load %arg13[%c5, %c0_92] {strides = array<i32: 2, 1>} : memref<14x128xf32, #tpu.memory_space<vmem>>, vector<5x128xf32>
    %cst_93 = arith.constant dense<0.000000e+00> : vector<5x256xf32>
    %93 = tpu.matmul %92, %89, %cst_93 {dimension_numbers = #tpu.dot_dimension_numbers<[1], [0], [0], [1], [0, 0, 1, 1], [], []>} : vector<5x128xf32>, vector<128x256xf32>, vector<5x256xf32> -> vector<5x256xf32>
    %94 = arith.addf %86, %91 : vector<5x256xf32>
    %95 = arith.addf %87, %93 : vector<5x256xf32>
    %96 = vector.broadcast %1 : vector<1x256xf32> to vector<5x256xf32>
    %97 = arith.addf %94, %96 : vector<5x256xf32>
    %cst_94 = arith.constant 0.000000e+00 : f32
    %98 = vector.broadcast %cst_94 : f32 to vector<5x256xf32>
    %99 = arith.maximumf %97, %98 : vector<5x256xf32>
    %100 = vector.broadcast %1 : vector<1x256xf32> to vector<5x256xf32>
    %101 = arith.addf %95, %100 : vector<5x256xf32>
    %cst_95 = arith.constant 0.000000e+00 : f32
    %102 = vector.broadcast %cst_95 : f32 to vector<5x256xf32>
    %103 = arith.maximumf %101, %102 : vector<5x256xf32>
    %104 = arith.maximumf %99, %103 : vector<5x256xf32>
    %105 = vector.extract_strided_slice %104 {offsets = [0, 0], sizes = [5, 128], strides = [1, 1]} : vector<5x256xf32> to vector<5x128xf32>
    %106 = vector.extract_strided_slice %104 {offsets = [0, 128], sizes = [5, 128], strides = [1, 1]} : vector<5x256xf32> to vector<5x128xf32>
    %107 = arith.maximumf %105, %106 : vector<5x128xf32>
    %c0_96 = arith.constant 0 : index
    %c0_97 = arith.constant 0 : index
    %108 = vector.load %arg14[%c0_96, %c0_97] : memref<16x128xf32, #tpu.memory_space<vmem>>, vector<5x128xf32>
    tpu.vector_store %arg14[%c0_96, %c0_97], %107 {strides = array<i32>} : memref<16x128xf32, #tpu.memory_space<vmem>>, vector<5x128xf32>,
    %c1_98 = arith.constant 1 : index
    %c0_99 = arith.constant 0 : index
    %c0_100 = arith.constant 0 : index
    %c0_101 = arith.constant 0 : index
    %109 = vector.load %arg0[%c1_98, %c0_99, %c0_100, %c0_101] : memref<2x1x28x28xf32, #tpu.memory_space<vmem>>, vector<1x1x28x28xf32>
    %110 = vector.shape_cast %109 : vector<1x1x28x28xf32> to vector<28x28xf32>
    %c8_102 = arith.constant 8 : index
    %c0_103 = arith.constant 0 : index
    %111 = vector.load %arg12[%c8_102, %c0_103] : memref<40x28xf32, #tpu.memory_space<vmem>>, vector<28x28xf32>
    tpu.vector_store %arg12[%c8_102, %c0_103], %110 {strides = array<i32>} : memref<40x28xf32, #tpu.memory_space<vmem>>, vector<28x28xf32>,
    %c0_104 = arith.constant 0 : index
    %c0_105 = arith.constant 0 : index
    %c0_106 = arith.constant 0 : index
    %112 = vector.load %arg1[%c0_104, %c0_105, %c0_106] : memref<5x28x256xf32, #tpu.memory_space<vmem>>, vector<1x28x256xf32>
    %113 = vector.shape_cast %112 : vector<1x28x256xf32> to vector<28x256xf32>
    %c6_107 = arith.constant 6 : index
    %c0_108 = arith.constant 0 : index
    %114 = tpu.strided_load %arg12[%c6_107, %c0_108] {strides = array<i32: 2, 1>} : memref<40x28xf32, #tpu.memory_space<vmem>>, vector<14x28xf32>
    %cst_109 = arith.constant dense<0.000000e+00> : vector<14x256xf32>
    %115 = tpu.matmul %114, %113, %cst_109 {dimension_numbers = #tpu.dot_dimension_numbers<[1], [0], [0], [1], [0, 0, 1, 1], [], []>} : vector<14x28xf32>, vector<28x256xf32>, vector<14x256xf32> -> vector<14x256xf32>
    %c7_110 = arith.constant 7 : index
    %c0_111 = arith.constant 0 : index
    %116 = tpu.strided_load %arg12[%c7_110, %c0_111] {strides = array<i32: 2, 1>} : memref<40x28xf32, #tpu.memory_space<vmem>>, vector<14x28xf32>
    %cst_112 = arith.constant dense<0.000000e+00> : vector<14x256xf32>
    %117 = tpu.matmul %116, %113, %cst_112 {dimension_numbers = #tpu.dot_dimension_numbers<[1], [0], [0], [1], [0, 0, 1, 1], [], []>} : vector<14x28xf32>, vector<28x256xf32>, vector<14x256xf32> -> vector<14x256xf32>
    %c1_113 = arith.constant 1 : index
    %c0_114 = arith.constant 0 : index
    %c0_115 = arith.constant 0 : index
    %118 = vector.load %arg1[%c1_113, %c0_114, %c0_115] : memref<5x28x256xf32, #tpu.memory_space<vmem>>, vector<1x28x256xf32>
    %119 = vector.shape_cast %118 : vector<1x28x256xf32> to vector<28x256xf32>
    %c7_116 = arith.constant 7 : index
    %c0_117 = arith.constant 0 : index
    %120 = tpu.strided_load %arg12[%c7_116, %c0_117] {strides = array<i32: 2, 1>} : memref<40x28xf32, #tpu.memory_space<vmem>>, vector<14x28xf32>
    %cst_118 = arith.constant dense<0.000000e+00> : vector<14x256xf32>
    %121 = tpu.matmul %120, %119, %cst_118 {dimension_numbers = #tpu.dot_dimension_numbers<[1], [0], [0], [1], [0, 0, 1, 1], [], []>} : vector<14x28xf32>, vector<28x256xf32>, vector<14x256xf32> -> vector<14x256xf32>
    %c8_119 = arith.constant 8 : index
    %c0_120 = arith.constant 0 : index
    %122 = tpu.strided_load %arg12[%c8_119, %c0_120] {strides = array<i32: 2, 1>} : memref<40x28xf32, #tpu.memory_space<vmem>>, vector<14x28xf32>
    %cst_121 = arith.constant dense<0.000000e+00> : vector<14x256xf32>
    %123 = tpu.matmul %122, %119, %cst_121 {dimension_numbers = #tpu.dot_dimension_numbers<[1], [0], [0], [1], [0, 0, 1, 1], [], []>} : vector<14x28xf32>, vector<28x256xf32>, vector<14x256xf32> -> vector<14x256xf32>
    %124 = arith.addf %115, %121 : vector<14x256xf32>
    %125 = arith.addf %117, %123 : vector<14x256xf32>
    %c2_122 = arith.constant 2 : index
    %c0_123 = arith.constant 0 : index
    %c0_124 = arith.constant 0 : index
    %126 = vector.load %arg1[%c2_122, %c0_123, %c0_124] : memref<5x28x256xf32, #tpu.memory_space<vmem>>, vector<1x28x256xf32>
    %127 = vector.shape_cast %126 : vector<1x28x256xf32> to vector<28x256xf32>
    %c8_125 = arith.constant 8 : index
    %c0_126 = arith.constant 0 : index
    %128 = tpu.strided_load %arg12[%c8_125, %c0_126] {strides = array<i32: 2, 1>} : memref<40x28xf32, #tpu.memory_space<vmem>>, vector<14x28xf32>
    %cst_127 = arith.constant dense<0.000000e+00> : vector<14x256xf32>
    %129 = tpu.matmul %128, %127, %cst_127 {dimension_numbers = #tpu.dot_dimension_numbers<[1], [0], [0], [1], [0, 0, 1, 1], [], []>} : vector<14x28xf32>, vector<28x256xf32>, vector<14x256xf32> -> vector<14x256xf32>
    %c9_128 = arith.constant 9 : index
    %c0_129 = arith.constant 0 : index
    %130 = tpu.strided_load %arg12[%c9_128, %c0_129] {strides = array<i32: 2, 1>} : memref<40x28xf32, #tpu.memory_space<vmem>>, vector<14x28xf32>
    %cst_130 = arith.constant dense<0.000000e+00> : vector<14x256xf32>
    %131 = tpu.matmul %130, %127, %cst_130 {dimension_numbers = #tpu.dot_dimension_numbers<[1], [0], [0], [1], [0, 0, 1, 1], [], []>} : vector<14x28xf32>, vector<28x256xf32>, vector<14x256xf32> -> vector<14x256xf32>
    %132 = arith.addf %124, %129 : vector<14x256xf32>
    %133 = arith.addf %125, %131 : vector<14x256xf32>
    %c3_131 = arith.constant 3 : index
    %c0_132 = arith.constant 0 : index
    %c0_133 = arith.constant 0 : index
    %134 = vector.load %arg1[%c3_131, %c0_132, %c0_133] : memref<5x28x256xf32, #tpu.memory_space<vmem>>, vector<1x28x256xf32>
    %135 = vector.shape_cast %134 : vector<1x28x256xf32> to vector<28x256xf32>
    %c9_134 = arith.constant 9 : index
    %c0_135 = arith.constant 0 : index
    %136 = tpu.strided_load %arg12[%c9_134, %c0_135] {strides = array<i32: 2, 1>} : memref<40x28xf32, #tpu.memory_space<vmem>>, vector<14x28xf32>
    %cst_136 = arith.constant dense<0.000000e+00> : vector<14x256xf32>
    %137 = tpu.matmul %136, %135, %cst_136 {dimension_numbers = #tpu.dot_dimension_numbers<[1], [0], [0], [1], [0, 0, 1, 1], [], []>} : vector<14x28xf32>, vector<28x256xf32>, vector<14x256xf32> -> vector<14x256xf32>
    %c10_137 = arith.constant 10 : index
    %c0_138 = arith.constant 0 : index
    %138 = tpu.strided_load %arg12[%c10_137, %c0_138] {strides = array<i32: 2, 1>} : memref<40x28xf32, #tpu.memory_space<vmem>>, vector<14x28xf32>
    %cst_139 = arith.constant dense<0.000000e+00> : vector<14x256xf32>
    %139 = tpu.matmul %138, %135, %cst_139 {dimension_numbers = #tpu.dot_dimension_numbers<[1], [0], [0], [1], [0, 0, 1, 1], [], []>} : vector<14x28xf32>, vector<28x256xf32>, vector<14x256xf32> -> vector<14x256xf32>
    %140 = arith.addf %132, %137 : vector<14x256xf32>
    %141 = arith.addf %133, %139 : vector<14x256xf32>
    %c4_140 = arith.constant 4 : index
    %c0_141 = arith.constant 0 : index
    %c0_142 = arith.constant 0 : index
    %142 = vector.load %arg1[%c4_140, %c0_141, %c0_142] : memref<5x28x256xf32, #tpu.memory_space<vmem>>, vector<1x28x256xf32>
    %143 = vector.shape_cast %142 : vector<1x28x256xf32> to vector<28x256xf32>
    %c10_143 = arith.constant 10 : index
    %c0_144 = arith.constant 0 : index
    %144 = tpu.strided_load %arg12[%c10_143, %c0_144] {strides = array<i32: 2, 1>} : memref<40x28xf32, #tpu.memory_space<vmem>>, vector<14x28xf32>
    %cst_145 = arith.constant dense<0.000000e+00> : vector<14x256xf32>
    %145 = tpu.matmul %144, %143, %cst_145 {dimension_numbers = #tpu.dot_dimension_numbers<[1], [0], [0], [1], [0, 0, 1, 1], [], []>} : vector<14x28xf32>, vector<28x256xf32>, vector<14x256xf32> -> vector<14x256xf32>
    %c11_146 = arith.constant 11 : index
    %c0_147 = arith.constant 0 : index
    %146 = tpu.strided_load %arg12[%c11_146, %c0_147] {strides = array<i32: 2, 1>} : memref<40x28xf32, #tpu.memory_space<vmem>>, vector<14x28xf32>
    %cst_148 = arith.constant dense<0.000000e+00> : vector<14x256xf32>
    %147 = tpu.matmul %146, %143, %cst_148 {dimension_numbers = #tpu.dot_dimension_numbers<[1], [0], [0], [1], [0, 0, 1, 1], [], []>} : vector<14x28xf32>, vector<28x256xf32>, vector<14x256xf32> -> vector<14x256xf32>
    %148 = arith.addf %140, %145 : vector<14x256xf32>
    %149 = arith.addf %141, %147 : vector<14x256xf32>
    %150 = vector.broadcast %0 : vector<1x256xf32> to vector<14x256xf32>
    %151 = arith.addf %148, %150 : vector<14x256xf32>
    %cst_149 = arith.constant 0.000000e+00 : f32
    %152 = vector.broadcast %cst_149 : f32 to vector<14x256xf32>
    %153 = arith.maximumf %151, %152 : vector<14x256xf32>
    %154 = vector.broadcast %0 : vector<1x256xf32> to vector<14x256xf32>
    %155 = arith.addf %149, %154 : vector<14x256xf32>
    %cst_150 = arith.constant 0.000000e+00 : f32
    %156 = vector.broadcast %cst_150 : f32 to vector<14x256xf32>
    %157 = arith.maximumf %155, %156 : vector<14x256xf32>
    %158 = arith.maximumf %153, %157 : vector<14x256xf32>
    %159 = vector.extract_strided_slice %158 {offsets = [0, 0], sizes = [14, 128], strides = [1, 1]} : vector<14x256xf32> to vector<14x128xf32>
    %160 = vector.extract_strided_slice %158 {offsets = [0, 128], sizes = [14, 128], strides = [1, 1]} : vector<14x256xf32> to vector<14x128xf32>
    %161 = arith.maximumf %159, %160 : vector<14x128xf32>
    %c0_151 = arith.constant 0 : index
    %c0_152 = arith.constant 0 : index
    %162 = vector.load %arg13[%c0_151, %c0_152] : memref<14x128xf32, #tpu.memory_space<vmem>>, vector<14x128xf32>
    tpu.vector_store %arg13[%c0_151, %c0_152], %161 {strides = array<i32>} : memref<14x128xf32, #tpu.memory_space<vmem>>, vector<14x128xf32>,
    %c0_153 = arith.constant 0 : index
    %c0_154 = arith.constant 0 : index
    %c0_155 = arith.constant 0 : index
    %163 = vector.load %arg3[%c0_153, %c0_154, %c0_155] : memref<5x128x256xf32, #tpu.memory_space<vmem>>, vector<1x128x256xf32>
    %164 = vector.shape_cast %163 : vector<1x128x256xf32> to vector<128x256xf32>
    %c0_156 = arith.constant 0 : index
    %c0_157 = arith.constant 0 : index
    %165 = tpu.strided_load %arg13[%c0_156, %c0_157] {strides = array<i32: 2, 1>} : memref<14x128xf32, #tpu.memory_space<vmem>>, vector<5x128xf32>
    %cst_158 = arith.constant dense<0.000000e+00> : vector<5x256xf32>
    %166 = tpu.matmul %165, %164, %cst_158 {dimension_numbers = #tpu.dot_dimension_numbers<[1], [0], [0], [1], [0, 0, 1, 1], [], []>} : vector<5x128xf32>, vector<128x256xf32>, vector<5x256xf32> -> vector<5x256xf32>
    %c1_159 = arith.constant 1 : index
    %c0_160 = arith.constant 0 : index
    %167 = tpu.strided_load %arg13[%c1_159, %c0_160] {strides = array<i32: 2, 1>} : memref<14x128xf32, #tpu.memory_space<vmem>>, vector<5x128xf32>
    %cst_161 = arith.constant dense<0.000000e+00> : vector<5x256xf32>
    %168 = tpu.matmul %167, %164, %cst_161 {dimension_numbers = #tpu.dot_dimension_numbers<[1], [0], [0], [1], [0, 0, 1, 1], [], []>} : vector<5x128xf32>, vector<128x256xf32>, vector<5x256xf32> -> vector<5x256xf32>
    %c1_162 = arith.constant 1 : index
    %c0_163 = arith.constant 0 : index
    %c0_164 = arith.constant 0 : index
    %169 = vector.load %arg3[%c1_162, %c0_163, %c0_164] : memref<5x128x256xf32, #tpu.memory_space<vmem>>, vector<1x128x256xf32>
    %170 = vector.shape_cast %169 : vector<1x128x256xf32> to vector<128x256xf32>
    %c1_165 = arith.constant 1 : index
    %c0_166 = arith.constant 0 : index
    %171 = tpu.strided_load %arg13[%c1_165, %c0_166] {strides = array<i32: 2, 1>} : memref<14x128xf32, #tpu.memory_space<vmem>>, vector<5x128xf32>
    %cst_167 = arith.constant dense<0.000000e+00> : vector<5x256xf32>
    %172 = tpu.matmul %171, %170, %cst_167 {dimension_numbers = #tpu.dot_dimension_numbers<[1], [0], [0], [1], [0, 0, 1, 1], [], []>} : vector<5x128xf32>, vector<128x256xf32>, vector<5x256xf32> -> vector<5x256xf32>
    %c2_168 = arith.constant 2 : index
    %c0_169 = arith.constant 0 : index
    %173 = tpu.strided_load %arg13[%c2_168, %c0_169] {strides = array<i32: 2, 1>} : memref<14x128xf32, #tpu.memory_space<vmem>>, vector<5x128xf32>
    %cst_170 = arith.constant dense<0.000000e+00> : vector<5x256xf32>
    %174 = tpu.matmul %173, %170, %cst_170 {dimension_numbers = #tpu.dot_dimension_numbers<[1], [0], [0], [1], [0, 0, 1, 1], [], []>} : vector<5x128xf32>, vector<128x256xf32>, vector<5x256xf32> -> vector<5x256xf32>
    %175 = arith.addf %166, %172 : vector<5x256xf32>
    %176 = arith.addf %168, %174 : vector<5x256xf32>
    %c2_171 = arith.constant 2 : index
    %c0_172 = arith.constant 0 : index
    %c0_173 = arith.constant 0 : index
    %177 = vector.load %arg3[%c2_171, %c0_172, %c0_173] : memref<5x128x256xf32, #tpu.memory_space<vmem>>, vector<1x128x256xf32>
    %178 = vector.shape_cast %177 : vector<1x128x256xf32> to vector<128x256xf32>
    %c2_174 = arith.constant 2 : index
    %c0_175 = arith.constant 0 : index
    %179 = tpu.strided_load %arg13[%c2_174, %c0_175] {strides = array<i32: 2, 1>} : memref<14x128xf32, #tpu.memory_space<vmem>>, vector<5x128xf32>
    %cst_176 = arith.constant dense<0.000000e+00> : vector<5x256xf32>
    %180 = tpu.matmul %179, %178, %cst_176 {dimension_numbers = #tpu.dot_dimension_numbers<[1], [0], [0], [1], [0, 0, 1, 1], [], []>} : vector<5x128xf32>, vector<128x256xf32>, vector<5x256xf32> -> vector<5x256xf32>
    %c3_177 = arith.constant 3 : index
    %c0_178 = arith.constant 0 : index
    %181 = tpu.strided_load %arg13[%c3_177, %c0_178] {strides = array<i32: 2, 1>} : memref<14x128xf32, #tpu.memory_space<vmem>>, vector<5x128xf32>
    %cst_179 = arith.constant dense<0.000000e+00> : vector<5x256xf32>
    %182 = tpu.matmul %181, %178, %cst_179 {dimension_numbers = #tpu.dot_dimension_numbers<[1], [0], [0], [1], [0, 0, 1, 1], [], []>} : vector<5x128xf32>, vector<128x256xf32>, vector<5x256xf32> -> vector<5x256xf32>
    %183 = arith.addf %175, %180 : vector<5x256xf32>
    %184 = arith.addf %176, %182 : vector<5x256xf32>
    %c3_180 = arith.constant 3 : index
    %c0_181 = arith.constant 0 : index
    %c0_182 = arith.constant 0 : index
    %185 = vector.load %arg3[%c3_180, %c0_181, %c0_182] : memref<5x128x256xf32, #tpu.memory_space<vmem>>, vector<1x128x256xf32>
    %186 = vector.shape_cast %185 : vector<1x128x256xf32> to vector<128x256xf32>
    %c3_183 = arith.constant 3 : index
    %c0_184 = arith.constant 0 : index
    %187 = tpu.strided_load %arg13[%c3_183, %c0_184] {strides = array<i32: 2, 1>} : memref<14x128xf32, #tpu.memory_space<vmem>>, vector<5x128xf32>
    %cst_185 = arith.constant dense<0.000000e+00> : vector<5x256xf32>
    %188 = tpu.matmul %187, %186, %cst_185 {dimension_numbers = #tpu.dot_dimension_numbers<[1], [0], [0], [1], [0, 0, 1, 1], [], []>} : vector<5x128xf32>, vector<128x256xf32>, vector<5x256xf32> -> vector<5x256xf32>
    %c4_186 = arith.constant 4 : index
    %c0_187 = arith.constant 0 : index
    %189 = tpu.strided_load %arg13[%c4_186, %c0_187] {strides = array<i32: 2, 1>} : memref<14x128xf32, #tpu.memory_space<vmem>>, vector<5x128xf32>
    %cst_188 = arith.constant dense<0.000000e+00> : vector<5x256xf32>
    %190 = tpu.matmul %189, %186, %cst_188 {dimension_numbers = #tpu.dot_dimension_numbers<[1], [0], [0], [1], [0, 0, 1, 1], [], []>} : vector<5x128xf32>, vector<128x256xf32>, vector<5x256xf32> -> vector<5x256xf32>
    %191 = arith.addf %183, %188 : vector<5x256xf32>
    %192 = arith.addf %184, %190 : vector<5x256xf32>
    %c4_189 = arith.constant 4 : index
    %c0_190 = arith.constant 0 : index
    %c0_191 = arith.constant 0 : index
    %193 = vector.load %arg3[%c4_189, %c0_190, %c0_191] : memref<5x128x256xf32, #tpu.memory_space<vmem>>, vector<1x128x256xf32>
    %194 = vector.shape_cast %193 : vector<1x128x256xf32> to vector<128x256xf32>
    %c4_192 = arith.constant 4 : index
    %c0_193 = arith.constant 0 : index
    %195 = tpu.strided_load %arg13[%c4_192, %c0_193] {strides = array<i32: 2, 1>} : memref<14x128xf32, #tpu.memory_space<vmem>>, vector<5x128xf32>
    %cst_194 = arith.constant dense<0.000000e+00> : vector<5x256xf32>
    %196 = tpu.matmul %195, %194, %cst_194 {dimension_numbers = #tpu.dot_dimension_numbers<[1], [0], [0], [1], [0, 0, 1, 1], [], []>} : vector<5x128xf32>, vector<128x256xf32>, vector<5x256xf32> -> vector<5x256xf32>
    %c5_195 = arith.constant 5 : index
    %c0_196 = arith.constant 0 : index
    %197 = tpu.strided_load %arg13[%c5_195, %c0_196] {strides = array<i32: 2, 1>} : memref<14x128xf32, #tpu.memory_space<vmem>>, vector<5x128xf32>
    %cst_197 = arith.constant dense<0.000000e+00> : vector<5x256xf32>
    %198 = tpu.matmul %197, %194, %cst_197 {dimension_numbers = #tpu.dot_dimension_numbers<[1], [0], [0], [1], [0, 0, 1, 1], [], []>} : vector<5x128xf32>, vector<128x256xf32>, vector<5x256xf32> -> vector<5x256xf32>
    %199 = arith.addf %191, %196 : vector<5x256xf32>
    %200 = arith.addf %192, %198 : vector<5x256xf32>
    %201 = vector.broadcast %1 : vector<1x256xf32> to vector<5x256xf32>
    %202 = arith.addf %199, %201 : vector<5x256xf32>
    %cst_198 = arith.constant 0.000000e+00 : f32
    %203 = vector.broadcast %cst_198 : f32 to vector<5x256xf32>
    %204 = arith.maximumf %202, %203 : vector<5x256xf32>
    %205 = vector.broadcast %1 : vector<1x256xf32> to vector<5x256xf32>
    %206 = arith.addf %200, %205 : vector<5x256xf32>
    %cst_199 = arith.constant 0.000000e+00 : f32
    %207 = vector.broadcast %cst_199 : f32 to vector<5x256xf32>
    %208 = arith.maximumf %206, %207 : vector<5x256xf32>
    %209 = arith.maximumf %204, %208 : vector<5x256xf32>
    %210 = vector.extract_strided_slice %209 {offsets = [0, 0], sizes = [5, 128], strides = [1, 1]} : vector<5x256xf32> to vector<5x128xf32>
    %211 = vector.extract_strided_slice %209 {offsets = [0, 128], sizes = [5, 128], strides = [1, 1]} : vector<5x256xf32> to vector<5x128xf32>
    %212 = arith.maximumf %210, %211 : vector<5x128xf32>
    %c8_200 = arith.constant 8 : index
    %c0_201 = arith.constant 0 : index
    %213 = vector.load %arg14[%c8_200, %c0_201] : memref<16x128xf32, #tpu.memory_space<vmem>>, vector<5x128xf32>
    tpu.vector_store %arg14[%c8_200, %c0_201], %212 {strides = array<i32>} : memref<16x128xf32, #tpu.memory_space<vmem>>, vector<5x128xf32>,
    %c0_202 = arith.constant 0 : index
    %c0_203 = arith.constant 0 : index
    %214 = tpu.strided_load %arg14[%c0_202, %c0_203] {strides = array<i32: 8, 1>} : memref<16x128xf32, #tpu.memory_space<vmem>>, vector<2x128xf32>
    %c0_204 = arith.constant 0 : index
    %c0_205 = arith.constant 0 : index
    %c0_206 = arith.constant 0 : index
    %215 = vector.load %arg5[%c0_204, %c0_205, %c0_206] : memref<5x128x120xf32, #tpu.memory_space<vmem>>, vector<1x128x120xf32>
    %216 = vector.shape_cast %215 : vector<1x128x120xf32> to vector<128x120xf32>
    %cst_207 = arith.constant dense<0.000000e+00> : vector<2x120xf32>
    %217 = tpu.matmul %214, %216, %cst_207 {dimension_numbers = #tpu.dot_dimension_numbers<[1], [0], [0], [1], [0, 0, 1, 1], [], []>} : vector<2x128xf32>, vector<128x120xf32>, vector<2x120xf32> -> vector<2x120xf32>
    %c1_208 = arith.constant 1 : index
    %c0_209 = arith.constant 0 : index
    %218 = tpu.strided_load %arg14[%c1_208, %c0_209] {strides = array<i32: 8, 1>} : memref<16x128xf32, #tpu.memory_space<vmem>>, vector<2x128xf32>
    %c1_210 = arith.constant 1 : index
    %c0_211 = arith.constant 0 : index
    %c0_212 = arith.constant 0 : index
    %219 = vector.load %arg5[%c1_210, %c0_211, %c0_212] : memref<5x128x120xf32, #tpu.memory_space<vmem>>, vector<1x128x120xf32>
    %220 = vector.shape_cast %219 : vector<1x128x120xf32> to vector<128x120xf32>
    %cst_213 = arith.constant dense<0.000000e+00> : vector<2x120xf32>
    %221 = tpu.matmul %218, %220, %cst_213 {dimension_numbers = #tpu.dot_dimension_numbers<[1], [0], [0], [1], [0, 0, 1, 1], [], []>} : vector<2x128xf32>, vector<128x120xf32>, vector<2x120xf32> -> vector<2x120xf32>
    %222 = arith.addf %217, %221 : vector<2x120xf32>
    %c2_214 = arith.constant 2 : index
    %c0_215 = arith.constant 0 : index
    %223 = tpu.strided_load %arg14[%c2_214, %c0_215] {strides = array<i32: 8, 1>} : memref<16x128xf32, #tpu.memory_space<vmem>>, vector<2x128xf32>
    %c2_216 = arith.constant 2 : index
    %c0_217 = arith.constant 0 : index
    %c0_218 = arith.constant 0 : index
    %224 = vector.load %arg5[%c2_216, %c0_217, %c0_218] : memref<5x128x120xf32, #tpu.memory_space<vmem>>, vector<1x128x120xf32>
    %225 = vector.shape_cast %224 : vector<1x128x120xf32> to vector<128x120xf32>
    %cst_219 = arith.constant dense<0.000000e+00> : vector<2x120xf32>
    %226 = tpu.matmul %223, %225, %cst_219 {dimension_numbers = #tpu.dot_dimension_numbers<[1], [0], [0], [1], [0, 0, 1, 1], [], []>} : vector<2x128xf32>, vector<128x120xf32>, vector<2x120xf32> -> vector<2x120xf32>
    %227 = arith.addf %222, %226 : vector<2x120xf32>
    %c3_220 = arith.constant 3 : index
    %c0_221 = arith.constant 0 : index
    %228 = tpu.strided_load %arg14[%c3_220, %c0_221] {strides = array<i32: 8, 1>} : memref<16x128xf32, #tpu.memory_space<vmem>>, vector<2x128xf32>
    %c3_222 = arith.constant 3 : index
    %c0_223 = arith.constant 0 : index
    %c0_224 = arith.constant 0 : index
    %229 = vector.load %arg5[%c3_222, %c0_223, %c0_224] : memref<5x128x120xf32, #tpu.memory_space<vmem>>, vector<1x128x120xf32>
    %230 = vector.shape_cast %229 : vector<1x128x120xf32> to vector<128x120xf32>
    %cst_225 = arith.constant dense<0.000000e+00> : vector<2x120xf32>
    %231 = tpu.matmul %228, %230, %cst_225 {dimension_numbers = #tpu.dot_dimension_numbers<[1], [0], [0], [1], [0, 0, 1, 1], [], []>} : vector<2x128xf32>, vector<128x120xf32>, vector<2x120xf32> -> vector<2x120xf32>
    %232 = arith.addf %227, %231 : vector<2x120xf32>
    %c4_226 = arith.constant 4 : index
    %c0_227 = arith.constant 0 : index
    %233 = tpu.strided_load %arg14[%c4_226, %c0_227] {strides = array<i32: 8, 1>} : memref<16x128xf32, #tpu.memory_space<vmem>>, vector<2x128xf32>
    %c4_228 = arith.constant 4 : index
    %c0_229 = arith.constant 0 : index
    %c0_230 = arith.constant 0 : index
    %234 = vector.load %arg5[%c4_228, %c0_229, %c0_230] : memref<5x128x120xf32, #tpu.memory_space<vmem>>, vector<1x128x120xf32>
    %235 = vector.shape_cast %234 : vector<1x128x120xf32> to vector<128x120xf32>
    %cst_231 = arith.constant dense<0.000000e+00> : vector<2x120xf32>
    %236 = tpu.matmul %233, %235, %cst_231 {dimension_numbers = #tpu.dot_dimension_numbers<[1], [0], [0], [1], [0, 0, 1, 1], [], []>} : vector<2x128xf32>, vector<128x120xf32>, vector<2x120xf32> -> vector<2x120xf32>
    %237 = arith.addf %232, %236 : vector<2x120xf32>
    %c0_232 = arith.constant 0 : index
    %c0_233 = arith.constant 0 : index
    %238 = vector.load %arg6[%c0_232, %c0_233] : memref<1x120xf32, #tpu.memory_space<vmem>>, vector<1x120xf32>
    %239 = vector.broadcast %238 : vector<1x120xf32> to vector<2x120xf32>
    %240 = arith.addf %237, %239 : vector<2x120xf32>
    %cst_234 = arith.constant 0.000000e+00 : f32
    %241 = vector.broadcast %cst_234 : f32 to vector<2x120xf32>
    %242 = arith.maximumf %240, %241 : vector<2x120xf32>
    %c0_235 = arith.constant 0 : index
    %c0_236 = arith.constant 0 : index
    %243 = vector.load %arg7[%c0_235, %c0_236] : memref<120x84xf32, #tpu.memory_space<vmem>>, vector<120x84xf32>
    %cst_237 = arith.constant dense<0.000000e+00> : vector<2x84xf32>
    %244 = tpu.matmul %242, %243, %cst_237 {dimension_numbers = #tpu.dot_dimension_numbers<[1], [0], [0], [1], [0, 0, 1, 1], [], []>} : vector<2x120xf32>, vector<120x84xf32>, vector<2x84xf32> -> vector<2x84xf32>
    %c0_238 = arith.constant 0 : index
    %c0_239 = arith.constant 0 : index
    %245 = vector.load %arg8[%c0_238, %c0_239] : memref<1x84xf32, #tpu.memory_space<vmem>>, vector<1x84xf32>
    %246 = vector.broadcast %245 : vector<1x84xf32> to vector<2x84xf32>
    %247 = arith.addf %244, %246 : vector<2x84xf32>
    %cst_240 = arith.constant 0.000000e+00 : f32
    %248 = vector.broadcast %cst_240 : f32 to vector<2x84xf32>
    %249 = arith.maximumf %247, %248 : vector<2x84xf32>
    %c0_241 = arith.constant 0 : index
    %c0_242 = arith.constant 0 : index
    %250 = vector.load %arg9[%c0_241, %c0_242] : memref<84x10xf32, #tpu.memory_space<vmem>>, vector<84x10xf32>
    %cst_243 = arith.constant dense<0.000000e+00> : vector<2x10xf32>
    %251 = tpu.matmul %249, %250, %cst_243 {dimension_numbers = #tpu.dot_dimension_numbers<[1], [0], [0], [1], [0, 0, 1, 1], [], []>} : vector<2x84xf32>, vector<84x10xf32>, vector<2x10xf32> -> vector<2x10xf32>
    %c0_244 = arith.constant 0 : index
    %c0_245 = arith.constant 0 : index
    %252 = vector.load %arg10[%c0_244, %c0_245] : memref<1x10xf32, #tpu.memory_space<vmem>>, vector<1x10xf32>
    %253 = vector.broadcast %252 : vector<1x10xf32> to vector<2x10xf32>
    %254 = arith.addf %251, %253 : vector<2x10xf32>
    %255 = vector.shape_cast %254 : vector<2x10xf32> to vector<1x2x10xf32>
    %cst_246 = arith.constant dense<0.000000e+00> : vector<1xf32>
    %256 = vector.multi_reduction <add>, %255, %cst_246 [1, 2] : vector<1x2x10xf32> to vector<1xf32>
    %257 = vector.shape_cast %256 : vector<1xf32> to vector<1x1x1xf32>
    %258 = vector.extract %257[0, 0, 0] : f32 from vector<1x1x1xf32>
    %cst_247 = arith.constant 0.000000e+00 : f32
    %259 = arith.cmpf ogt, %258, %cst_247 : f32
    %cst_248 = arith.constant 1.000000e+00 : f32
    %cst_249 = arith.constant -1.000000e+00 : f32
    %260 = arith.select %259, %cst_248, %cst_249 : f32
    %261 = vector.broadcast %260 : f32 to vector<2x10xf32>
    %262 = arith.mulf %254, %261 : vector<2x10xf32>
    %c0_250 = arith.constant 0 : index
    %c0_251 = arith.constant 0 : index
    %263 = vector.load %arg11[%c0_250, %c0_251] : memref<2x10xf32, #tpu.memory_space<vmem>>, vector<2x10xf32>
    tpu.vector_store %arg11[%c0_250, %c0_251], %262 {strides = array<i32>} : memref<2x10xf32, #tpu.memory_space<vmem>>, vector<2x10xf32>,
    return
  }
}

</mosaic_0001>

<bundles_post_ra>
// kernel: lenet5_pos_forward.1
= control target key start
LH: loop header
LB: loop body
LE: loop exit
PB: predicated region body
PF: predicated region fallthrough
CT: control target
= control target key end

     0   :  { %16 = vsyncpa [#allocation6], 0  ;;  %s8645_s0 = inlined_call_operand.vmem [shape: f32[2,1,28,28], index: 0, kind: input, shape index: {}]   ;;  %s8646_s1 = inlined_call_operand.vmem [shape: f32[5,28,256], index: 1, kind: input, shape index: {}]   ;;  %s8647_s2 = inlined_call_operand.vmem [shape: f32[1,256], index: 2, kind: input, shape index: {}]   ;;  %s8648_s3 = inlined_call_operand.vmem [shape: f32[5,128,256], index: 3, kind: input, shape index: {}]   ;;  %s8649_s4 = inlined_call_operand.hbm [shape: f32[1,256], index: 4, kind: input, shape index: {}]   ;;  %s8650_s5 = inlined_call_operand.vmem [shape: f32[5,128,120], index: 5, kind: input, shape index: {}]   ;;  %s8651_s6 = inlined_call_operand.hbm [shape: f32[1,120], index: 6, kind: input, shape index: {}]   ;;  %s8652_s7 = inlined_call_operand.vmem [shape: f32[120,84], index: 7, kind: input, shape index: {}]   ;;  %s8653_s8 = inlined_call_operand.hbm [shape: f32[1,84], index: 8, kind: input, shape index: {}]   ;;  %s8654_s9 = inlined_call_operand.vmem [shape: f32[84,10], index: 9, kind: input, shape index: {}]   ;;  %s8655_s10 = inlined_call_operand.hbm [shape: f32[1,10], index: 10, kind: input, shape index: {}]   ;;  %s8656_s11 = inlined_call_operand.hbm [shape: f32[2,10], index: 11, kind: output, shape index: {}]  }
   0x1   :  { %17 = vsyncpa [#allocation9], 0 }
   0x2   :  { %18 = vsyncpa [#allocation12], 0 }
   0x3   :  { %19 = vsyncpa [#allocation7], 0  ;;  %s6553_s17 = smov [#allocation8]   ;;  %s6554_s19 = smov [#allocation5]  }
   0x4   :  { %s46_s18 = sshll.u32 %s6553_s17, 4  ;;  %s34_s20 = sshll.u32 %s6554_s19, 4  ;;  %s47_s18 = int_to_ptr.vmem [resolvable:$true] %s46_s18  ;;  %s35_s20 = int_to_ptr.vmem [resolvable:$true] %s34_s20 }
   0x5   :  { %s6435_s23 = scalar_lea.hbm %s8651_s6, 16 }
   0x6   :  { %p6436_p0 = scmp.ne.s32.totalorder %s8651_s6, %s6435_s23  ;;  %p6439_p1 = scmp.lt.u32.totalorder %s6435_s23, %s8651_s6 }
   0x8   :  { %p6441_p2 = pnand %p6439_p1, %p6436_p0 }
   0xa   :  { %6444 = shalt.err (!%p6441_p2)
}
   0xb   :  { %s6445_s28 = scalar_lea.vmem %s47_s18, 16  ;;  %s6449_s29 = scalar_lea.vmem %s47_s18, 32 }
   0xc   :  { %p6446_p3 = scmp.ne.s32.totalorder %s47_s18, %s6445_s28  ;;  %p6450_p4 = scmp.lt.s32.totalorder %s47_s18, %s47_s18 }
   0xd   :  { %p6451_p5 = scmp.lt.s32.totalorder %s6449_s29, %s6445_s28 }
   0xf   :  { %p6452_p6 = por %p6451_p5, %p6450_p4 }
  0x11   :  { %p6453_p7 = pnand %p6452_p6, %p6446_p3 }
  0x13   :  { %6456 = shalt.err (!%p6453_p7)
}
  0x14   :  { %49 = dma.hbm_to_vmem [thread:$0]  %s8651_s6, 16, %s47_s18, [#allocation9]  }
  0x15   :  { %s6457_s15 = scalar_lea.hbm %s8649_s4, 32 }
  0x16   :  { %p6458_p8 = scmp.ne.s32.totalorder %s8649_s4, %s6457_s15  ;;  %p6461_p9 = scmp.lt.u32.totalorder %s6457_s15, %s8649_s4 }
  0x18   :  { %p6463_p10 = pnand %p6461_p9, %p6458_p8 }
  0x1a   :  { %6466 = shalt.err (!%p6463_p10)
}
  0x1b   :  { %s6467_s22 = scalar_lea.vmem %s35_s20, 32  ;;  %p6472_p12 = scmp.lt.s32.totalorder %s35_s20, %s35_s20 }
  0x1c   :  { %p6468_p11 = scmp.ne.s32.totalorder %s35_s20, %s6467_s22  ;;  %p6473_p13 = scmp.lt.s32.totalorder %s6467_s22, %s6467_s22 }
  0x1e   :  { %p6474_p0 = por %p6473_p13, %p6472_p12 }
  0x20   :  { %p6475_p1 = pnand %p6474_p0, %p6468_p11 }
  0x22   :  { %6478 = shalt.err (!%p6475_p1)
}
  0x23   :  { %37 = dma.hbm_to_vmem [thread:$0]  %s8649_s4, 32, %s35_s20, [#allocation6]  }
  0x24   :  { %s6555_s23 = smov [#allocation10]   ;;  %s6556_s25 = smov [#allocation11]  }
  0x25   :  { %s58_s24 = sshll.u32 %s6555_s23, 4  ;;  %s70_s26 = sshll.u32 %s6556_s25, 4  ;;  %s59_s24 = int_to_ptr.vmem [resolvable:$true] %s58_s24  ;;  %s71_s26 = int_to_ptr.vmem [resolvable:$true] %s70_s26 }
  0x26   :  { %s6479_s29 = scalar_lea.hbm %s8653_s8, 16 }
  0x27   :  { %p6480_p2 = scmp.ne.s32.totalorder %s8653_s8, %s6479_s29  ;;  %p6483_p3 = scmp.lt.u32.totalorder %s6479_s29, %s8653_s8 }
  0x29   :  { %p6485_p4 = pnand %p6483_p3, %p6480_p2 }
  0x2b   :  { %6488 = shalt.err (!%p6485_p4)
}
  0x2c   :  { %s6489_s4 = scalar_lea.vmem %s59_s24, 16  ;;  %s6493_s20 = scalar_lea.vmem %s59_s24, 32 }
  0x2d   :  { %p6490_p5 = scmp.ne.s32.totalorder %s59_s24, %s6489_s4  ;;  %p6494_p6 = scmp.lt.s32.totalorder %s59_s24, %s59_s24 }
  0x2e   :  { %p6495_p7 = scmp.lt.s32.totalorder %s6493_s20, %s6489_s4 }
  0x30   :  { %p6496_p8 = por %p6495_p7, %p6494_p6 }
  0x32   :  { %p6497_p9 = pnand %p6496_p8, %p6490_p5 }
  0x34   :  { %6500 = shalt.err (!%p6497_p9)
}
  0x35   :  { %61 = dma.hbm_to_vmem [thread:$0]  %s8653_s8, 16, %s59_s24, [#allocation9]  }
  0x36   :  { %s6501_s21 = scalar_lea.hbm %s8655_s10, 16 }
  0x37   :  { %p6502_p10 = scmp.ne.s32.totalorder %s8655_s10, %s6501_s21  ;;  %p6505_p11 = scmp.lt.u32.totalorder %s6501_s21, %s8655_s10 }
  0x39   :  { %p6507_p12 = pnand %p6505_p11, %p6502_p10 }
  0x3b   :  { %6510 = shalt.err (!%p6507_p12)
}
  0x3c   :  { %s6511_s25 = scalar_lea.vmem %s71_s26, 16  ;;  %s6515_s27 = scalar_lea.vmem %s71_s26, 32 }
  0x3d   :  { %p6512_p13 = scmp.ne.s32.totalorder %s71_s26, %s6511_s25  ;;  %p6516_p0 = scmp.lt.s32.totalorder %s71_s26, %s71_s26 }
  0x3e   :  { %p6517_p1 = scmp.lt.s32.totalorder %s6515_s27, %s6511_s25 }
  0x40   :  { %p6518_p2 = por %p6517_p1, %p6516_p0 }
  0x42   :  { %p6519_p3 = pnand %p6518_p2, %p6512_p13 }
  0x44   :  { %6522 = shalt.err (!%p6519_p3)
}
  0x45   :  { %73 = dma.hbm_to_vmem [thread:$0]  %s8655_s10, 16, %s71_s26, [#allocation12]  }
  0x46   :  { %6545 = dma.done.wait [#allocation6], 32  }
  0x47   :  { %6546 = vsyncadd [#allocation6], 4294967264 }
  0x48   :  { %6547 = dma.done.wait [#allocation9], 32  }
  0x49   :  { %6548 = vsyncadd [#allocation9], 4294967264 }
  0x4a   :  { %6549 = dma.done.wait [#allocation12], 16  }
  0x4b   :  { %6550 = vsyncadd [#allocation12], 4294967280  ;;  %vm88_vm0 = vcmask 228352   ;;  %v6557_v0 = vmov 0.0   ;;  %vm134_vm1 = vcmask 1043456   ;;  %vm6558_vm2 = vmmov 1  }
  0x4c   :  { %205 = vmatprep.mubr.f32.mxu0 %v6557_v0  ;;  %458 = vmatprep.mubr.f32.mxu1 %v6557_v0  ;;  %89 = vst.msk [vmem:[#allocation2] sm:$0xff] %vm88_vm0, %v6557_v0  ;;  %90 = vst.msk [vmem:[#allocation2 + $0x8] sm:$0xff] %vm88_vm0, %v6557_v0  ;;  %v4513_v2 = vld [vmem:[%s8646_s1 + $0x48] sm:$0xff]  ;;  %v4515_v3 = vld [vmem:[%s8646_s1 + $0x58] sm:$0xff]  ;;  %vm101_vm4 = vcmask 224256   ;;  %vm6560_vm5 = vmmov 0  }
  0x4d   :  { %91 = vst.msk [vmem:[#allocation2 + $0x10] sm:$0xff] %vm88_vm0, %v6557_v0  ;;  %92 = vst.msk [vmem:[#allocation2 + $0x18] sm:$0xff] %vm88_vm0, %v6557_v0  ;;  %v104_v4 = vld [vmem:[%s8646_s1 + $0x8] sm:$0xff]  ;;  %v5332_v5 = vpack.c.bf16 %v4515_v3, %v4513_v2  ;;  %v106_v6 = vld [vmem:[%s8646_s1 + $0x18] sm:$0xff]  ;;  %vm4309_vm6 = vcmask 982016   ;;  %vm4402_vm7 = vcmask 687104  }
  0x4e   :  { %93 = vst.msk [vmem:[#allocation2 + $0x20] sm:$0xff] %vm88_vm0, %v6557_v0  ;;  %vm6683_vm3 = vmpackc.low %vm134_vm1, %vm6558_vm2  ;;  %v4512_v7 = vld [vmem:[%s8646_s1 + $0x40] sm:$0xff]  ;;  %v4514_v8 = vld [vmem:[%s8646_s1 + $0x50] sm:$0xff]  ;;  %v6705_v9 = vpack.c.bf16 %v106_v6, %v104_v4  ;;  %vm4479_vm8 = vcmask 74752   ;;  %s6561_s16 = smov [#allocation13]  }
  0x4f   :  { %v5334_v10 = vpack.c.bf16 %v4514_v8, %v4512_v7  ;;  %v103_v11 = vld [vmem:[%s8646_s1] sm:$0xff]  ;;  %v105_v12 = vld [vmem:[%s8646_s1 + $0x10] sm:$0xff]  ;;  %v4517_v13 = vld [vmem:[%s8646_s1 + $0x68] sm:$0xff]  ;;  %5333 = vmatprep.subr.bf16.mxu0 %v5332_v5  ;;  %s4501_s17 = sshll.u32 %s6561_s16, 4  ;;  %s4502_s17 = int_to_ptr.vmem [resolvable:$true] %s4501_s17 }
  0x50   :  { %v6716_v14 = vpack.c.bf16 %v105_v12, %v103_v11  ;;  %v4519_v15 = vld [vmem:[%s8646_s1 + $0x78] sm:$0xf]  ;;  %v108_v16 = vld [vmem:[%s8646_s1 + $0x28] sm:$0xff]  ;;  %5363 = vmatprep.subr.bf16.mxu1 %v6705_v9  ;;  %v4516_v20 = vld [vmem:[%s8646_s1 + $0x60] sm:$0xff]  ;;  %s6523_s21 = scalar_lea.vmem %s4502_s17, 32  ;;  %p6528_p6 = scmp.lt.s32.totalorder %s4502_s17, %s4502_s17 }
  0x51   :  { %v110_v17 = vld [vmem:[%s8646_s1 + $0x38] sm:$0xf]  ;;  %5335 = vmatpush1.bf16.msra.mxu0 %v5334_v10  ;;  %v5336_v18 = vpack.c.bf16 %v4519_v15, %v4517_v13  ;;  %v4518_v21 = vld [vmem:[%s8646_s1 + $0x70] sm:$0xf]  ;;  %v107_v22 = vld [vmem:[%s8646_s1 + $0x20] sm:$0xff]  ;;  %p6524_p5 = scmp.ne.s32.totalorder %s4502_s17, %s6523_s21  ;;  %p6529_p7 = scmp.lt.s32.totalorder %s6523_s21, %s6523_s21 }
  0x52   :  { %v6728_v19 = vpack.c.bf16 %v110_v17, %v108_v16  ;;  %5365 = vmatpush1.bf16.msra.mxu1 %v6716_v14  ;;  %v5339_v23 = vpack.c.bf16 %v4518_v21, %v4516_v20  ;;  %v109_v24 = vld [vmem:[%s8646_s1 + $0x30] sm:$0xf]  ;;  %v94_v25 = vld [vmem:[%s8645_s0] sm:$0xff]  ;;  %v95_v26 = vld [vmem:[%s8645_s0 + $0x8] sm:$0xff] }
  0x53   :  { %5338 = vmatprep.subr.msk.bf16.mxu0 %vm6683_vm3, %v5336_v18  ;;  %v6754_v27 = vpack.c.bf16 %v109_v24, %v107_v22  ;;  %98 = vst.msk [vmem:[#allocation2 + $0x8] sm:$0xff] %vm88_vm0, %v94_v25  ;;  %99 = vst.msk [vmem:[#allocation2 + $0x10] sm:$0xff] %vm88_vm0, %v95_v26  ;;  %v4537_v28 = vld [vmem:[%s8646_s1 + $0x88] sm:$0xff]  ;;  %v4539_v29 = vld [vmem:[%s8646_s1 + $0x98] sm:$0xff]  ;;  %p6530_p8 = por %p6529_p7, %p6528_p6 }
  0x54   :  { %5368 = vmatprep.subr.msk.bf16.mxu1 %vm6683_vm3, %v6728_v19  ;;  %v6764_v30 = vpack.c.bf16 %v4539_v29, %v4537_v28  ;;  %v96_v31 = vld [vmem:[%s8645_s0 + $0x10] sm:$0xff]  ;;  %v97_v32 = vld [vmem:[%s8645_s0 + $0x18] sm:$0xf]  ;;  %v4536_v33 = vld [vmem:[%s8646_s1 + $0x80] sm:$0xff] }
  0x55   :  { %5341 = vmatpush1.bf16.msk.msra.mxu0 %vm6683_vm3, %v5339_v23  ;;  %v4538_v34 = vld [vmem:[%s8646_s1 + $0x90] sm:$0xff]  ;;  %100 = vst.msk [vmem:[#allocation2 + $0x18] sm:$0xff] %vm88_vm0, %v96_v31  ;;  %v4541_v35 = vld [vmem:[%s8646_s1 + $0xa8] sm:$0xff]  ;;  %v4543_v36 = vld [vmem:[%s8646_s1 + $0xb8] sm:$0xf]  ;;  %p6531_p9 = pnand %p6530_p8, %p6524_p5 }
  0x56   :  { %102 = vst.msk [vmem:[#allocation2 + $0x20] sm:$0xf] %vm101_vm4, %v97_v32  ;;  %5371 = vmatpush1.bf16.msk.msra.mxu1 %vm6683_vm3, %v6754_v27  ;;  %5343 = vmatprep.subr.bf16.mxu0 %v5332_v5  ;;  %v6792_v37 = vpack.c.bf16 %v4538_v34, %v4536_v33  ;;  %v4540_v38 = vld [vmem:[%s8646_s1 + $0xa0] sm:$0xff]  ;;  %v4542_v39 = vld [vmem:[%s8646_s1 + $0xb0] sm:$0xf]  ;;  %v6800_v41 = vpack.c.bf16 %v4543_v36, %v4541_v35  ;;  %v4553_v42 = vld [vmem:[%s8646_s1 + $0xc8] sm:$0xff] }
  0x57   :  { %5383 = vmatprep.subr.bf16.mxu1 %v6764_v30  ;;  %v4555_v43 = vld [vmem:[%s8646_s1 + $0xd8] sm:$0xff]  ;;  %v6811_v45 = vpack.c.bf16 %v4542_v39, %v4540_v38  ;;  %v4552_v46 = vld [vmem:[%s8646_s1 + $0xc0] sm:$0xff]  ;;  %v4554_v47 = vld [vmem:[%s8646_s1 + $0xd0] sm:$0xff] }
  0x58   :  { %v4559_v48 = vld [vmem:[%s8646_s1 + $0xf8] sm:$0xf]  ;;  %v6833_v51 = vpack.c.bf16 %v4555_v43, %v4553_v42  ;;  %v4557_v57 = vld [vmem:[%s8646_s1 + $0xe8] sm:$0xff]  ;;  %v5394_v60 = vpack.c.bf16 %v4554_v47, %v4552_v46  ;;  %v4712_v61 = vld [vmem:[%s8645_s0 + $0x20] sm:$0xff] }
  0x59   :  { %v4715_v63 = vld [vmem:[%s8645_s0 + $0x38] sm:$0xf]  ;;  %v4556_v2 = vld [vmem:[%s8646_s1 + $0xe0] sm:$0xff]  ;;  %v4558_v3 = vld [vmem:[%s8646_s1 + $0xf0] sm:$0xf]  ;;  %v5396_v4 = vpack.c.bf16 %v4559_v48, %v4557_v57 }
  0x5a   :  { %v116_v40 = vld [vmem:[#allocation2 + $0x7] ss:$2 sm:$0xff]  ;;  %v6829_v49 = vld [vmem:[#allocation2 + $0x8] ss:$2 sm:$0xff]  ;;  %v5399_v7 = vpack.c.bf16 %v4558_v3, %v4556_v2  ;;  %v4575_v12 = vld [vmem:[%s8646_s1 + $0x138] sm:$0xf] }
  0x5b   :  { %4522 = vmatmul.mubr.msk.f32.vlgmr.msra.gmra.mrb[0].mxu0 %vm88_vm0, %v116_v40  ;;  %4534 = vmatmul.mubr.msk.f32.vlgmr.msra.gmra.mrb[0].mxu1 %vm88_vm0, %v116_v40  ;;  %v6831_v50 = vld [vmem:[#allocation2 + $0x9] ss:$2 sm:$0xff]  ;;  %v112_v54 = vld [vmem:[#allocation2 + $0x6] ss:$2 sm:$0xff]  ;;  %v4574_v15 = vld [vmem:[%s8646_s1 + $0x130] sm:$0xf] }
  0x5c   :  { %5345 = vmatpush1.bf16.msra.mxu0 %v5334_v10  ;;  %5385 = vmatpush1.bf16.msra.mxu1 %v6792_v37  ;;  %v6839_v55 = vld [vmem:[#allocation2 + $0xa] ss:$2 sm:$0xff]  ;;  %v938_v59 = vld [vmem:[#allocation2 + $0xb] ss:$2 sm:$0xff]  ;;  %v4571_v6 = vld [vmem:[%s8646_s1 + $0x118] sm:$0xff] }
  0x5d   :  { %v118_v44 = vld [vmem:[#allocation2 + $0x17] ss:$2 sm:$0x3f]  ;;  %211 = vmatprep.mubr.f32.mxu0 %v6557_v0  ;;  %464 = vmatprep.mubr.f32.mxu1 %v6557_v0  ;;  %v6835_v52 = vld [vmem:[#allocation2 + $0x18] ss:$2 sm:$0x3f] }
  0x5e   :  { %5348 = vmatprep.subr.msk.bf16.mxu0 %vm6683_vm3, %v5336_v18  ;;  %5388 = vmatprep.subr.msk.bf16.mxu1 %vm6683_vm3, %v6800_v41  ;;  %v6837_v53 = vld [vmem:[#allocation2 + $0x19] ss:$2 sm:$0x3f]  ;;  %v114_v56 = vld [vmem:[#allocation2 + $0x16] ss:$2 sm:$0x3f] }
  0x5f   :  { %4523 = vmatmul.mubr.msk.f32.gmra.mrb[2].mxu0 %vm88_vm0, %v118_v44  ;;  %4535 = vmatmul.mubr.msk.f32.gmra.mrb[2].mxu1 %vm88_vm0, %v118_v44  ;;  %v6846_v58 = vld [vmem:[#allocation2 + $0x1a] ss:$2 sm:$0x3f]  ;;  %v940_v62 = vld [vmem:[#allocation2 + $0x1b] ss:$2 sm:$0x3f] }
  0x60   :  { %5351 = vmatpush1.bf16.msk.msra.mxu0 %vm6683_vm3, %v5339_v23  ;;  %5391 = vmatpush1.bf16.msk.msra.mxu1 %vm6683_vm3, %v6811_v45  ;;  %1992 = vst.msk [vmem:[#allocation2 + $0x8] sm:$0xff] %vm88_vm0, %v4712_v61  ;;  %v4569_v5 = vld [vmem:[%s8646_s1 + $0x108] sm:$0xff]  ;;  %v4568_v8 = vld [vmem:[%s8646_s1 + $0x100] sm:$0xff]  ;;  %v4586_v22 = vld [vmem:[%s8648_s3 + $0x110] sm:$0xff] }
  0x61   :  { %292 = vmatprep.mubr.f32.mxu0 %v6557_v0  ;;  %637 = vmatprep.mubr.f32.mxu1 %v6557_v0  ;;  %1995 = vst.msk [vmem:[#allocation2 + $0x20] sm:$0xf] %vm101_vm4, %v4715_v63  ;;  %v5412_v10 = vpack.c.bf16 %v4571_v6, %v4569_v5  ;;  %v4573_v11 = vld [vmem:[%s8646_s1 + $0x128] sm:$0xff]  ;;  %v4584_v21 = vld [vmem:[%s8648_s3 + $0x100] sm:$0xff]  ;;  %v4591_v25 = vld [vmem:[%s8648_s3 + $0x138] sm:$0xff] }
  0x62   :  { %5353 = vmatprep.subr.bf16.mxu0 %v6705_v9  ;;  %5403 = vmatprep.subr.bf16.mxu1 %v6833_v51  ;;  %v4570_v9 = vld [vmem:[%s8646_s1 + $0x110] sm:$0xff]  ;;  %v5416_v16 = vpack.c.bf16 %v4575_v12, %v4573_v11  ;;  %v4585_v18 = vld [vmem:[%s8648_s3 + $0x108] sm:$0xff]  ;;  %v5434_v23 = vpack.c.bf16 %v4586_v22, %v4584_v21  ;;  %v4595_v31 = vld [vmem:[%s8648_s3 + $0x158] sm:$0xff]  ;;  %v1033_v11 = vlaneseq }
  0x63   :  { %4526 = vmatmul.mubr.msk.f32.vlgmr.msra.gmra.mrb[4].mxu0 %vm88_vm0, %v6829_v49  ;;  %4550 = vmatmul.mubr.msk.f32.vlgmr.msra.gmra.mrb[0].mxu1 %vm88_vm0, %v6831_v50  ;;  %v5414_v13 = vpack.c.bf16 %v4570_v9, %v4568_v8  ;;  %v4589_v24 = vld [vmem:[%s8648_s3 + $0x128] sm:$0xff]  ;;  %v4590_v28 = vld [vmem:[%s8648_s3 + $0x130] sm:$0xff]  ;;  %v4592_v32 = vld [vmem:[%s8648_s3 + $0x140] sm:$0xff] }
  0x64   :  { %5355 = vmatpush1.bf16.msra.mxu0 %v6716_v14  ;;  %5405 = vmatpush1.bf16.msra.mxu1 %v5394_v60  ;;  %v4572_v14 = vld [vmem:[%s8646_s1 + $0x120] sm:$0xff]  ;;  %v5436_v26 = vpack.c.bf16 %v4591_v25, %v4589_v24  ;;  %v4594_v34 = vld [vmem:[%s8648_s3 + $0x150] sm:$0xff]  ;;  %v4597_v36 = vld [vmem:[%s8648_s3 + $0x168] sm:$0xff] }
  0x65   :  { %298 = vmatprep.mubr.f32.mxu0 %v6557_v0  ;;  %643 = vmatprep.mubr.f32.mxu1 %v6557_v0  ;;  %v5419_v17 = vpack.c.bf16 %v4574_v15, %v4572_v14  ;;  %v5442_v35 = vpack.c.bf16 %v4594_v34, %v4592_v32  ;;  %v4596_v39 = vld [vmem:[%s8648_s3 + $0x160] sm:$0xff]  ;;  %v4598_v40 = vld [vmem:[%s8648_s3 + $0x170] sm:$0xff]  ;;  %v4601_v42 = vld [vmem:[%s8648_s3 + $0x188] sm:$0xff] }
  0x66   :  { %5358 = vmatprep.subr.msk.bf16.mxu0 %vm6683_vm3, %v6728_v19  ;;  %5408 = vmatprep.subr.msk.bf16.mxu1 %vm6683_vm3, %v5396_v4  ;;  %v4587_v19 = vld [vmem:[%s8648_s3 + $0x118] sm:$0xff]  ;;  %v4602_v46 = vld [vmem:[%s8648_s3 + $0x190] sm:$0xff]  ;;  %v4605_v48 = vld [vmem:[%s8648_s3 + $0x1a8] sm:$0xff] }
  0x67   :  { %4527 = vmatmul.mubr.msk.f32.gmra.mrb[6].mxu0 %vm88_vm0, %v6835_v52  ;;  %4551 = vmatmul.mubr.msk.f32.gmra.mrb[2].mxu1 %vm88_vm0, %v6837_v53  ;;  %v5432_v20 = vpack.c.bf16 %v4587_v19, %v4585_v18  ;;  %v4603_v43 = vld [vmem:[%s8648_s3 + $0x198] sm:$0xff]  ;;  %v4608_v57 = vld [vmem:[%s8648_s3 + $0x1c0] sm:$0xff]  ;;  %v4614_v2 = vld [vmem:[%s8648_s3 + $0x1f0] sm:$0xff] }
  0x68   :  { %5361 = vmatpush1.bf16.msk.msra.mxu0 %vm6683_vm3, %v6754_v27  ;;  %5411 = vmatpush1.bf16.msk.msra.mxu1 %vm6683_vm3, %v5399_v7  ;;  %v4588_v27 = vld [vmem:[%s8648_s3 + $0x120] sm:$0xff]  ;;  %v5448_v44 = vpack.c.bf16 %v4603_v43, %v4601_v42  ;;  %v4615_v61 = vld [vmem:[%s8648_s3 + $0x1f8] sm:$0xff]  ;;  %v1068_v3 = vld [vmem:[%s8648_s3 + $0x8] sm:$0xff] }
  0x69   :  { %381 = vmatprep.mubr.f32.mxu0 %v6557_v0  ;;  %824 = vmatprep.mubr.f32.mxu1 %v6557_v0  ;;  %v5438_v29 = vpack.c.bf16 %v4590_v28, %v4588_v27  ;;  %v86_v22 = vld [vmem:[%s8647_s2] sm:$0x3]  ;;  %v4789_v1 = vld [vmem:[%s8648_s3 + $0x108] sm:$0xff] }
  0x6a   :  { %5373 = vmatprep.subr.bf16.mxu0 %v6764_v30  ;;  %5423 = vmatprep.subr.bf16.mxu1 %v5412_v10  ;;  %v4593_v30 = vld [vmem:[%s8648_s3 + $0x148] sm:$0xff] }
  0x6b   :  { %4530 = vmatmul.mubr.msk.f32.vlgmr.msra.gmra.mrb[0].mxu0 %vm88_vm0, %v112_v54  ;;  %4566 = vmatmul.mubr.msk.f32.vlgmr.msra.gmra.mrb[0].mxu1 %vm88_vm0, %v6839_v55  ;;  %v5440_v33 = vpack.c.bf16 %v4595_v31, %v4593_v30  ;;  %v4609_v54 = vld [vmem:[%s8648_s3 + $0x1c8] sm:$0xff] }
  0x6c   :  { %5375 = vmatpush1.bf16.msra.mxu0 %v6792_v37  ;;  %5425 = vmatpush1.bf16.msra.mxu1 %v5414_v13  ;;  %v4599_v37 = vld [vmem:[%s8648_s3 + $0x178] sm:$0xff] }
  0x6d   :  { %387 = vmatprep.mubr.f32.mxu0 %v6557_v0  ;;  %830 = vmatprep.mubr.f32.mxu1 %v6557_v0  ;;  %v5444_v38 = vpack.c.bf16 %v4599_v37, %v4597_v36 }
  0x6e   :  { %5378 = vmatprep.subr.msk.bf16.mxu0 %vm6683_vm3, %v6800_v41  ;;  %5428 = vmatprep.subr.msk.bf16.mxu1 %vm6683_vm3, %v5416_v16  ;;  %v5446_v41 = vpack.c.bf16 %v4598_v40, %v4596_v39 }
  0x6f   :  { %4531 = vmatmul.mubr.msk.f32.gmra.mrb[2].mxu0 %vm88_vm0, %v114_v56  ;;  %4567 = vmatmul.mubr.msk.f32.gmra.mrb[2].mxu1 %vm88_vm0, %v6846_v58 }
  0x70   :  { %5381 = vmatpush1.bf16.msk.msra.mxu0 %vm6683_vm3, %v6811_v45  ;;  %5431 = vmatpush1.bf16.msk.msra.mxu1 %vm6683_vm3, %v5419_v17  ;;  %v4600_v45 = vld [vmem:[%s8648_s3 + $0x180] sm:$0xff] }
  0x71   :  { %550 = vmatprep.mubr.f32.mxu0 %v6557_v0  ;;  %1011 = vmatprep.mubr.f32.mxu1 %v6557_v0  ;;  %v5450_v47 = vpack.c.bf16 %v4602_v46, %v4600_v45 }
  0x72   :  { %5393 = vmatprep.subr.bf16.mxu0 %v6833_v51  ;;  %5465 = vmatprep.subr.bf16.mxu1 %v5432_v20  ;;  %v4604_v51 = vld [vmem:[%s8648_s3 + $0x1a0] sm:$0xff] }
  0x73   :  { %4546 = vmatmul.mubr.msk.f32.vlgmr.msra.gmra.mrb[0].mxu0 %vm88_vm0, %v6829_v49  ;;  %4582 = vmatmul.mubr.msk.f32.vlgmr.msra.gmra.mrb[0].mxu1 %vm88_vm0, %v938_v59  ;;  %v4607_v49 = vld [vmem:[%s8648_s3 + $0x1b8] sm:$0xff] }
  0x74   :  { %5395 = vmatpush1.bf16.msra.mxu0 %v5394_v60  ;;  %556 = vmatprep.mubr.f32.mxu0 %v6557_v0  ;;  %v4613_v60 = vld [vmem:[%s8648_s3 + $0x1e8] sm:$0xff] }
  0x75   :  { %1017 = vmatprep.mubr.f32.mxu1 %v6557_v0  ;;  %5398 = vmatprep.subr.msk.bf16.mxu0 %vm6683_vm3, %v5396_v4  ;;  %v5460_v63 = vpack.c.bf16 %v4615_v61, %v4613_v60  ;;  %v1070_v4 = vld [vmem:[%s8648_s3 + $0x18] sm:$0xff]  ;;  %v1076_v60 = vld [vmem:[%s8648_s3 + $0x48] sm:$0xff] }
  0x76   :  { %5467 = vmatpush1.bf16.msra.mxu1 %v5434_v23  ;;  %v5496_v6 = vpack.c.bf16 %v1070_v4, %v1068_v3  ;;  %v1078_v61 = vld [vmem:[%s8648_s3 + $0x58] sm:$0xff]  ;;  %v1075_v4 = vld [vmem:[%s8648_s3 + $0x40] sm:$0xff] }
  0x77   :  { %4547 = vmatmul.mubr.msk.f32.gmra.mrb[2].mxu0 %vm88_vm0, %v6835_v52  ;;  %4583 = vmatmul.mubr.msk.f32.gmra.mrb[2].mxu1 %vm88_vm0, %v940_v62  ;;  %v4606_v52 = vld [vmem:[%s8648_s3 + $0x1b0] sm:$0xff]  ;;  %v4612_v62 = vld [vmem:[%s8648_s3 + $0x1e0] sm:$0xff]  ;;  %v5504_v3 = vpack.c.bf16 %v1078_v61, %v1076_v60 }
  0x78   :  { %5401 = vmatpush1.bf16.msk.msra.mxu0 %vm6683_vm3, %v5399_v7  ;;  %737 = vmatprep.mubr.f32.mxu0 %v6557_v0  ;;  %v5462_v5 = vpack.c.bf16 %v4614_v2, %v4612_v62  ;;  %v4624_v60 = vld [vmem:[%s8648_s3 + $0x240] sm:$0xff]  ;;  %v4626_v61 = vld [vmem:[%s8648_s3 + $0x250] sm:$0xff] }
  0x79   :  { %5413 = vmatprep.subr.bf16.mxu0 %v5412_v10  ;;  %1272 = vmatprep.mubr.f32.mxu1 %v6557_v0 }
  0x7a   :  { %5469 = vmatprep.subr.bf16.mxu1 %v5436_v26 }
  0x7b   :  { %4562 = vmatmul.mubr.msk.f32.vlgmr.msra.gmra.mrb[0].mxu0 %vm88_vm0, %v6831_v50  ;;  %5471 = vmatpush1.bf16.msra.mxu1 %v5438_v29  ;;  %v5452_v50 = vpack.c.bf16 %v4607_v49, %v4605_v48 }
  0x7c   :  { %5415 = vmatpush1.bf16.msra.mxu0 %v5414_v13  ;;  %743 = vmatprep.mubr.f32.mxu0 %v6557_v0 }
  0x7d   :  { %5418 = vmatprep.subr.msk.bf16.mxu0 %vm6683_vm3, %v5416_v16  ;;  %5473 = vmatprep.subr.bf16.mxu1 %v5440_v33  ;;  %v7073_v16 = vshrl.u32 %v1033_v11, 7 }
  0x7f   :  { %4563 = vmatmul.mubr.msk.f32.gmra.mrb[2].mxu0 %vm88_vm0, %v6837_v53  ;;  %5475 = vmatpush1.bf16.msra.mxu1 %v5442_v35  ;;  %v5454_v53 = vpack.c.bf16 %v4606_v52, %v4604_v51  ;;  %v1035_v21 = vsub.s32 0, %v7073_v16  ;;  %v1067_v52 = vld [vmem:[%s8648_s3] sm:$0xff] }
  0x80   :  { %5421 = vmatpush1.bf16.msk.msra.mxu0 %vm6683_vm3, %v5419_v17  ;;  %924 = vmatprep.mubr.f32.mxu0 %v6557_v0 }
  0x81   :  { %5433 = vmatprep.subr.bf16.mxu0 %v5432_v20  ;;  %5477 = vmatprep.subr.bf16.mxu1 %v5444_v38  ;;  %v7082_v24 = vrot.slane %v86_v22, %v1035_v21 }
  0x83   :  { %4578 = vmatmul.mubr.msk.f32.vlgmr.msra.gmra.mrb[0].mxu0 %vm88_vm0, %v6839_v55  ;;  %5479 = vmatpush1.bf16.msra.mxu1 %v5446_v41  ;;  %v4611_v55 = vld [vmem:[%s8648_s3 + $0x1d8] sm:$0xff] }
  0x84   :  { %930 = vmatprep.mubr.f32.mxu0 %v6557_v0  ;;  %5435 = vmatpush1.bf16.msra.mxu0 %v5434_v23  ;;  %v5456_v56 = vpack.c.bf16 %v4611_v55, %v4609_v54  ;;  %v1039_v23 = vsub.s32 1, %v7073_v16  ;;  %v1072_v54 = vld [vmem:[%s8648_s3 + $0x28] sm:$0xff]  ;;  %v1074_v55 = vld [vmem:[%s8648_s3 + $0x38] sm:$0xff] }
  0x85   :  { %5437 = vmatprep.subr.bf16.mxu0 %v5436_v26  ;;  %5481 = vmatprep.subr.bf16.mxu1 %v5448_v44 }
  0x86   :  { %v7086_v25 = vrot.slane %v86_v22, %v1039_v23  ;;  %v1088_v22 = vld [vmem:[%s8648_s3 + $0xa8] sm:$0xff] }
  0x87   :  { %4579 = vmatmul.mubr.msk.f32.gmra.mrb[2].mxu0 %vm88_vm0, %v6846_v58  ;;  %5483 = vmatpush1.bf16.msra.mxu1 %v5450_v47  ;;  %v4610_v58 = vld [vmem:[%s8648_s3 + $0x1d0] sm:$0xff] }
  0x88   :  { %1199 = vmatprep.mubr.f32.mxu0 %v6557_v0  ;;  %5439 = vmatpush1.bf16.msra.mxu0 %v5438_v29  ;;  %v5458_v59 = vpack.c.bf16 %v4610_v58, %v4608_v57  ;;  %v1071_v57 = vld [vmem:[%s8648_s3 + $0x20] sm:$0xff]  ;;  %v5500_v58 = vpack.c.bf16 %v1074_v55, %v1072_v54  ;;  %v4622_v54 = vld [vmem:[%s8648_s3 + $0x230] sm:$0xff] }
  0x89   :  { %5441 = vmatprep.subr.bf16.mxu0 %v5440_v33  ;;  %5485 = vmatprep.subr.bf16.mxu1 %v5452_v50 }
  0x8b   :  { %5487 = vmatpush1.bf16.msra.mxu1 %v5454_v53 }
  0x8c   :  { %5443 = vmatpush1.bf16.msra.mxu0 %v5442_v35  ;;  %5489 = vmatprep.subr.bf16.mxu1 %v5456_v56 }
  0x8d   :  { %5445 = vmatprep.subr.bf16.mxu0 %v5444_v38 }
  0x8f   :  { %5491 = vmatpush1.bf16.msra.mxu1 %v5458_v59 }
  0x90   :  { %5447 = vmatpush1.bf16.msra.mxu0 %v5446_v41  ;;  %5493 = vmatprep.subr.bf16.mxu1 %v5460_v63 }
  0x91   :  { %5449 = vmatprep.subr.bf16.mxu0 %v5448_v44 }
  0x93   :  { %5495 = vmatpush1.bf16.msra.mxu1 %v5462_v5 }
  0x94   :  { %5451 = vmatpush1.bf16.msra.mxu0 %v5450_v47  ;;  %5529 = vmatprep.subr.bf16.mxu1 %v5496_v6 }
  0x95   :  { %5453 = vmatprep.subr.bf16.mxu0 %v5452_v50 }
  0x98   :  { %5455 = vmatpush1.bf16.msra.mxu0 %v5454_v53  ;;  %v1069_v53 = vld [vmem:[%s8648_s3 + $0x10] sm:$0xff] }
  0x99   :  { %5457 = vmatprep.subr.bf16.mxu0 %v5456_v56  ;;  %v5498_v56 = vpack.c.bf16 %v1069_v53, %v1067_v52  ;;  %v4620_v53 = vld [vmem:[%s8648_s3 + $0x220] sm:$0xff] }
  0x9c   :  { %5459 = vmatpush1.bf16.msra.mxu0 %v5458_v59  ;;  %v1073_v59 = vld [vmem:[%s8648_s3 + $0x30] sm:$0xff] }
  0x9d   :  { %5461 = vmatprep.subr.bf16.mxu0 %v5460_v63  ;;  %v5502_v2 = vpack.c.bf16 %v1073_v59, %v1071_v57  ;;  %v4627_v57 = vld [vmem:[%s8648_s3 + $0x258] sm:$0xff] }
  0xa0   :  { %5463 = vmatpush1.bf16.msra.mxu0 %v5462_v5  ;;  %v1077_v5 = vld [vmem:[%s8648_s3 + $0x50] sm:$0xff] }
  0xa1   :  { %5497 = vmatprep.subr.bf16.mxu0 %v5496_v6  ;;  %v1080_v6 = vld [vmem:[%s8648_s3 + $0x68] sm:$0xff] }
 0x136   :  { %v294_v7 = vpop.f32.mrb[4].mxu0 }
 0x137   :  { %v296_v8 = vpop.f32.mrb[5].mxu0 }
 0x13a   :  { %v300_v9 = vpop.f32.mrb[6].mxu0 }
 0x13b   :  { %v302_v10 = vpop.f32.mrb[7].mxu0 }
 0x146   :  { %v1013_v12 = vpop.f32.mrb[0].mxu1 }
 0x147   :  { %v6328_v13 = vadd.f32 %v1013_v12, %v294_v7  ;;  %v1015_v14 = vpop.f32.mrb[1].mxu1  ;;  %v1082_v7 = vld [vmem:[%s8648_s3 + $0x78] sm:$0xff]  ;;  %v1079_v12 = vld [vmem:[%s8648_s3 + $0x60] sm:$0xff] }
 0x148   :  { %v6329_v15 = vadd.f32 %v1015_v14, %v296_v8  ;;  %v4713_v8 = vld [vmem:[%s8645_s0 + $0x28] sm:$0xff]  ;;  %v5508_v11 = vpack.c.bf16 %v1082_v7, %v1080_v6  ;;  %v4630_v6 = vld [vmem:[%s8648_s3 + $0x270] sm:$0xff] }
 0x149   :  { %v1051_v26 = vadd.f32 %v6328_v13, %v7082_v24  ;;  %1993 = vst.msk [vmem:[#allocation2 + $0x10] sm:$0xff] %vm88_vm0, %v4713_v8  ;;  %v1081_v13 = vld [vmem:[%s8648_s3 + $0x70] sm:$0xff]  ;;  %v1084_v14 = vld [vmem:[%s8648_s3 + $0x88] sm:$0xff]  ;;  %v4635_v8 = vld [vmem:[%s8648_s3 + $0x298] sm:$0xff] }
 0x14a   :  { %v1019_v17 = vpop.f32.mrb[2].mxu1  ;;  %v1052_v27 = vadd.f32 %v6329_v15, %v7086_v25  ;;  %v1086_v15 = vld [vmem:[%s8648_s3 + $0x98] sm:$0xff]  ;;  %v4633_v7 = vld [vmem:[%s8648_s3 + $0x288] sm:$0xff] }
 0x14b   :  { %v6330_v18 = vadd.f32 %v1019_v17, %v300_v9  ;;  %v1021_v19 = vpop.f32.mrb[3].mxu1  ;;  %v1055_v32 = vmax.f32 %v1051_v26, 0.0  ;;  %v4714_v9 = vld [vmem:[%s8645_s0 + $0x30] sm:$0xff]  ;;  %v5510_v17 = vpack.c.bf16 %v1081_v13, %v1079_v12  ;;  %v1090_v26 = vld [vmem:[%s8648_s3 + $0xb8] sm:$0xff]  ;;  %v4637_v13 = vld [vmem:[%s8648_s3 + $0x2a8] sm:$0xff] }
 0x14c   :  { %v6331_v20 = vadd.f32 %v1021_v19, %v302_v10  ;;  %v1056_v35 = vmax.f32 %v1052_v27, 0.0  ;;  %v5506_v10 = vpack.c.bf16 %v1077_v5, %v1075_v4  ;;  %1994 = vst.msk [vmem:[#allocation2 + $0x18] sm:$0xff] %vm88_vm0, %v4714_v9  ;;  %v1083_v19 = vld [vmem:[%s8648_s3 + $0x80] sm:$0xff]  ;;  %v4634_v12 = vld [vmem:[%s8648_s3 + $0x290] sm:$0xff] }
 0x14d   :  { %v1053_v33 = vadd.f32 %v6330_v18, %v7082_v24  ;;  %v5512_v18 = vpack.c.bf16 %v1086_v15, %v1084_v14  ;;  %v4628_v5 = vld [vmem:[%s8648_s3 + $0x260] sm:$0xff]  ;;  %v4639_v14 = vld [vmem:[%s8648_s3 + $0x2b8] sm:$0xff] }
 0x14e   :  { %v1054_v36 = vadd.f32 %v6331_v20, %v7086_v25  ;;  %v1085_v20 = vld [vmem:[%s8648_s3 + $0x90] sm:$0xff]  ;;  %v5574_v9 = vpack.c.bf16 %v4630_v6, %v4628_v5  ;;  %v4669_v5 = vld [vmem:[%s8648_s3 + $0x3a8] sm:$0xff]  ;;  %v4671_v6 = vld [vmem:[%s8648_s3 + $0x3b8] sm:$0xff] }
 0x14f   :  { %v1057_v44 = vmax.f32 %v1053_v33, 0.0  ;;  %v5514_v27 = vpack.c.bf16 %v1085_v20, %v1083_v19  ;;  %v4638_v19 = vld [vmem:[%s8648_s3 + $0x2b0] sm:$0xff]  ;;  %v4641_v20 = vld [vmem:[%s8648_s3 + $0x2c8] sm:$0xff] }
 0x150   :  { %v1058_v46 = vmax.f32 %v1054_v36, 0.0  ;;  %v1093_v36 = vld [vmem:[%s8648_s3 + $0xd0] sm:$0xff] }
 0x156   :  { %v926_v28 = vpop.f32.mrb[0].mxu0 }
 0x157   :  { %v1043_v29 = vadd.f32 %v7082_v24, %v926_v28  ;;  %v928_v30 = vpop.f32.mrb[1].mxu0  ;;  %v5516_v28 = vpack.c.bf16 %v1090_v26, %v1088_v22  ;;  %v4643_v22 = vld [vmem:[%s8648_s3 + $0x2d8] sm:$0xff] }
 0x158   :  { %v1044_v31 = vadd.f32 %v7086_v25, %v928_v30  ;;  %v1089_v30 = vld [vmem:[%s8648_s3 + $0xb0] sm:$0xff] }
 0x159   :  { %v1047_v34 = vmax.f32 %v1043_v29, 0.0  ;;  %v1087_v29 = vld [vmem:[%s8648_s3 + $0xa0] sm:$0xff] }
 0x15a   :  { %v1048_v37 = vmax.f32 %v1044_v31, 0.0  ;;  %v932_v38 = vpop.f32.mrb[2].mxu0  ;;  %v1092_v31 = vld [vmem:[%s8648_s3 + $0xc8] sm:$0xff]  ;;  %v5518_v33 = vpack.c.bf16 %v1089_v30, %v1087_v29  ;;  %v4642_v29 = vld [vmem:[%s8648_s3 + $0x2d0] sm:$0xff] }
 0x15b   :  { %v1059_v39 = vmax.f32 %v1047_v34, %v1055_v32  ;;  %v1045_v40 = vadd.f32 %v7082_v24, %v932_v38  ;;  %v934_v41 = vpop.f32.mrb[3].mxu0  ;;  %v1094_v32 = vld [vmem:[%s8648_s3 + $0xd8] sm:$0xff]  ;;  %v4645_v30 = vld [vmem:[%s8648_s3 + $0x2e8] sm:$0xff] }
 0x15c   :  { %v1060_v42 = vmax.f32 %v1048_v37, %v1056_v35  ;;  %v1046_v43 = vadd.f32 %v7086_v25, %v934_v41  ;;  %v5520_v34 = vpack.c.bf16 %v1094_v32, %v1092_v31  ;;  %v1091_v35 = vld [vmem:[%s8648_s3 + $0xc0] sm:$0xff]  ;;  %v1096_v37 = vld [vmem:[%s8648_s3 + $0xe8] sm:$0xff]  ;;  %v1098_v38 = vld [vmem:[%s8648_s3 + $0xf8] sm:$0xff] }
 0x15d   :  { %v1049_v45 = vmax.f32 %v1045_v40, 0.0  ;;  %v5524_v40 = vpack.c.bf16 %v1098_v38, %v1096_v37  ;;  %v1095_v41 = vld [vmem:[%s8648_s3 + $0xe0] sm:$0xff]  ;;  %v4647_v31 = vld [vmem:[%s8648_s3 + $0x2f8] sm:$0xff] }
 0x15e   :  { %v1063_v47 = vmax.f32 %v1059_v39, %v1060_v42  ;;  %v1050_v48 = vmax.f32 %v1046_v43, 0.0  ;;  %v5522_v39 = vpack.c.bf16 %v1093_v36, %v1091_v35  ;;  %v1097_v42 = vld [vmem:[%s8648_s3 + $0xf0] sm:$0xff]  ;;  %v4617_v43 = vld [vmem:[%s8648_s3 + $0x208] sm:$0xff]  ;;  %v4651_v37 = vld [vmem:[%s8648_s3 + $0x318] sm:$0xff] }
 0x15f   :  { %v1061_v49 = vmax.f32 %v1049_v45, %v1057_v44  ;;  %v4619_v44 = vld [vmem:[%s8648_s3 + $0x218] sm:$0xff]  ;;  %v5526_v45 = vpack.c.bf16 %v1097_v42, %v1095_v41  ;;  %v4646_v35 = vld [vmem:[%s8648_s3 + $0x2f0] sm:$0xff]  ;;  %v4649_v36 = vld [vmem:[%s8648_s3 + $0x308] sm:$0xff] }
 0x160   :  { %1065 = vst [vmem:[#allocation3] sm:$0xff] %v1063_v47  ;;  %v1062_v50 = vmax.f32 %v1050_v48, %v1058_v46  ;;  %v5560_v46 = vpack.c.bf16 %v4619_v44, %v4617_v43  ;;  %v4616_v47 = vld [vmem:[%s8648_s3 + $0x200] sm:$0xff]  ;;  %v4618_v48 = vld [vmem:[%s8648_s3 + $0x210] sm:$0xff]  ;;  %v4653_v42 = vld [vmem:[%s8648_s3 + $0x328] sm:$0xff] }
 0x161   :  { %v4650_v41 = vld [vmem:[%s8648_s3 + $0x310] sm:$0xff]  ;;  %v4655_v43 = vld [vmem:[%s8648_s3 + $0x338] sm:$0xff] }
 0x162   :  { %v1064_v51 = vmax.f32 %v1061_v49, %v1062_v50  ;;  %v4621_v49 = vld [vmem:[%s8648_s3 + $0x228] sm:$0xff]  ;;  %v4623_v50 = vld [vmem:[%s8648_s3 + $0x238] sm:$0xff] }
 0x163   :  { %v5564_v52 = vpack.c.bf16 %v4623_v50, %v4621_v49  ;;  %v4657_v49 = vld [vmem:[%s8648_s3 + $0x348] sm:$0xff]  ;;  %v4659_v50 = vld [vmem:[%s8648_s3 + $0x358] sm:$0xff] }
 0x164   :  { %1066 = vst [vmem:[#allocation3 + $0x8] sm:$0x3f] %v1064_v51  ;;  %v5562_v51 = vpack.c.bf16 %v4618_v48, %v4616_v47  ;;  %v4654_v47 = vld [vmem:[%s8648_s3 + $0x330] sm:$0xff] }
 0x16b   :  { %v7120_v62 = vld [vmem:[#allocation3 + $0x1] ss:$2 sm:$0x1f]  ;;  %v7122_v63 = vld [vmem:[#allocation3 + $0x2] ss:$2 sm:$0x1f] }
 0x16c   :  { %1200 = vmatmul.mubr.f32.vlgmr.msra.gmra.mrb[8].mxu0 %v7120_v62  ;;  %1273 = vmatmul.mubr.f32.vlgmr.msra.gmra.mrb[4].mxu1 %v7122_v63  ;;  %v1099_v55 = vld [vmem:[#allocation3] ss:$2 sm:$0x1f]  ;;  %v7325_v48 = vld [vmem:[#allocation3 + $0x3] ss:$2 sm:$0x1f] }
 0x16d   :  { %5499 = vmatpush1.bf16.msra.mxu0 %v5498_v56  ;;  %5531 = vmatpush1.bf16.msra.mxu1 %v5498_v56  ;;  %v4625_v56 = vld [vmem:[%s8648_s3 + $0x248] sm:$0xff] }
 0x16e   :  { %5501 = vmatprep.subr.bf16.mxu0 %v5500_v58  ;;  %5533 = vmatprep.subr.bf16.mxu1 %v5500_v58  ;;  %v5566_v58 = vpack.c.bf16 %v4622_v54, %v4620_v53  ;;  %v5568_v59 = vpack.c.bf16 %v4627_v57, %v4625_v56  ;;  %v4656_v53 = vld [vmem:[%s8648_s3 + $0x340] sm:$0xff]  ;;  %v4658_v54 = vld [vmem:[%s8648_s3 + $0x350] sm:$0xff] }
 0x16f   :  { %1343 = vmatprep.mubr.f32.mxu0 %v6557_v0  ;;  %1414 = vmatprep.mubr.f32.mxu1 %v6557_v0  ;;  %v5634_v56 = vpack.c.bf16 %v4658_v54, %v4656_v53  ;;  %v4697_v53 = vld [vmem:[%s8648_s3 + $0x488] sm:$0xff]  ;;  %v4699_v54 = vld [vmem:[%s8648_s3 + $0x498] sm:$0xff] }
 0x171   :  { %5503 = vmatpush1.bf16.msra.mxu0 %v5502_v2  ;;  %5535 = vmatpush1.bf16.msra.mxu1 %v5502_v2  ;;  %v4629_v2 = vld [vmem:[%s8648_s3 + $0x268] sm:$0xff] }
 0x172   :  { %5505 = vmatprep.subr.bf16.mxu0 %v5504_v3  ;;  %5537 = vmatprep.subr.bf16.mxu1 %v5504_v3  ;;  %v5570_v3 = vpack.c.bf16 %v4626_v61, %v4624_v60  ;;  %v4665_v60 = vld [vmem:[%s8648_s3 + $0x388] sm:$0xff]  ;;  %v4667_v61 = vld [vmem:[%s8648_s3 + $0x398] sm:$0xff] }
 0x175   :  { %5507 = vmatpush1.bf16.msra.mxu0 %v5506_v10  ;;  %5539 = vmatpush1.bf16.msra.mxu1 %v5506_v10  ;;  %v5576_v10 = vpack.c.bf16 %v4635_v8, %v4633_v7  ;;  %v5644_v8 = vpack.c.bf16 %v4671_v6, %v4669_v5 }
 0x176   :  { %5509 = vmatprep.subr.bf16.mxu0 %v5508_v11  ;;  %5541 = vmatprep.subr.bf16.mxu1 %v5508_v11  ;;  %v4632_v11 = vld [vmem:[%s8648_s3 + $0x280] sm:$0xff] }
 0x177   :  { %v5578_v15 = vpack.c.bf16 %v4634_v12, %v4632_v11  ;;  %v4673_v11 = vld [vmem:[%s8648_s3 + $0x3c8] sm:$0xff]  ;;  %v4675_v12 = vld [vmem:[%s8648_s3 + $0x3d8] sm:$0xff] }
 0x179   :  { %5511 = vmatpush1.bf16.msra.mxu0 %v5510_v17  ;;  %5543 = vmatpush1.bf16.msra.mxu1 %v5510_v17  ;;  %v5580_v17 = vpack.c.bf16 %v4639_v14, %v4637_v13  ;;  %v5648_v14 = vpack.c.bf16 %v4675_v12, %v4673_v11 }
 0x17a   :  { %5513 = vmatprep.subr.bf16.mxu0 %v5512_v18  ;;  %5545 = vmatprep.subr.bf16.mxu1 %v5512_v18  ;;  %v4636_v18 = vld [vmem:[%s8648_s3 + $0x2a0] sm:$0xff] }
 0x17b   :  { %v5582_v26 = vpack.c.bf16 %v4638_v19, %v4636_v18  ;;  %v4677_v18 = vld [vmem:[%s8648_s3 + $0x3e8] sm:$0xff]  ;;  %v4679_v19 = vld [vmem:[%s8648_s3 + $0x3f8] sm:$0xff] }
 0x17d   :  { %5515 = vmatpush1.bf16.msra.mxu0 %v5514_v27  ;;  %5547 = vmatpush1.bf16.msra.mxu1 %v5514_v27  ;;  %v5584_v27 = vpack.c.bf16 %v4643_v22, %v4641_v20  ;;  %v5652_v22 = vpack.c.bf16 %v4679_v19, %v4677_v18 }
 0x17e   :  { %5517 = vmatprep.subr.bf16.mxu0 %v5516_v28  ;;  %5549 = vmatprep.subr.bf16.mxu1 %v5516_v28  ;;  %v4640_v28 = vld [vmem:[%s8648_s3 + $0x2c0] sm:$0xff] }
 0x17f   :  { %v5586_v32 = vpack.c.bf16 %v4642_v29, %v4640_v28  ;;  %v4681_v28 = vld [vmem:[%s8648_s3 + $0x408] sm:$0xff]  ;;  %v4683_v29 = vld [vmem:[%s8648_s3 + $0x418] sm:$0xff] }
 0x181   :  { %5519 = vmatpush1.bf16.msra.mxu0 %v5518_v33  ;;  %5551 = vmatpush1.bf16.msra.mxu1 %v5518_v33  ;;  %v5588_v33 = vpack.c.bf16 %v4647_v31, %v4645_v30  ;;  %v5688_v31 = vpack.c.bf16 %v4683_v29, %v4681_v28 }
 0x182   :  { %5521 = vmatprep.subr.bf16.mxu0 %v5520_v34  ;;  %5553 = vmatprep.subr.bf16.mxu1 %v5520_v34  ;;  %v4644_v34 = vld [vmem:[%s8648_s3 + $0x2e0] sm:$0xff] }
 0x183   :  { %v5590_v38 = vpack.c.bf16 %v4646_v35, %v4644_v34  ;;  %v4685_v34 = vld [vmem:[%s8648_s3 + $0x428] sm:$0xff]  ;;  %v4687_v35 = vld [vmem:[%s8648_s3 + $0x438] sm:$0xff] }
 0x185   :  { %5523 = vmatpush1.bf16.msra.mxu0 %v5522_v39  ;;  %5555 = vmatpush1.bf16.msra.mxu1 %v5522_v39  ;;  %v5624_v39 = vpack.c.bf16 %v4651_v37, %v4649_v36  ;;  %v5692_v37 = vpack.c.bf16 %v4687_v35, %v4685_v34  ;;  %v1999_v34 = vld [vmem:[%s8646_s1 + $0x18] sm:$0xff] }
 0x186   :  { %5525 = vmatprep.subr.bf16.mxu0 %v5524_v40  ;;  %5557 = vmatprep.subr.bf16.mxu1 %v5524_v40  ;;  %v4648_v40 = vld [vmem:[%s8648_s3 + $0x300] sm:$0xff] }
 0x187   :  { %v5626_v44 = vpack.c.bf16 %v4650_v41, %v4648_v40  ;;  %v7427_v40 = vld [vmem:[#allocation3 + $0x4] ss:$2 sm:$0x1f] }
 0x188   :  { %v4689_v41 = vld [vmem:[%s8648_s3 + $0x448] sm:$0xff] }
 0x189   :  { %5527 = vmatpush1.bf16.msra.mxu0 %v5526_v45  ;;  %5559 = vmatpush1.bf16.msra.mxu1 %v5526_v45  ;;  %v5628_v45 = vpack.c.bf16 %v4655_v43, %v4653_v42  ;;  %v4691_v42 = vld [vmem:[%s8648_s3 + $0x458] sm:$0xff] }
 0x18a   :  { %5561 = vmatprep.subr.bf16.mxu0 %v5560_v46  ;;  %5593 = vmatprep.subr.bf16.mxu1 %v5560_v46  ;;  %v4652_v46 = vld [vmem:[%s8648_s3 + $0x320] sm:$0xff] }
 0x18c   :  { %1344 = vmatmul.mubr.f32.vlgmr.msra.gmra.mrb[8].mxu0 %v1099_v55  ;;  %1415 = vmatmul.mubr.f32.vlgmr.msra.gmra.mrb[4].mxu1 %v7120_v62  ;;  %v4631_v62 = vld [vmem:[%s8648_s3 + $0x278] sm:$0xff] }
 0x18d   :  { %5563 = vmatpush1.bf16.msra.mxu0 %v5562_v51  ;;  %5595 = vmatpush1.bf16.msra.mxu1 %v5562_v51  ;;  %v5572_v4 = vpack.c.bf16 %v4631_v62, %v4629_v2  ;;  %v5630_v51 = vpack.c.bf16 %v4654_v47, %v4652_v46  ;;  %v4663_v55 = vld [vmem:[%s8648_s3 + $0x378] sm:$0xff]  ;;  %v5640_v62 = vpack.c.bf16 %v4667_v61, %v4665_v60  ;;  %v4690_v46 = vld [vmem:[%s8648_s3 + $0x450] sm:$0xff]  ;;  %v4693_v47 = vld [vmem:[%s8648_s3 + $0x468] sm:$0xff] }
 0x18e   :  { %5565 = vmatprep.subr.bf16.mxu0 %v5564_v52  ;;  %5597 = vmatprep.subr.bf16.mxu1 %v5564_v52  ;;  %v5632_v52 = vpack.c.bf16 %v4659_v50, %v4657_v49 }
 0x18f   :  { %1518 = vmatprep.mubr.f32.mxu0 %v6557_v0  ;;  %1591 = vmatprep.mubr.f32.mxu1 %v6557_v0 }
 0x191   :  { %5567 = vmatpush1.bf16.msra.mxu0 %v5566_v58  ;;  %5599 = vmatpush1.bf16.msra.mxu1 %v5566_v58  ;;  %v4660_v58 = vld [vmem:[%s8648_s3 + $0x360] sm:$0xff] }
 0x192   :  { %5569 = vmatprep.subr.bf16.mxu0 %v5568_v59  ;;  %5601 = vmatprep.subr.bf16.mxu1 %v5568_v59  ;;  %v4662_v59 = vld [vmem:[%s8648_s3 + $0x370] sm:$0xff] }
 0x193   :  { %v5638_v2 = vpack.c.bf16 %v4662_v59, %v4660_v58  ;;  %v4701_v58 = vld [vmem:[%s8648_s3 + $0x4a8] sm:$0xff]  ;;  %v4703_v59 = vld [vmem:[%s8648_s3 + $0x4b8] sm:$0xff] }
 0x194   :  { %v5708_v61 = vpack.c.bf16 %v4703_v59, %v4701_v58  ;;  %v4744_v58 = vld [vmem:[%s8646_s1 + $0xa0] sm:$0xff]  ;;  %v4746_v59 = vld [vmem:[%s8646_s1 + $0xb0] sm:$0xf] }
 0x195   :  { %5571 = vmatpush1.bf16.msra.mxu0 %v5570_v3  ;;  %5603 = vmatpush1.bf16.msra.mxu1 %v5570_v3  ;;  %v4664_v3 = vld [vmem:[%s8648_s3 + $0x380] sm:$0xff] }
 0x196   :  { %5573 = vmatprep.subr.bf16.mxu0 %v5572_v4  ;;  %5605 = vmatprep.subr.bf16.mxu1 %v5572_v4  ;;  %v4666_v4 = vld [vmem:[%s8648_s3 + $0x390] sm:$0xff] }
 0x197   :  { %v5642_v7 = vpack.c.bf16 %v4666_v4, %v4664_v3  ;;  %v4705_v3 = vld [vmem:[%s8648_s3 + $0x4c8] sm:$0xff]  ;;  %v4707_v4 = vld [vmem:[%s8648_s3 + $0x4d8] sm:$0xff] }
 0x198   :  { %v5712_v6 = vpack.c.bf16 %v4707_v4, %v4705_v3  ;;  %v5799_v3 = vpack.c.bf16 %v4746_v59, %v4744_v58  ;;  %v4756_v4 = vld [vmem:[%s8646_s1 + $0xc0] sm:$0xff]  ;;  %v4805_v59 = vld [vmem:[%s8648_s3 + $0x188] sm:$0xff] }
 0x199   :  { %5575 = vmatpush1.bf16.msra.mxu0 %v5574_v9  ;;  %5607 = vmatpush1.bf16.msra.mxu1 %v5574_v9  ;;  %v4668_v9 = vld [vmem:[%s8648_s3 + $0x3a0] sm:$0xff] }
 0x19a   :  { %5577 = vmatprep.subr.bf16.mxu0 %v5576_v10  ;;  %5609 = vmatprep.subr.bf16.mxu1 %v5576_v10  ;;  %v4670_v10 = vld [vmem:[%s8648_s3 + $0x3b0] sm:$0xff] }
 0x19b   :  { %v5646_v13 = vpack.c.bf16 %v4670_v10, %v4668_v9  ;;  %v4709_v9 = vld [vmem:[%s8648_s3 + $0x4e8] sm:$0xff]  ;;  %v4711_v10 = vld [vmem:[%s8648_s3 + $0x4f8] sm:$0xff] }
 0x19c   :  { %v5716_v12 = vpack.c.bf16 %v4711_v10, %v4709_v9  ;;  %v2447_v9 = vld [vmem:[#allocation2 + $0x9] ss:$2 sm:$0xff] }
 0x19d   :  { %5579 = vmatpush1.bf16.msra.mxu0 %v5578_v15  ;;  %5611 = vmatpush1.bf16.msra.mxu1 %v5578_v15  ;;  %v4672_v15 = vld [vmem:[%s8648_s3 + $0x3c0] sm:$0xff] }
 0x19e   :  { %5581 = vmatprep.subr.bf16.mxu0 %v5580_v17  ;;  %5613 = vmatprep.subr.bf16.mxu1 %v5580_v17  ;;  %v4674_v17 = vld [vmem:[%s8648_s3 + $0x3d0] sm:$0xff] }
 0x19f   :  { %v5650_v20 = vpack.c.bf16 %v4674_v17, %v4672_v15  ;;  %v4717_v15 = vld [vmem:[%s8646_s1 + $0x48] sm:$0xff]  ;;  %v4719_v17 = vld [vmem:[%s8646_s1 + $0x58] sm:$0xff] }
 0x1a0   :  { %v5752_v19 = vpack.c.bf16 %v4719_v17, %v4717_v15  ;;  %v4775_v15 = vld [vmem:[%s8646_s1 + $0x118] sm:$0xff] }
 0x1a1   :  { %5583 = vmatpush1.bf16.msra.mxu0 %v5582_v26  ;;  %5615 = vmatpush1.bf16.msra.mxu1 %v5582_v26  ;;  %v4676_v26 = vld [vmem:[%s8648_s3 + $0x3e0] sm:$0xff]  ;;  %v2448_v17 = vld [vmem:[#allocation2 + $0x19] ss:$2 sm:$0x3f] }
 0x1a2   :  { %5585 = vmatprep.subr.bf16.mxu0 %v5584_v27  ;;  %5617 = vmatprep.subr.bf16.mxu1 %v5584_v27  ;;  %v4678_v27 = vld [vmem:[%s8648_s3 + $0x3f0] sm:$0xff] }
 0x1a3   :  { %v5654_v30 = vpack.c.bf16 %v4678_v27, %v4676_v26  ;;  %v4721_v26 = vld [vmem:[%s8646_s1 + $0x68] sm:$0xff]  ;;  %v4723_v27 = vld [vmem:[%s8646_s1 + $0x78] sm:$0xf] }
 0x1a4   :  { %v5756_v29 = vpack.c.bf16 %v4723_v27, %v4721_v26  ;;  %v4777_v26 = vld [vmem:[%s8646_s1 + $0x128] sm:$0xff]  ;;  %v4779_v27 = vld [vmem:[%s8646_s1 + $0x138] sm:$0xf] }
 0x1a5   :  { %5587 = vmatpush1.bf16.msra.mxu0 %v5586_v32  ;;  %5619 = vmatpush1.bf16.msra.mxu1 %v5586_v32  ;;  %v4680_v32 = vld [vmem:[%s8648_s3 + $0x400] sm:$0xff] }
 0x1a6   :  { %5589 = vmatprep.subr.bf16.mxu0 %v5588_v33  ;;  %5621 = vmatprep.subr.bf16.mxu1 %v5588_v33  ;;  %v4682_v33 = vld [vmem:[%s8648_s3 + $0x410] sm:$0xff] }
 0x1a7   :  { %v5690_v36 = vpack.c.bf16 %v4682_v33, %v4680_v32  ;;  %v1888_v32 = vld [vmem:[#allocation3 + $0x5] ss:$2 sm:$0x1f] }
 0x1a8   :  { %v1997_v33 = vld [vmem:[%s8646_s1 + $0x8] sm:$0xff] }
 0x1a9   :  { %5591 = vmatpush1.bf16.msra.mxu0 %v5590_v38  ;;  %5623 = vmatpush1.bf16.msra.mxu1 %v5590_v38  ;;  %v4684_v38 = vld [vmem:[%s8648_s3 + $0x420] sm:$0xff] }
 0x1aa   :  { %5625 = vmatprep.subr.bf16.mxu0 %v5624_v39  ;;  %5657 = vmatprep.subr.bf16.mxu1 %v5624_v39  ;;  %v4686_v39 = vld [vmem:[%s8648_s3 + $0x430] sm:$0xff] }
 0x1ab   :  { %v5694_v43 = vpack.c.bf16 %v4686_v39, %v4684_v38  ;;  %v1998_v38 = vld [vmem:[%s8646_s1 + $0x10] sm:$0xff]  ;;  %v2001_v39 = vld [vmem:[%s8646_s1 + $0x28] sm:$0xff] }
 0x1ac   :  { %1519 = vmatmul.mubr.f32.vlgmr.msra.gmra.mrb[8].mxu0 %v7122_v63  ;;  %1592 = vmatmul.mubr.f32.vlgmr.msra.gmra.mrb[4].mxu1 %v7325_v48  ;;  %v4661_v63 = vld [vmem:[%s8648_s3 + $0x368] sm:$0xff] }
 0x1ad   :  { %5627 = vmatpush1.bf16.msra.mxu0 %v5626_v44  ;;  %5659 = vmatpush1.bf16.msra.mxu1 %v5626_v44  ;;  %v5636_v57 = vpack.c.bf16 %v4663_v55, %v4661_v63  ;;  %v5696_v44 = vpack.c.bf16 %v4691_v42, %v4689_v41  ;;  %v5704_v55 = vpack.c.bf16 %v4699_v54, %v4697_v53  ;;  %v2006_v41 = vld [vmem:[#allocation2 + $0x7] ss:$2 sm:$0xff]  ;;  %v7558_v42 = vld [vmem:[#allocation2 + $0x8] ss:$2 sm:$0xff]  ;;  %v4742_v53 = vld [vmem:[%s8646_s1 + $0x90] sm:$0xff] }
 0x1ae   :  { %5629 = vmatprep.subr.bf16.mxu0 %v5628_v45  ;;  %5661 = vmatprep.subr.bf16.mxu1 %v5628_v45  ;;  %v4688_v45 = vld [vmem:[%s8648_s3 + $0x440] sm:$0xff] }
 0x1af   :  { %1699 = vmatprep.mubr.f32.mxu0 %v6557_v0  ;;  %1772 = vmatprep.mubr.f32.mxu1 %v6557_v0  ;;  %v5698_v49 = vpack.c.bf16 %v4690_v46, %v4688_v45  ;;  %v2002_v45 = vld [vmem:[%s8646_s1 + $0x30] sm:$0xf] }
 0x1b1   :  { %5631 = vmatpush1.bf16.msra.mxu0 %v5630_v51  ;;  %5663 = vmatpush1.bf16.msra.mxu1 %v5630_v51  ;;  %v4692_v51 = vld [vmem:[%s8648_s3 + $0x460] sm:$0xff] }
 0x1b2   :  { %5633 = vmatprep.subr.bf16.mxu0 %v5632_v52  ;;  %5665 = vmatprep.subr.bf16.mxu1 %v5632_v52  ;;  %v4694_v52 = vld [vmem:[%s8648_s3 + $0x470] sm:$0xff] }
 0x1b3   :  { %v5702_v63 = vpack.c.bf16 %v4694_v52, %v4692_v51  ;;  %v4740_v52 = vld [vmem:[%s8646_s1 + $0x80] sm:$0xff] }
 0x1b5   :  { %5635 = vmatpush1.bf16.msra.mxu0 %v5634_v56  ;;  %5667 = vmatpush1.bf16.msra.mxu1 %v5634_v56  ;;  %v4696_v56 = vld [vmem:[%s8648_s3 + $0x480] sm:$0xff] }
 0x1b6   :  { %5637 = vmatprep.subr.bf16.mxu0 %v5636_v57  ;;  %5669 = vmatprep.subr.bf16.mxu1 %v5636_v57  ;;  %v4698_v57 = vld [vmem:[%s8648_s3 + $0x490] sm:$0xff] }
 0x1b7   :  { %v5706_v60 = vpack.c.bf16 %v4698_v57, %v4696_v56  ;;  %v2004_v56 = vld [vmem:[#allocation2 + $0x6] ss:$2 sm:$0xff]  ;;  %v5794_v57 = vpack.c.bf16 %v4742_v53, %v4740_v52  ;;  %v4798_v52 = vld [vmem:[%s8648_s3 + $0x150] sm:$0xff] }
 0x1b9   :  { %5639 = vmatpush1.bf16.msra.mxu0 %v5638_v2  ;;  %5671 = vmatpush1.bf16.msra.mxu1 %v5638_v2  ;;  %v4700_v2 = vld [vmem:[%s8648_s3 + $0x4a0] sm:$0xff] }
 0x1ba   :  { %5641 = vmatprep.subr.bf16.mxu0 %v5640_v62  ;;  %5673 = vmatprep.subr.bf16.mxu1 %v5640_v62  ;;  %v4702_v62 = vld [vmem:[%s8648_s3 + $0x4b0] sm:$0xff] }
 0x1bb   :  { %v5710_v5 = vpack.c.bf16 %v4702_v62, %v4700_v2  ;;  %v4759_v2 = vld [vmem:[%s8646_s1 + $0xd8] sm:$0xff] }
 0x1bc   :  { %v2005_v62 = vld [vmem:[#allocation2 + $0x16] ss:$2 sm:$0x3f] }
 0x1bd   :  { %5643 = vmatpush1.bf16.msra.mxu0 %v5642_v7  ;;  %5675 = vmatpush1.bf16.msra.mxu1 %v5642_v7  ;;  %v4704_v7 = vld [vmem:[%s8648_s3 + $0x4c0] sm:$0xff] }
 0x1be   :  { %5645 = vmatprep.subr.bf16.mxu0 %v5644_v8  ;;  %5677 = vmatprep.subr.bf16.mxu1 %v5644_v8  ;;  %v4706_v8 = vld [vmem:[%s8648_s3 + $0x4d0] sm:$0xff] }
 0x1bf   :  { %v5714_v11 = vpack.c.bf16 %v4706_v8, %v4704_v7  ;;  %v4761_v7 = vld [vmem:[%s8646_s1 + $0xe8] sm:$0xff]  ;;  %v4763_v8 = vld [vmem:[%s8646_s1 + $0xf8] sm:$0xf] }
 0x1c1   :  { %5647 = vmatpush1.bf16.msra.mxu0 %v5646_v13  ;;  %5679 = vmatpush1.bf16.msra.mxu1 %v5646_v13  ;;  %v4708_v13 = vld [vmem:[%s8648_s3 + $0x4e0] sm:$0xff] }
 0x1c2   :  { %5649 = vmatprep.subr.bf16.mxu0 %v5648_v14  ;;  %5681 = vmatprep.subr.bf16.mxu1 %v5648_v14  ;;  %v4710_v14 = vld [vmem:[%s8648_s3 + $0x4f0] sm:$0xff] }
 0x1c3   :  { %v5718_v18 = vpack.c.bf16 %v4710_v14, %v4708_v13  ;;  %v5816_v13 = vpack.c.bf16 %v4763_v8, %v4761_v7  ;;  %v4773_v14 = vld [vmem:[%s8646_s1 + $0x108] sm:$0xff]  ;;  %v4808_v7 = vld [vmem:[%s8648_s3 + $0x1a0] sm:$0xff]  ;;  %v4810_v8 = vld [vmem:[%s8648_s3 + $0x1b0] sm:$0xff] }
 0x1c5   :  { %5651 = vmatpush1.bf16.msra.mxu0 %v5650_v20  ;;  %5683 = vmatpush1.bf16.msra.mxu1 %v5650_v20  ;;  %v4716_v20 = vld [vmem:[%s8646_s1 + $0x40] sm:$0xff] }
 0x1c6   :  { %5653 = vmatprep.subr.bf16.mxu0 %v5652_v22  ;;  %5685 = vmatprep.subr.bf16.mxu1 %v5652_v22  ;;  %v4718_v22 = vld [vmem:[%s8646_s1 + $0x50] sm:$0xff] }
 0x1c7   :  { %v5754_v28 = vpack.c.bf16 %v4718_v22, %v4716_v20  ;;  %v4774_v20 = vld [vmem:[%s8646_s1 + $0x110] sm:$0xff]  ;;  %v5832_v22 = vpack.c.bf16 %v4775_v15, %v4773_v14 }
 0x1c8   :  { %v4814_v14 = vld [vmem:[%s8648_s3 + $0x1d0] sm:$0xff] }
 0x1c9   :  { %5655 = vmatpush1.bf16.msra.mxu0 %v5654_v30  ;;  %5687 = vmatpush1.bf16.msra.mxu1 %v5654_v30  ;;  %v4720_v30 = vld [vmem:[%s8646_s1 + $0x60] sm:$0xff] }
 0x1ca   :  { %5689 = vmatprep.subr.bf16.mxu0 %v5688_v31  ;;  %5721 = vmatprep.subr.bf16.mxu1 %v5688_v31  ;;  %v4722_v31 = vld [vmem:[%s8646_s1 + $0x70] sm:$0xf] }
 0x1cb   :  { %v5759_v35 = vpack.c.bf16 %v4722_v31, %v4720_v30  ;;  %v4776_v30 = vld [vmem:[%s8646_s1 + $0x120] sm:$0xff]  ;;  %v4778_v31 = vld [vmem:[%s8646_s1 + $0x130] sm:$0xf] }
 0x1cc   :  { %1700 = vmatmul.mubr.f32.vlgmr.msra.gmra.mrb[8].mxu0 %v7325_v48  ;;  %1773 = vmatmul.mubr.f32.vlgmr.msra.gmra.mrb[4].mxu1 %v7427_v40  ;;  %v4695_v48 = vld [vmem:[%s8648_s3 + $0x478] sm:$0xff] }
 0x1cd   :  { %5691 = vmatpush1.bf16.msra.mxu0 %v5690_v36  ;;  %5723 = vmatpush1.bf16.msra.mxu1 %v5690_v36  ;;  %v5700_v50 = vpack.c.bf16 %v4695_v48, %v4693_v47  ;;  %v5772_v36 = vpack.c.bf16 %v1999_v34, %v1997_v33  ;;  %v4741_v47 = vld [vmem:[%s8646_s1 + $0x88] sm:$0xff]  ;;  %v4743_v48 = vld [vmem:[%s8646_s1 + $0x98] sm:$0xff]  ;;  %v5839_v34 = vpack.c.bf16 %v4778_v31, %v4776_v30  ;;  %v87_v30 = vld [vmem:[#allocation5] sm:$0x3] }
 0x1ce   :  { %5693 = vmatprep.subr.bf16.mxu0 %v5692_v37  ;;  %5725 = vmatprep.subr.bf16.mxu1 %v5692_v37  ;;  %v1996_v37 = vld [vmem:[%s8646_s1] sm:$0xff]  ;;  %v5792_v54 = vpack.c.bf16 %v4743_v48, %v4741_v47  ;;  %v2632_v33 = vld [vmem:[#allocation2 + $0x1a] ss:$2 sm:$0x3f]  ;;  %v4797_v47 = vld [vmem:[%s8648_s3 + $0x148] sm:$0xff]  ;;  %v7820_v31 = vrot.slane %v87_v30, %v1035_v21 }
 0x1cf   :  { %1880 = vmatprep.mubr.f32.mxu0 %v6557_v0  ;;  %1953 = vmatprep.mubr.f32.mxu1 %v6557_v0  ;;  %v4799_v48 = vld [vmem:[%s8648_s3 + $0x158] sm:$0xff] }
 0x1d1   :  { %5695 = vmatpush1.bf16.msra.mxu0 %v5694_v43  ;;  %5727 = vmatpush1.bf16.msra.mxu1 %v5694_v43  ;;  %v5774_v43 = vpack.c.bf16 %v1998_v38, %v1996_v37  ;;  %v4791_v37 = vld [vmem:[%s8648_s3 + $0x118] sm:$0xff]  ;;  %v4788_v38 = vld [vmem:[%s8648_s3 + $0x100] sm:$0xff] }
 0x1d2   :  { %5697 = vmatprep.subr.bf16.mxu0 %v5696_v44  ;;  %5729 = vmatprep.subr.bf16.mxu1 %v5696_v44  ;;  %v2000_v44 = vld [vmem:[%s8646_s1 + $0x20] sm:$0xff] }
 0x1d3   :  { %v5779_v51 = vpack.c.bf16 %v2002_v45, %v2000_v44  ;;  %v4792_v45 = vld [vmem:[%s8648_s3 + $0x120] sm:$0xff] }
 0x1d5   :  { %5699 = vmatpush1.bf16.msra.mxu0 %v5698_v49  ;;  %5731 = vmatpush1.bf16.msra.mxu1 %v5698_v49  ;;  %v2007_v49 = vld [vmem:[#allocation2 + $0x17] ss:$2 sm:$0x3f] }
 0x1d6   :  { %5701 = vmatprep.subr.bf16.mxu0 %v5700_v50  ;;  %5733 = vmatprep.subr.bf16.mxu1 %v5700_v50  ;;  %v7575_v50 = vld [vmem:[#allocation2 + $0x18] ss:$2 sm:$0x3f] }
 0x1d9   :  { %5703 = vmatpush1.bf16.msra.mxu0 %v5702_v63  ;;  %5735 = vmatpush1.bf16.msra.mxu1 %v5702_v63  ;;  %v4745_v63 = vld [vmem:[%s8646_s1 + $0xa8] sm:$0xff] }
 0x1da   :  { %5705 = vmatprep.subr.bf16.mxu0 %v5704_v55  ;;  %5737 = vmatprep.subr.bf16.mxu1 %v5704_v55  ;;  %v4747_v55 = vld [vmem:[%s8646_s1 + $0xb8] sm:$0xf] }
 0x1dd   :  { %5707 = vmatpush1.bf16.msra.mxu0 %v5706_v60  ;;  %5739 = vmatpush1.bf16.msra.mxu1 %v5706_v60  ;;  %v5796_v60 = vpack.c.bf16 %v4747_v55, %v4745_v63  ;;  %v4803_v63 = vld [vmem:[%s8648_s3 + $0x178] sm:$0xff] }
 0x1de   :  { %5709 = vmatprep.subr.bf16.mxu0 %v5708_v61  ;;  %5741 = vmatprep.subr.bf16.mxu1 %v5708_v61  ;;  %v4757_v61 = vld [vmem:[%s8646_s1 + $0xc8] sm:$0xff] }
 0x1e1   :  { %5711 = vmatpush1.bf16.msra.mxu0 %v5710_v5  ;;  %5743 = vmatpush1.bf16.msra.mxu1 %v5710_v5  ;;  %v4758_v5 = vld [vmem:[%s8646_s1 + $0xd0] sm:$0xff] }
 0x1e2   :  { %5713 = vmatprep.subr.bf16.mxu0 %v5712_v6  ;;  %5745 = vmatprep.subr.bf16.mxu1 %v5712_v6  ;;  %v5812_v6 = vpack.c.bf16 %v4759_v2, %v4757_v61  ;;  %v5814_v10 = vpack.c.bf16 %v4758_v5, %v4756_v4  ;;  %v4804_v2 = vld [vmem:[%s8648_s3 + $0x180] sm:$0xff]  ;;  %v4809_v4 = vld [vmem:[%s8648_s3 + $0x1a8] sm:$0xff]  ;;  %v4811_v5 = vld [vmem:[%s8648_s3 + $0x1b8] sm:$0xff] }
 0x1e5   :  { %5715 = vmatpush1.bf16.msra.mxu0 %v5714_v11  ;;  %5747 = vmatpush1.bf16.msra.mxu1 %v5714_v11  ;;  %v4760_v11 = vld [vmem:[%s8646_s1 + $0xe0] sm:$0xff] }
 0x1e6   :  { %5717 = vmatprep.subr.bf16.mxu0 %v5716_v12  ;;  %5749 = vmatprep.subr.bf16.mxu1 %v5716_v12  ;;  %v4762_v12 = vld [vmem:[%s8646_s1 + $0xf0] sm:$0xf] }
 0x1e9   :  { %5719 = vmatpush1.bf16.msra.mxu0 %v5718_v18  ;;  %5751 = vmatpush1.bf16.msra.mxu1 %v5718_v18  ;;  %v5819_v18 = vpack.c.bf16 %v4762_v12, %v4760_v11  ;;  %v4815_v11 = vld [vmem:[%s8648_s3 + $0x1d8] sm:$0xff] }
 0x1ea   :  { %5753 = vmatprep.subr.bf16.mxu0 %v5752_v19  ;;  %5763 = vmatprep.subr.bf16.mxu1 %v5752_v19  ;;  %v4772_v19 = vld [vmem:[%s8646_s1 + $0x100] sm:$0xff] }
 0x1ec   :  { %1881 = vmatmul.mubr.f32.vlgmr.msra.gmra.mrb[8].mxu0 %v7427_v40  ;;  %1954 = vmatmul.mubr.f32.vlgmr.msra.gmra.mrb[4].mxu1 %v1888_v32  ;;  %v2003_v40 = vld [vmem:[%s8646_s1 + $0x38] sm:$0xf]  ;;  %v5836_v32 = vpack.c.bf16 %v4779_v27, %v4777_v26  ;;  %v2933_v26 = vld [vmem:[%s8648_s3 + $0x8] sm:$0xff] }
 0x1ed   :  { %5755 = vmatpush1.bf16.msra.mxu0 %v5754_v28  ;;  %5765 = vmatpush1.bf16.msra.mxu1 %v5754_v28  ;;  %v5776_v46 = vpack.c.bf16 %v2003_v40, %v2001_v39  ;;  %v2631_v28 = vld [vmem:[#allocation2 + $0xa] ss:$2 sm:$0xff]  ;;  %v5852_v39 = vpack.c.bf16 %v4791_v37, %v4789_v1  ;;  %v2935_v27 = vld [vmem:[%s8648_s3 + $0x18] sm:$0xff] }
 0x1ee   :  { %5758 = vmatprep.subr.msk.bf16.mxu0 %vm6683_vm3, %v5756_v29  ;;  %5768 = vmatprep.subr.msk.bf16.mxu1 %vm6683_vm3, %v5756_v29  ;;  %v5834_v29 = vpack.c.bf16 %v4774_v20, %v4772_v19  ;;  %v4790_v40 = vld [vmem:[%s8648_s3 + $0x110] sm:$0xff]  ;;  %v4816_v19 = vld [vmem:[%s8648_s3 + $0x1e0] sm:$0xff] }
 0x1ef   :  { %2092 = vmatprep.mubr.f32.mxu0 %v6557_v0  ;;  %2177 = vmatprep.mubr.f32.mxu1 %v6557_v0 }
 0x1f1   :  { %5761 = vmatpush1.bf16.msk.msra.mxu0 %vm6683_vm3, %v5759_v35  ;;  %5771 = vmatpush1.bf16.msk.msra.mxu1 %vm6683_vm3, %v5759_v35  ;;  %v2815_v35 = vld [vmem:[#allocation2 + $0xb] ss:$2 sm:$0xff] }
 0x1f2   :  { %5773 = vmatprep.subr.bf16.mxu0 %v5772_v36  ;;  %5783 = vmatprep.subr.bf16.mxu1 %v5772_v36  ;;  %v2816_v36 = vld [vmem:[#allocation2 + $0x1b] ss:$2 sm:$0x3f] }
 0x1f4   :  { %4726 = vmatmul.mubr.msk.f32.vlgmr.msra.gmra.mrb[10].mxu0 %vm88_vm0, %v2006_v41  ;;  %4730 = vmatmul.mubr.msk.f32.vlgmr.msra.gmra.mrb[6].mxu1 %vm88_vm0, %v7558_v42 }
 0x1f5   :  { %5775 = vmatpush1.bf16.msra.mxu0 %v5774_v43  ;;  %5785 = vmatpush1.bf16.msra.mxu1 %v5774_v43  ;;  %v5854_v43 = vpack.c.bf16 %v4790_v40, %v4788_v38 }
 0x1f6   :  { %2098 = vmatprep.mubr.f32.mxu0 %v6557_v0  ;;  %2183 = vmatprep.mubr.f32.mxu1 %v6557_v0 }
 0x1f7   :  { %5778 = vmatprep.subr.msk.bf16.mxu0 %vm6683_vm3, %v5776_v46  ;;  %5788 = vmatprep.subr.msk.bf16.mxu1 %vm6683_vm3, %v5776_v46  ;;  %v4794_v46 = vld [vmem:[%s8648_s3 + $0x130] sm:$0xff] }
 0x1f8   :  { %4727 = vmatmul.mubr.msk.f32.gmra.mrb[12].mxu0 %vm88_vm0, %v2007_v49  ;;  %4731 = vmatmul.mubr.msk.f32.gmra.mrb[8].mxu1 %vm88_vm0, %v7575_v50 }
 0x1f9   :  { %5781 = vmatpush1.bf16.msk.msra.mxu0 %vm6683_vm3, %v5779_v51  ;;  %5791 = vmatpush1.bf16.msk.msra.mxu1 %vm6683_vm3, %v5779_v51  ;;  %v4796_v51 = vld [vmem:[%s8648_s3 + $0x140] sm:$0xff] }
 0x1fa   :  { %2266 = vmatprep.mubr.f32.mxu0 %v6557_v0  ;;  %2343 = vmatprep.mubr.f32.mxu1 %v6557_v0  ;;  %v5862_v53 = vpack.c.bf16 %v4798_v52, %v4796_v51 }
 0x1fb   :  { %5793 = vmatprep.subr.bf16.mxu0 %v5792_v54  ;;  %5803 = vmatprep.subr.bf16.mxu1 %v5792_v54  ;;  %v4801_v54 = vld [vmem:[%s8648_s3 + $0x168] sm:$0xff] }
 0x1fc   :  { %4734 = vmatmul.mubr.msk.f32.vlgmr.msra.gmra.mrb[10].mxu0 %vm88_vm0, %v2004_v56  ;;  %4738 = vmatmul.mubr.msk.f32.vlgmr.msra.gmra.mrb[6].mxu1 %vm88_vm0, %v2006_v41  ;;  %v4793_v41 = vld [vmem:[%s8648_s3 + $0x128] sm:$0xff]  ;;  %v5864_v55 = vpack.c.bf16 %v4803_v63, %v4801_v54  ;;  %v4800_v56 = vld [vmem:[%s8648_s3 + $0x160] sm:$0xff] }
 0x1fd   :  { %5795 = vmatpush1.bf16.msra.mxu0 %v5794_v57  ;;  %5805 = vmatpush1.bf16.msra.mxu1 %v5794_v57  ;;  %v4802_v57 = vld [vmem:[%s8648_s3 + $0x170] sm:$0xff] }
 0x1fe   :  { %2272 = vmatprep.mubr.f32.mxu0 %v6557_v0  ;;  %2349 = vmatprep.mubr.f32.mxu1 %v6557_v0  ;;  %v5866_v58 = vpack.c.bf16 %v4802_v57, %v4800_v56 }
 0x1ff   :  { %5798 = vmatprep.subr.msk.bf16.mxu0 %vm6683_vm3, %v5796_v60  ;;  %5808 = vmatprep.subr.msk.bf16.mxu1 %vm6683_vm3, %v5796_v60  ;;  %v4807_v60 = vld [vmem:[%s8648_s3 + $0x198] sm:$0xff] }
 0x200   :  { %4735 = vmatmul.mubr.msk.f32.gmra.mrb[12].mxu0 %vm88_vm0, %v2005_v62  ;;  %4739 = vmatmul.mubr.msk.f32.gmra.mrb[8].mxu1 %vm88_vm0, %v2007_v49  ;;  %v5858_v49 = vpack.c.bf16 %v4794_v46, %v4792_v45  ;;  %v5868_v61 = vpack.c.bf16 %v4807_v60, %v4805_v59  ;;  %v4806_v62 = vld [vmem:[%s8648_s3 + $0x190] sm:$0xff] }
 0x201   :  { %5801 = vmatpush1.bf16.msk.msra.mxu0 %vm6683_vm3, %v5799_v3  ;;  %5811 = vmatpush1.bf16.msk.msra.mxu1 %vm6683_vm3, %v5799_v3  ;;  %v5870_v3 = vpack.c.bf16 %v4806_v62, %v4804_v2 }
 0x202   :  { %2434 = vmatprep.mubr.f32.mxu0 %v6557_v0  ;;  %2519 = vmatprep.mubr.f32.mxu1 %v6557_v0 }
 0x203   :  { %5813 = vmatprep.subr.bf16.mxu0 %v5812_v6  ;;  %5823 = vmatprep.subr.bf16.mxu1 %v5812_v6  ;;  %v5872_v6 = vpack.c.bf16 %v4811_v5, %v4809_v4 }
 0x204   :  { %4750 = vmatmul.mubr.msk.f32.vlgmr.msra.gmra.mrb[10].mxu0 %vm88_vm0, %v7558_v42  ;;  %4754 = vmatmul.mubr.msk.f32.vlgmr.msra.gmra.mrb[6].mxu1 %vm88_vm0, %v2447_v9  ;;  %v4795_v42 = vld [vmem:[%s8648_s3 + $0x138] sm:$0xff] }
 0x205   :  { %5815 = vmatpush1.bf16.msra.mxu0 %v5814_v10  ;;  %5825 = vmatpush1.bf16.msra.mxu1 %v5814_v10  ;;  %v5856_v44 = vpack.c.bf16 %v4795_v42, %v4793_v41  ;;  %v4813_v10 = vld [vmem:[%s8648_s3 + $0x1c8] sm:$0xff] }
 0x206   :  { %2440 = vmatprep.mubr.f32.mxu0 %v6557_v0  ;;  %2525 = vmatprep.mubr.f32.mxu1 %v6557_v0  ;;  %v5876_v12 = vpack.c.bf16 %v4815_v11, %v4813_v10 }
 0x207   :  { %5818 = vmatprep.subr.msk.bf16.mxu0 %vm6683_vm3, %v5816_v13  ;;  %5828 = vmatprep.subr.msk.bf16.mxu1 %vm6683_vm3, %v5816_v13  ;;  %v4812_v13 = vld [vmem:[%s8648_s3 + $0x1c0] sm:$0xff] }
 0x208   :  { %4751 = vmatmul.mubr.msk.f32.gmra.mrb[12].mxu0 %vm88_vm0, %v7575_v50  ;;  %4755 = vmatmul.mubr.msk.f32.gmra.mrb[8].mxu1 %vm88_vm0, %v2448_v17  ;;  %v5860_v50 = vpack.c.bf16 %v4799_v48, %v4797_v47  ;;  %v5878_v15 = vpack.c.bf16 %v4814_v14, %v4812_v13  ;;  %v2939_v13 = vld [vmem:[%s8648_s3 + $0x38] sm:$0xff] }
 0x209   :  { %5821 = vmatpush1.bf16.msk.msra.mxu0 %vm6683_vm3, %v5819_v18  ;;  %5831 = vmatpush1.bf16.msk.msra.mxu1 %vm6683_vm3, %v5819_v18  ;;  %v4819_v18 = vld [vmem:[%s8648_s3 + $0x1f8] sm:$0xff] }
 0x20a   :  { %2618 = vmatprep.mubr.f32.mxu0 %v6557_v0  ;;  %2703 = vmatprep.mubr.f32.mxu1 %v6557_v0 }
 0x20b   :  { %5833 = vmatprep.subr.bf16.mxu0 %v5832_v22  ;;  %5843 = vmatprep.subr.bf16.mxu1 %v5832_v22  ;;  %v4818_v22 = vld [vmem:[%s8648_s3 + $0x1f0] sm:$0xff] }
 0x20c   :  { %4766 = vmatmul.mubr.msk.f32.vlgmr.msra.gmra.mrb[10].mxu0 %vm88_vm0, %v2447_v9  ;;  %4770 = vmatmul.mubr.msk.f32.vlgmr.msra.gmra.mrb[6].mxu1 %vm88_vm0, %v2631_v28  ;;  %v5874_v9 = vpack.c.bf16 %v4810_v8, %v4808_v7 }
 0x20d   :  { %5835 = vmatpush1.bf16.msra.mxu0 %v5834_v29  ;;  %5845 = vmatpush1.bf16.msra.mxu1 %v5834_v29  ;;  %v5916_v29 = vpack.c.bf16 %v2935_v27, %v2933_v26 }
 0x20e   :  { %2624 = vmatprep.mubr.f32.mxu0 %v6557_v0  ;;  %2709 = vmatprep.mubr.f32.mxu1 %v6557_v0 }
 0x20f   :  { %5838 = vmatprep.subr.msk.bf16.mxu0 %vm6683_vm3, %v5836_v32  ;;  %5848 = vmatprep.subr.msk.bf16.mxu1 %vm6683_vm3, %v5836_v32  ;;  %v7824_v32 = vrot.slane %v87_v30, %v1039_v23  ;;  %v2942_v30 = vld [vmem:[%s8648_s3 + $0x50] sm:$0xff] }
 0x210   :  { %4767 = vmatmul.mubr.msk.f32.gmra.mrb[12].mxu0 %vm88_vm0, %v2448_v17  ;;  %4771 = vmatmul.mubr.msk.f32.gmra.mrb[8].mxu1 %vm88_vm0, %v2632_v33  ;;  %v4817_v17 = vld [vmem:[%s8648_s3 + $0x1e8] sm:$0xff] }
 0x211   :  { %5841 = vmatpush1.bf16.msk.msra.mxu0 %vm6683_vm3, %v5839_v34  ;;  %5851 = vmatpush1.bf16.msk.msra.mxu1 %vm6683_vm3, %v5839_v34  ;;  %v5880_v20 = vpack.c.bf16 %v4819_v18, %v4817_v17  ;;  %v2938_v18 = vld [vmem:[%s8648_s3 + $0x30] sm:$0xff] }
 0x212   :  { %2802 = vmatprep.mubr.f32.mxu0 %v6557_v0  ;;  %2887 = vmatprep.mubr.f32.mxu1 %v6557_v0 }
 0x213   :  { %5853 = vmatprep.subr.bf16.mxu0 %v5852_v39  ;;  %5885 = vmatprep.subr.bf16.mxu1 %v5852_v39 }
 0x214   :  { %4782 = vmatmul.mubr.msk.f32.vlgmr.msra.gmra.mrb[10].mxu0 %vm88_vm0, %v2631_v28  ;;  %4786 = vmatmul.mubr.msk.f32.vlgmr.msra.gmra.mrb[6].mxu1 %vm88_vm0, %v2815_v35  ;;  %v5882_v28 = vpack.c.bf16 %v4818_v22, %v4816_v19  ;;  %v2941_v19 = vld [vmem:[%s8648_s3 + $0x48] sm:$0xff] }
 0x215   :  { %2808 = vmatprep.mubr.f32.mxu0 %v6557_v0  ;;  %2893 = vmatprep.mubr.f32.mxu1 %v6557_v0 }
 0x216   :  { %5855 = vmatpush1.bf16.msra.mxu0 %v5854_v43  ;;  %5887 = vmatpush1.bf16.msra.mxu1 %v5854_v43 }
 0x217   :  { %5857 = vmatprep.subr.bf16.mxu0 %v5856_v44  ;;  %5889 = vmatprep.subr.bf16.mxu1 %v5856_v44 }
 0x218   :  { %4783 = vmatmul.mubr.msk.f32.gmra.mrb[12].mxu0 %vm88_vm0, %v2632_v33  ;;  %4787 = vmatmul.mubr.msk.f32.gmra.mrb[8].mxu1 %vm88_vm0, %v2816_v36 }
 0x219   :  { %3062 = vmatprep.mubr.f32.mxu0 %v6557_v0  ;;  %3134 = vmatprep.mubr.f32.mxu1 %v6557_v0 }
 0x21a   :  { %5859 = vmatpush1.bf16.msra.mxu0 %v5858_v49  ;;  %5891 = vmatpush1.bf16.msra.mxu1 %v5858_v49 }
 0x21b   :  { %5861 = vmatprep.subr.bf16.mxu0 %v5860_v50  ;;  %5893 = vmatprep.subr.bf16.mxu1 %v5860_v50 }
 0x21e   :  { %5863 = vmatpush1.bf16.msra.mxu0 %v5862_v53  ;;  %5895 = vmatpush1.bf16.msra.mxu1 %v5862_v53 }
 0x21f   :  { %5865 = vmatprep.subr.bf16.mxu0 %v5864_v55  ;;  %5897 = vmatprep.subr.bf16.mxu1 %v5864_v55 }
 0x222   :  { %5867 = vmatpush1.bf16.msra.mxu0 %v5866_v58  ;;  %5899 = vmatpush1.bf16.msra.mxu1 %v5866_v58 }
 0x223   :  { %5869 = vmatprep.subr.bf16.mxu0 %v5868_v61  ;;  %5901 = vmatprep.subr.bf16.mxu1 %v5868_v61 }
 0x226   :  { %5871 = vmatpush1.bf16.msra.mxu0 %v5870_v3  ;;  %5903 = vmatpush1.bf16.msra.mxu1 %v5870_v3 }
 0x227   :  { %5873 = vmatprep.subr.bf16.mxu0 %v5872_v6  ;;  %5905 = vmatprep.subr.bf16.mxu1 %v5872_v6 }
 0x22a   :  { %5875 = vmatpush1.bf16.msra.mxu0 %v5874_v9  ;;  %5907 = vmatpush1.bf16.msra.mxu1 %v5874_v9 }
 0x22b   :  { %5877 = vmatprep.subr.bf16.mxu0 %v5876_v12  ;;  %5909 = vmatprep.subr.bf16.mxu1 %v5876_v12  ;;  %v2934_v12 = vld [vmem:[%s8648_s3 + $0x10] sm:$0xff] }
 0x22e   :  { %5879 = vmatpush1.bf16.msra.mxu0 %v5878_v15  ;;  %5911 = vmatpush1.bf16.msra.mxu1 %v5878_v15  ;;  %v2936_v15 = vld [vmem:[%s8648_s3 + $0x20] sm:$0xff] }
 0x22f   :  { %5881 = vmatprep.subr.bf16.mxu0 %v5880_v20  ;;  %5913 = vmatprep.subr.bf16.mxu1 %v5880_v20  ;;  %v2943_v20 = vld [vmem:[%s8648_s3 + $0x58] sm:$0xff]  ;;  %v5922_v27 = vpack.c.bf16 %v2938_v18, %v2936_v15 }
 0x230   :  { %v4835_v15 = vld [vmem:[%s8648_s3 + $0x278] sm:$0xff] }
 0x232   :  { %5883 = vmatpush1.bf16.msra.mxu0 %v5882_v28  ;;  %5915 = vmatpush1.bf16.msra.mxu1 %v5882_v28  ;;  %v5924_v28 = vpack.c.bf16 %v2943_v20, %v2941_v19  ;;  %v4832_v19 = vld [vmem:[%s8648_s3 + $0x260] sm:$0xff]  ;;  %v4834_v20 = vld [vmem:[%s8648_s3 + $0x270] sm:$0xff] }
 0x233   :  { %5917 = vmatprep.subr.bf16.mxu0 %v5916_v29  ;;  %5949 = vmatprep.subr.bf16.mxu1 %v5916_v29  ;;  %v2940_v29 = vld [vmem:[%s8648_s3 + $0x40] sm:$0xff] }
 0x2bf   :  { %v1882_v33 = vpop.f32.mrb[8].mxu0  ;;  %v1955_v34 = vpop.f32.mrb[4].mxu1 }
 0x2c0   :  { %v1975_v35 = vadd.f32 %v7820_v31, %v1882_v33  ;;  %v1979_v36 = vadd.f32 %v7820_v31, %v1955_v34  ;;  %v1884_v1 = vpop.f32.mrb[9].mxu0  ;;  %v1957_v37 = vpop.f32.mrb[5].mxu1  ;;  %v2945_v33 = vld [vmem:[%s8648_s3 + $0x68] sm:$0xff]  ;;  %v2947_v34 = vld [vmem:[%s8648_s3 + $0x78] sm:$0xff] }
 0x2c1   :  { %v1976_v38 = vadd.f32 %v7824_v32, %v1884_v1  ;;  %v1980_v39 = vadd.f32 %v7824_v32, %v1957_v37  ;;  %v2944_v1 = vld [vmem:[%s8648_s3 + $0x60] sm:$0xff]  ;;  %v2946_v37 = vld [vmem:[%s8648_s3 + $0x70] sm:$0xff] }
 0x2c2   :  { %v1977_v40 = vmax.f32 %v1975_v35, 0.0  ;;  %v1981_v41 = vmax.f32 %v1979_v36, 0.0  ;;  %v5926_v35 = vpack.c.bf16 %v2942_v30, %v2940_v29  ;;  %v5928_v36 = vpack.c.bf16 %v2947_v34, %v2945_v33  ;;  %v4836_v30 = vld [vmem:[%s8648_s3 + $0x280] sm:$0xff]  ;;  %v4838_v33 = vld [vmem:[%s8648_s3 + $0x290] sm:$0xff]  ;;  %v4841_v34 = vld [vmem:[%s8648_s3 + $0x2a8] sm:$0xff] }
 0x2c3   :  { %v1978_v21 = vmax.f32 %v1976_v38, 0.0  ;;  %v1982_v42 = vmax.f32 %v1980_v39, 0.0  ;;  %v2949_v38 = vld [vmem:[%s8648_s3 + $0x88] sm:$0xff]  ;;  %v2951_v39 = vld [vmem:[%s8648_s3 + $0x98] sm:$0xff] }
 0x2c4   :  { %v1983_v43 = vmax.f32 %v1977_v40, %v1981_v41  ;;  %v5930_v40 = vpack.c.bf16 %v2946_v37, %v2944_v1  ;;  %v5932_v41 = vpack.c.bf16 %v2951_v39, %v2949_v38  ;;  %v4840_v37 = vld [vmem:[%s8648_s3 + $0x2a0] sm:$0xff]  ;;  %v4842_v38 = vld [vmem:[%s8648_s3 + $0x2b0] sm:$0xff]  ;;  %v4845_v39 = vld [vmem:[%s8648_s3 + $0x2c8] sm:$0xff] }
 0x2c5   :  { %v1984_v16 = vmax.f32 %v1978_v21, %v1982_v42  ;;  %v2948_v21 = vld [vmem:[%s8648_s3 + $0x80] sm:$0xff]  ;;  %v2950_v42 = vld [vmem:[%s8648_s3 + $0x90] sm:$0xff] }
 0x2c7   :  { %v1985_v23 = vmax.f32 %v1983_v43, %v1984_v16  ;;  %v2953_v43 = vld [vmem:[%s8648_s3 + $0xa8] sm:$0xff]  ;;  %v2955_v16 = vld [vmem:[%s8648_s3 + $0xb8] sm:$0xff] }
 0x2c9   :  { %1986 = vst [vmem:[#allocation4] sm:$0x1f] %v1985_v23  ;;  %v5934_v23 = vpack.c.bf16 %v2950_v42, %v2948_v21  ;;  %v4844_v42 = vld [vmem:[%s8648_s3 + $0x2c0] sm:$0xff] }
 0x2e7   :  { %v2804_v44 = vpop.f32.mrb[10].mxu0  ;;  %v2889_v45 = vpop.f32.mrb[6].mxu1 }
 0x2e8   :  { %v2908_v46 = vadd.f32 %v2804_v44, %v7082_v24  ;;  %v2916_v47 = vadd.f32 %v2889_v45, %v7082_v24  ;;  %v2806_v48 = vpop.f32.mrb[11].mxu0  ;;  %v2891_v49 = vpop.f32.mrb[7].mxu1  ;;  %v5936_v44 = vpack.c.bf16 %v2955_v16, %v2953_v43  ;;  %v2952_v45 = vld [vmem:[%s8648_s3 + $0xa0] sm:$0xff]  ;;  %v4846_v43 = vld [vmem:[%s8648_s3 + $0x2d0] sm:$0xff]  ;;  %v4849_v16 = vld [vmem:[%s8648_s3 + $0x2e8] sm:$0xff] }
 0x2e9   :  { %v2909_v50 = vadd.f32 %v2806_v48, %v7086_v25  ;;  %v2917_v51 = vadd.f32 %v2891_v49, %v7086_v25  ;;  %v2959_v48 = vld [vmem:[%s8648_s3 + $0xd8] sm:$0xff] }
 0x2ea   :  { %v2912_v52 = vmax.f32 %v2908_v46, 0.0  ;;  %v2920_v53 = vmax.f32 %v2916_v47, 0.0  ;;  %v2954_v46 = vld [vmem:[%s8648_s3 + $0xb0] sm:$0xff]  ;;  %v2957_v47 = vld [vmem:[%s8648_s3 + $0xc8] sm:$0xff] }
 0x2eb   :  { %v2913_v54 = vmax.f32 %v2909_v50, 0.0  ;;  %v2921_v63 = vmax.f32 %v2917_v51, 0.0  ;;  %v2810_v55 = vpop.f32.mrb[12].mxu0  ;;  %v2895_v56 = vpop.f32.mrb[8].mxu1  ;;  %v5938_v49 = vpack.c.bf16 %v2954_v46, %v2952_v45  ;;  %v5940_v50 = vpack.c.bf16 %v2959_v48, %v2957_v47  ;;  %v2956_v51 = vld [vmem:[%s8648_s3 + $0xc0] sm:$0xff]  ;;  %v4850_v47 = vld [vmem:[%s8648_s3 + $0x2f0] sm:$0xff] }
 0x2ec   :  { %v2924_v57 = vmax.f32 %v2912_v52, %v2920_v53  ;;  %v2910_v58 = vadd.f32 %v2810_v55, %v7082_v24  ;;  %v2918_v59 = vadd.f32 %v2895_v56, %v7082_v24  ;;  %v2812_v60 = vpop.f32.mrb[13].mxu0  ;;  %v2897_v61 = vpop.f32.mrb[9].mxu1  ;;  %v2932_v24 = vld [vmem:[%s8648_s3] sm:$0xff]  ;;  %v2958_v52 = vld [vmem:[%s8648_s3 + $0xd0] sm:$0xff]  ;;  %v2961_v53 = vld [vmem:[%s8648_s3 + $0xe8] sm:$0xff] }
 0x2ed   :  { %v2925_v2 = vmax.f32 %v2913_v54, %v2921_v63  ;;  %v2911_v62 = vadd.f32 %v2812_v60, %v7086_v25  ;;  %v2919_v3 = vadd.f32 %v2897_v61, %v7086_v25  ;;  %v2937_v25 = vld [vmem:[%s8648_s3 + $0x28] sm:$0xff]  ;;  %v5918_v14 = vpack.c.bf16 %v2934_v12, %v2932_v24  ;;  %v2963_v54 = vld [vmem:[%s8648_s3 + $0xf8] sm:$0xff]  ;;  %v2960_v56 = vld [vmem:[%s8648_s3 + $0xe0] sm:$0xff] }
 0x2ee   :  { %v2914_v4 = vmax.f32 %v2910_v58, 0.0  ;;  %v2922_v5 = vmax.f32 %v2918_v59, 0.0  ;;  %v5920_v17 = vpack.c.bf16 %v2939_v13, %v2937_v25  ;;  %v5942_v63 = vpack.c.bf16 %v2958_v52, %v2956_v51  ;;  %v4821_v58 = vld [vmem:[%s8648_s3 + $0x208] sm:$0xff]  ;;  %v4823_v59 = vld [vmem:[%s8648_s3 + $0x218] sm:$0xff]  ;;  %v4828_v25 = vld [vmem:[%s8648_s3 + $0x240] sm:$0xff] }
 0x2ef   :  { %v2928_v6 = vmax.f32 %v2924_v57, %v2925_v2  ;;  %v2915_v7 = vmax.f32 %v2911_v62, 0.0  ;;  %v2923_v8 = vmax.f32 %v2919_v3, 0.0  ;;  %v5944_v55 = vpack.c.bf16 %v2963_v54, %v2961_v53  ;;  %v2962_v57 = vld [vmem:[%s8648_s3 + $0xf0] sm:$0xff]  ;;  %v4820_v2 = vld [vmem:[%s8648_s3 + $0x200] sm:$0xff]  ;;  %v4825_v3 = vld [vmem:[%s8648_s3 + $0x228] sm:$0xff] }
 0x2f0   :  { %v2926_v9 = vmax.f32 %v2914_v4, %v2922_v5  ;;  %v5946_v60 = vpack.c.bf16 %v2962_v57, %v2960_v56  ;;  %v5980_v61 = vpack.c.bf16 %v4823_v59, %v4821_v58  ;;  %v4822_v62 = vld [vmem:[%s8648_s3 + $0x210] sm:$0xff]  ;;  %v4827_v4 = vld [vmem:[%s8648_s3 + $0x238] sm:$0xff]  ;;  %v4848_v46 = vld [vmem:[%s8648_s3 + $0x2e0] sm:$0xff] }
 0x2f1   :  { %2930 = vst [vmem:[#allocation3] sm:$0xff] %v2928_v6  ;;  %v2927_v10 = vmax.f32 %v2915_v7, %v2923_v8  ;;  %v5982_v5 = vpack.c.bf16 %v4822_v62, %v4820_v2  ;;  %v5984_v6 = vpack.c.bf16 %v4827_v4, %v4825_v3  ;;  %v4824_v7 = vld [vmem:[%s8648_s3 + $0x220] sm:$0xff]  ;;  %v4826_v8 = vld [vmem:[%s8648_s3 + $0x230] sm:$0xff]  ;;  %v4853_v48 = vld [vmem:[%s8648_s3 + $0x308] sm:$0xff] }
 0x2f2   :  { %v5986_v24 = vpack.c.bf16 %v4826_v8, %v4824_v7  ;;  %v4830_v13 = vld [vmem:[%s8648_s3 + $0x250] sm:$0xff]  ;;  %v4852_v52 = vld [vmem:[%s8648_s3 + $0x300] sm:$0xff]  ;;  %v4857_v54 = vld [vmem:[%s8648_s3 + $0x328] sm:$0xff] }
 0x2f3   :  { %v2929_v11 = vmax.f32 %v2926_v9, %v2927_v10  ;;  %v4829_v10 = vld [vmem:[%s8648_s3 + $0x248] sm:$0xff]  ;;  %v4854_v53 = vld [vmem:[%s8648_s3 + $0x310] sm:$0xff]  ;;  %v4856_v57 = vld [vmem:[%s8648_s3 + $0x320] sm:$0xff] }
 0x2f4   :  { %v4858_v58 = vld [vmem:[%s8648_s3 + $0x330] sm:$0xff]  ;;  %v4860_v3 = vld [vmem:[%s8648_s3 + $0x340] sm:$0xff] }
 0x2f5   :  { %2931 = vst [vmem:[#allocation3 + $0x8] sm:$0x3f] %v2929_v11  ;;  %v4831_v11 = vld [vmem:[%s8648_s3 + $0x258] sm:$0xff]  ;;  %v6050_v2 = vpack.c.bf16 %v4858_v58, %v4856_v57  ;;  %v4862_v4 = vld [vmem:[%s8648_s3 + $0x350] sm:$0xff]  ;;  %v4864_v8 = vld [vmem:[%s8648_s3 + $0x360] sm:$0xff] }
 0x2f6   :  { %v5988_v12 = vpack.c.bf16 %v4831_v11, %v4829_v10  ;;  %v4869_v10 = vld [vmem:[%s8648_s3 + $0x388] sm:$0xff]  ;;  %v4871_v11 = vld [vmem:[%s8648_s3 + $0x398] sm:$0xff]  ;;  %v4896_v58 = vld [vmem:[%s8648_s3 + $0x460] sm:$0xff] }
 0x2fc   :  { %v7862_v22 = vld [vmem:[#allocation3 + $0x1] ss:$2 sm:$0x1f]  ;;  %v7864_v26 = vld [vmem:[#allocation3 + $0x2] ss:$2 sm:$0x1f] }
 0x2fd   :  { %3063 = vmatmul.mubr.f32.vlgmr.msra.gmra.mrb[14].mxu0 %v7862_v22  ;;  %3135 = vmatmul.mubr.f32.vlgmr.msra.gmra.mrb[10].mxu1 %v7864_v26  ;;  %v2964_v9 = vld [vmem:[#allocation3] ss:$2 sm:$0x1f]  ;;  %v8059_v59 = vld [vmem:[#allocation3 + $0x3] ss:$2 sm:$0x1f] }
 0x2fe   :  { %5919 = vmatpush1.bf16.msra.mxu0 %v5918_v14  ;;  %5951 = vmatpush1.bf16.msra.mxu1 %v5918_v14  ;;  %v4833_v14 = vld [vmem:[%s8648_s3 + $0x268] sm:$0xff] }
 0x2ff   :  { %5921 = vmatprep.subr.bf16.mxu0 %v5920_v17  ;;  %5953 = vmatprep.subr.bf16.mxu1 %v5920_v17  ;;  %v5990_v17 = vpack.c.bf16 %v4830_v13, %v4828_v25  ;;  %v5992_v18 = vpack.c.bf16 %v4835_v15, %v4833_v14  ;;  %v4868_v25 = vld [vmem:[%s8648_s3 + $0x380] sm:$0xff]  ;;  %v4870_v13 = vld [vmem:[%s8648_s3 + $0x390] sm:$0xff]  ;;  %v4873_v14 = vld [vmem:[%s8648_s3 + $0x3a8] sm:$0xff] }
 0x300   :  { %3205 = vmatprep.mubr.f32.mxu0 %v6557_v0  ;;  %3276 = vmatprep.mubr.f32.mxu1 %v6557_v0  ;;  %v4875_v15 = vld [vmem:[%s8648_s3 + $0x3b8] sm:$0xff] }
 0x302   :  { %5923 = vmatpush1.bf16.msra.mxu0 %v5922_v27  ;;  %5955 = vmatpush1.bf16.msra.mxu1 %v5922_v27  ;;  %v4839_v27 = vld [vmem:[%s8648_s3 + $0x298] sm:$0xff] }
 0x303   :  { %5925 = vmatprep.subr.bf16.mxu0 %v5924_v28  ;;  %5957 = vmatprep.subr.bf16.mxu1 %v5924_v28  ;;  %v5994_v28 = vpack.c.bf16 %v4834_v20, %v4832_v19  ;;  %v4872_v19 = vld [vmem:[%s8648_s3 + $0x3a0] sm:$0xff]  ;;  %v4874_v20 = vld [vmem:[%s8648_s3 + $0x3b0] sm:$0xff] }
 0x306   :  { %5927 = vmatpush1.bf16.msra.mxu0 %v5926_v35  ;;  %5959 = vmatpush1.bf16.msra.mxu1 %v5926_v35  ;;  %v4843_v35 = vld [vmem:[%s8648_s3 + $0x2b8] sm:$0xff] }
 0x307   :  { %5929 = vmatprep.subr.bf16.mxu0 %v5928_v36  ;;  %5961 = vmatprep.subr.bf16.mxu1 %v5928_v36  ;;  %v5998_v36 = vpack.c.bf16 %v4838_v33, %v4836_v30  ;;  %v6000_v1 = vpack.c.bf16 %v4843_v35, %v4841_v34  ;;  %v4876_v30 = vld [vmem:[%s8648_s3 + $0x3c0] sm:$0xff]  ;;  %v4878_v33 = vld [vmem:[%s8648_s3 + $0x3d0] sm:$0xff]  ;;  %v4881_v34 = vld [vmem:[%s8648_s3 + $0x3e8] sm:$0xff] }
 0x308   :  { %v4883_v35 = vld [vmem:[%s8648_s3 + $0x3f8] sm:$0xff] }
 0x30a   :  { %5931 = vmatpush1.bf16.msra.mxu0 %v5930_v40  ;;  %5963 = vmatpush1.bf16.msra.mxu1 %v5930_v40  ;;  %v4847_v40 = vld [vmem:[%s8648_s3 + $0x2d8] sm:$0xff] }
 0x30b   :  { %5933 = vmatprep.subr.bf16.mxu0 %v5932_v41  ;;  %5965 = vmatprep.subr.bf16.mxu1 %v5932_v41  ;;  %v6002_v41 = vpack.c.bf16 %v4842_v38, %v4840_v37  ;;  %v6004_v21 = vpack.c.bf16 %v4847_v40, %v4845_v39  ;;  %v4880_v37 = vld [vmem:[%s8648_s3 + $0x3e0] sm:$0xff]  ;;  %v4882_v38 = vld [vmem:[%s8648_s3 + $0x3f0] sm:$0xff]  ;;  %v4885_v39 = vld [vmem:[%s8648_s3 + $0x408] sm:$0xff] }
 0x30c   :  { %v4887_v40 = vld [vmem:[%s8648_s3 + $0x418] sm:$0xff] }
 0x30e   :  { %5935 = vmatpush1.bf16.msra.mxu0 %v5934_v23  ;;  %5967 = vmatpush1.bf16.msra.mxu1 %v5934_v23  ;;  %v4851_v23 = vld [vmem:[%s8648_s3 + $0x2f8] sm:$0xff] }
 0x30f   :  { %5937 = vmatprep.subr.bf16.mxu0 %v5936_v44  ;;  %5969 = vmatprep.subr.bf16.mxu1 %v5936_v44  ;;  %v6006_v44 = vpack.c.bf16 %v4846_v43, %v4844_v42  ;;  %v6008_v45 = vpack.c.bf16 %v4851_v23, %v4849_v16  ;;  %v4884_v42 = vld [vmem:[%s8648_s3 + $0x400] sm:$0xff]  ;;  %v4886_v43 = vld [vmem:[%s8648_s3 + $0x410] sm:$0xff]  ;;  %v4889_v16 = vld [vmem:[%s8648_s3 + $0x428] sm:$0xff] }
 0x310   :  { %v4891_v23 = vld [vmem:[%s8648_s3 + $0x438] sm:$0xff] }
 0x312   :  { %5939 = vmatpush1.bf16.msra.mxu0 %v5938_v49  ;;  %5971 = vmatpush1.bf16.msra.mxu1 %v5938_v49  ;;  %v4855_v49 = vld [vmem:[%s8648_s3 + $0x318] sm:$0xff] }
 0x313   :  { %5941 = vmatprep.subr.bf16.mxu0 %v5940_v50  ;;  %5973 = vmatprep.subr.bf16.mxu1 %v5940_v50  ;;  %v6010_v50 = vpack.c.bf16 %v4850_v47, %v4848_v46  ;;  %v6044_v51 = vpack.c.bf16 %v4855_v49, %v4853_v48  ;;  %v4888_v46 = vld [vmem:[%s8648_s3 + $0x420] sm:$0xff]  ;;  %v4890_v47 = vld [vmem:[%s8648_s3 + $0x430] sm:$0xff]  ;;  %v4893_v49 = vld [vmem:[%s8648_s3 + $0x448] sm:$0xff] }
 0x314   :  { %v8161_v48 = vld [vmem:[#allocation3 + $0x4] ss:$2 sm:$0x1f] }
 0x316   :  { %5943 = vmatpush1.bf16.msra.mxu0 %v5942_v63  ;;  %5975 = vmatpush1.bf16.msra.mxu1 %v5942_v63  ;;  %v4859_v63 = vld [vmem:[%s8648_s3 + $0x338] sm:$0xff] }
 0x317   :  { %5945 = vmatprep.subr.bf16.mxu0 %v5944_v55  ;;  %5977 = vmatprep.subr.bf16.mxu1 %v5944_v55  ;;  %v6046_v55 = vpack.c.bf16 %v4854_v53, %v4852_v52  ;;  %v6048_v56 = vpack.c.bf16 %v4859_v63, %v4857_v54  ;;  %v4892_v53 = vld [vmem:[%s8648_s3 + $0x440] sm:$0xff]  ;;  %v4894_v54 = vld [vmem:[%s8648_s3 + $0x450] sm:$0xff]  ;;  %v4897_v63 = vld [vmem:[%s8648_s3 + $0x468] sm:$0xff] }
 0x31a   :  { %5947 = vmatpush1.bf16.msra.mxu0 %v5946_v60  ;;  %5979 = vmatpush1.bf16.msra.mxu1 %v5946_v60  ;;  %v4861_v60 = vld [vmem:[%s8648_s3 + $0x348] sm:$0xff] }
 0x31b   :  { %5981 = vmatprep.subr.bf16.mxu0 %v5980_v61  ;;  %6013 = vmatprep.subr.bf16.mxu1 %v5980_v61  ;;  %v4863_v61 = vld [vmem:[%s8648_s3 + $0x358] sm:$0xff] }
 0x31c   :  { %v6052_v62 = vpack.c.bf16 %v4863_v61, %v4861_v60  ;;  %v4901_v60 = vld [vmem:[%s8648_s3 + $0x488] sm:$0xff]  ;;  %v4903_v61 = vld [vmem:[%s8648_s3 + $0x498] sm:$0xff] }
 0x31d   :  { %3206 = vmatmul.mubr.f32.vlgmr.msra.gmra.mrb[14].mxu0 %v2964_v9  ;;  %3277 = vmatmul.mubr.f32.vlgmr.msra.gmra.mrb[10].mxu1 %v7862_v22  ;;  %v4837_v22 = vld [vmem:[%s8648_s3 + $0x288] sm:$0xff]  ;;  %v4866_v9 = vld [vmem:[%s8648_s3 + $0x370] sm:$0xff] }
 0x31e   :  { %5983 = vmatpush1.bf16.msra.mxu0 %v5982_v5  ;;  %6015 = vmatpush1.bf16.msra.mxu1 %v5982_v5  ;;  %v5996_v29 = vpack.c.bf16 %v4839_v27, %v4837_v22  ;;  %v4867_v5 = vld [vmem:[%s8648_s3 + $0x378] sm:$0xff]  ;;  %v4877_v22 = vld [vmem:[%s8648_s3 + $0x3c8] sm:$0xff] }
 0x31f   :  { %5985 = vmatprep.subr.bf16.mxu0 %v5984_v6  ;;  %6017 = vmatprep.subr.bf16.mxu1 %v5984_v6  ;;  %v6054_v6 = vpack.c.bf16 %v4862_v4, %v4860_v3  ;;  %v4879_v27 = vld [vmem:[%s8648_s3 + $0x3d8] sm:$0xff]  ;;  %v4900_v3 = vld [vmem:[%s8648_s3 + $0x480] sm:$0xff]  ;;  %v4902_v4 = vld [vmem:[%s8648_s3 + $0x490] sm:$0xff] }
 0x320   :  { %3379 = vmatprep.mubr.f32.mxu0 %v6557_v0  ;;  %3451 = vmatprep.mubr.f32.mxu1 %v6557_v0 }
 0x322   :  { %5987 = vmatpush1.bf16.msra.mxu0 %v5986_v24  ;;  %6019 = vmatpush1.bf16.msra.mxu1 %v5986_v24  ;;  %v6058_v24 = vpack.c.bf16 %v4866_v9, %v4864_v8  ;;  %v4904_v8 = vld [vmem:[%s8648_s3 + $0x4a0] sm:$0xff]  ;;  %v4906_v9 = vld [vmem:[%s8648_s3 + $0x4b0] sm:$0xff] }
 0x323   :  { %5989 = vmatprep.subr.bf16.mxu0 %v5988_v12  ;;  %6021 = vmatprep.subr.bf16.mxu1 %v5988_v12  ;;  %v6060_v12 = vpack.c.bf16 %v4871_v11, %v4869_v10  ;;  %v4909_v10 = vld [vmem:[%s8648_s3 + $0x4c8] sm:$0xff]  ;;  %v4911_v11 = vld [vmem:[%s8648_s3 + $0x4d8] sm:$0xff] }
 0x326   :  { %5991 = vmatpush1.bf16.msra.mxu0 %v5990_v17  ;;  %6023 = vmatpush1.bf16.msra.mxu1 %v5990_v17  ;;  %v6062_v17 = vpack.c.bf16 %v4870_v13, %v4868_v25  ;;  %v4908_v25 = vld [vmem:[%s8648_s3 + $0x4c0] sm:$0xff]  ;;  %v4910_v13 = vld [vmem:[%s8648_s3 + $0x4d0] sm:$0xff] }
 0x327   :  { %5993 = vmatprep.subr.bf16.mxu0 %v5992_v18  ;;  %6025 = vmatprep.subr.bf16.mxu1 %v5992_v18  ;;  %v6064_v18 = vpack.c.bf16 %v4875_v15, %v4873_v14  ;;  %v4913_v14 = vld [vmem:[%s8648_s3 + $0x4e8] sm:$0xff]  ;;  %v4915_v15 = vld [vmem:[%s8648_s3 + $0x4f8] sm:$0xff] }
 0x32a   :  { %5995 = vmatpush1.bf16.msra.mxu0 %v5994_v28  ;;  %6027 = vmatpush1.bf16.msra.mxu1 %v5994_v28  ;;  %v6066_v28 = vpack.c.bf16 %v4874_v20, %v4872_v19  ;;  %v4912_v19 = vld [vmem:[%s8648_s3 + $0x4e0] sm:$0xff]  ;;  %v4914_v20 = vld [vmem:[%s8648_s3 + $0x4f0] sm:$0xff] }
 0x32b   :  { %5997 = vmatprep.subr.bf16.mxu0 %v5996_v29  ;;  %6029 = vmatprep.subr.bf16.mxu1 %v5996_v29  ;;  %v6068_v29 = vpack.c.bf16 %v4879_v27, %v4877_v22  ;;  %v6138_v22 = vpack.c.bf16 %v4914_v20, %v4912_v19  ;;  %v4916_v27 = vld [vmem:[%s8650_s5 + $0x80] sm:$0xff] }
 0x32e   :  { %5999 = vmatpush1.bf16.msra.mxu0 %v5998_v36  ;;  %6031 = vmatpush1.bf16.msra.mxu1 %v5998_v36  ;;  %v6070_v36 = vpack.c.bf16 %v4878_v33, %v4876_v30  ;;  %v3834_v30 = vld [vmem:[%s8650_s5 + $0x8] sm:$0xff] }
 0x32f   :  { %6001 = vmatprep.subr.bf16.mxu0 %v6000_v1  ;;  %6033 = vmatprep.subr.bf16.mxu1 %v6000_v1  ;;  %v6072_v1 = vpack.c.bf16 %v4883_v35, %v4881_v34  ;;  %v4918_v35 = vld [vmem:[%s8650_s5 + $0x90] sm:$0xff] }
 0x332   :  { %6003 = vmatpush1.bf16.msra.mxu0 %v6002_v41  ;;  %6035 = vmatpush1.bf16.msra.mxu1 %v6002_v41  ;;  %v6074_v41 = vpack.c.bf16 %v4882_v38, %v4880_v37  ;;  %v3835_v37 = vld [vmem:[%s8650_s5 + $0x10] sm:$0xff]  ;;  %v3836_v38 = vld [vmem:[%s8650_s5 + $0x18] sm:$0xff] }
 0x333   :  { %6005 = vmatprep.subr.bf16.mxu0 %v6004_v21  ;;  %6037 = vmatprep.subr.bf16.mxu1 %v6004_v21  ;;  %v6108_v21 = vpack.c.bf16 %v4887_v40, %v4885_v39  ;;  %v3744_v39 = vld [vmem:[#allocation3 + $0x5] ss:$2 sm:$0x1f] }
 0x336   :  { %6007 = vmatpush1.bf16.msra.mxu0 %v6006_v44  ;;  %6039 = vmatpush1.bf16.msra.mxu1 %v6006_v44  ;;  %v6110_v44 = vpack.c.bf16 %v4886_v43, %v4884_v42  ;;  %v4921_v42 = vld [vmem:[%s8650_s5 + $0xa8] sm:$0xff]  ;;  %v3837_v43 = vld [vmem:[%s8650_s5 + $0x20] sm:$0xff] }
 0x337   :  { %6009 = vmatprep.subr.bf16.mxu0 %v6008_v45  ;;  %6041 = vmatprep.subr.bf16.mxu1 %v6008_v45  ;;  %v6112_v45 = vpack.c.bf16 %v4891_v23, %v4889_v16  ;;  %v3838_v16 = vld [vmem:[%s8650_s5 + $0x28] sm:$0xff] }
 0x33a   :  { %6011 = vmatpush1.bf16.msra.mxu0 %v6010_v50  ;;  %6043 = vmatpush1.bf16.msra.mxu1 %v6010_v50  ;;  %v4895_v50 = vld [vmem:[%s8648_s3 + $0x458] sm:$0xff] }
 0x33b   :  { %6045 = vmatprep.subr.bf16.mxu0 %v6044_v51  ;;  %6077 = vmatprep.subr.bf16.mxu1 %v6044_v51  ;;  %v6114_v51 = vpack.c.bf16 %v4890_v47, %v4888_v46  ;;  %v6116_v52 = vpack.c.bf16 %v4895_v50, %v4893_v49  ;;  %v4923_v46 = vld [vmem:[%s8650_s5 + $0xb8] sm:$0xff]  ;;  %v3839_v47 = vld [vmem:[%s8650_s5 + $0x30] sm:$0xff] }
 0x33d   :  { %3380 = vmatmul.mubr.f32.vlgmr.msra.gmra.mrb[14].mxu0 %v7864_v26  ;;  %3452 = vmatmul.mubr.f32.vlgmr.msra.gmra.mrb[10].mxu1 %v8059_v59  ;;  %v4865_v26 = vld [vmem:[%s8648_s3 + $0x368] sm:$0xff] }
 0x33e   :  { %6047 = vmatpush1.bf16.msra.mxu0 %v6046_v55  ;;  %6079 = vmatpush1.bf16.msra.mxu1 %v6046_v55  ;;  %v6056_v7 = vpack.c.bf16 %v4867_v5, %v4865_v26  ;;  %v4899_v55 = vld [vmem:[%s8648_s3 + $0x478] sm:$0xff]  ;;  %v4905_v26 = vld [vmem:[%s8648_s3 + $0x4a8] sm:$0xff] }
 0x33f   :  { %6049 = vmatprep.subr.bf16.mxu0 %v6048_v56  ;;  %6081 = vmatprep.subr.bf16.mxu1 %v6048_v56  ;;  %v6118_v56 = vpack.c.bf16 %v4894_v54, %v4892_v53  ;;  %v6120_v57 = vpack.c.bf16 %v4899_v55, %v4897_v63  ;;  %v4907_v5 = vld [vmem:[%s8648_s3 + $0x4b8] sm:$0xff]  ;;  %v3841_v53 = vld [vmem:[%s8650_s5 + $0x40] sm:$0xff]  ;;  %v3842_v63 = vld [vmem:[%s8650_s5 + $0x48] sm:$0xff] }
 0x340   :  { %3558 = vmatprep.mubr.f32.mxu0 %v6557_v0  ;;  %3630 = vmatprep.mubr.f32.mxu1 %v6557_v0  ;;  %v6209_v55 = vpack.c.bf16 %v3842_v63, %v3841_v53  ;;  %v4941_v63 = vld [vmem:[%s8650_s5 + $0x148] sm:$0xff] }
 0x342   :  { %6051 = vmatpush1.bf16.msra.mxu0 %v6050_v2  ;;  %6083 = vmatpush1.bf16.msra.mxu1 %v6050_v2 }
 0x343   :  { %6053 = vmatprep.subr.bf16.mxu0 %v6052_v62  ;;  %6085 = vmatprep.subr.bf16.mxu1 %v6052_v62  ;;  %v6124_v62 = vpack.c.bf16 %v4903_v61, %v4901_v60  ;;  %v3844_v60 = vld [vmem:[%s8650_s5 + $0x58] sm:$0xff] }
 0x346   :  { %6055 = vmatpush1.bf16.msra.mxu0 %v6054_v6  ;;  %6087 = vmatpush1.bf16.msra.mxu1 %v6054_v6  ;;  %v6126_v6 = vpack.c.bf16 %v4902_v4, %v4900_v3  ;;  %v3845_v3 = vld [vmem:[%s8650_s5 + $0x60] sm:$0xff] }
 0x347   :  { %6057 = vmatprep.subr.bf16.mxu0 %v6056_v7  ;;  %6089 = vmatprep.subr.bf16.mxu1 %v6056_v7  ;;  %v6128_v7 = vpack.c.bf16 %v4907_v5, %v4905_v26  ;;  %v3846_v26 = vld [vmem:[%s8650_s5 + $0x68] sm:$0xff] }
 0x348   :  { %v6215_v5 = vpack.c.bf16 %v3846_v26, %v3845_v3  ;;  %v4945_v26 = vld [vmem:[%s8650_s5 + $0x168] sm:$0xff] }
 0x34a   :  { %6059 = vmatpush1.bf16.msra.mxu0 %v6058_v24  ;;  %6091 = vmatpush1.bf16.msra.mxu1 %v6058_v24  ;;  %v6130_v24 = vpack.c.bf16 %v4906_v9, %v4904_v8  ;;  %v3847_v8 = vld [vmem:[%s8650_s5 + $0x70] sm:$0xff] }
 0x34b   :  { %6061 = vmatprep.subr.bf16.mxu0 %v6060_v12  ;;  %6093 = vmatprep.subr.bf16.mxu1 %v6060_v12  ;;  %v6132_v12 = vpack.c.bf16 %v4911_v11, %v4909_v10  ;;  %v3848_v10 = vld [vmem:[%s8650_s5 + $0x78] sm:$0xff] }
 0x34c   :  { %v6218_v11 = vpack.c.bf16 %v3848_v10, %v3847_v8  ;;  %v4947_v10 = vld [vmem:[%s8650_s5 + $0x178] sm:$0xff] }
 0x34e   :  { %6063 = vmatpush1.bf16.msra.mxu0 %v6062_v17  ;;  %6095 = vmatpush1.bf16.msra.mxu1 %v6062_v17  ;;  %v6134_v17 = vpack.c.bf16 %v4910_v13, %v4908_v25 }
 0x34f   :  { %6065 = vmatprep.subr.bf16.mxu0 %v6064_v18  ;;  %6097 = vmatprep.subr.bf16.mxu1 %v6064_v18  ;;  %v6136_v18 = vpack.c.bf16 %v4915_v15, %v4913_v14 }
 0x352   :  { %6067 = vmatpush1.bf16.msra.mxu0 %v6066_v28  ;;  %6099 = vmatpush1.bf16.msra.mxu1 %v6066_v28  ;;  %v4917_v28 = vld [vmem:[%s8650_s5 + $0x88] sm:$0xff] }
 0x353   :  { %6069 = vmatprep.subr.bf16.mxu0 %v6068_v29  ;;  %6101 = vmatprep.subr.bf16.mxu1 %v6068_v29  ;;  %v3833_v29 = vld [vmem:[%s8650_s5] sm:$0xff]  ;;  %v6173_v33 = vpack.c.bf16 %v4917_v28, %v4916_v27 }
 0x354   :  { %v6197_v34 = vpack.c.bf16 %v3834_v30, %v3833_v29 }
 0x356   :  { %6071 = vmatpush1.bf16.msra.mxu0 %v6070_v36  ;;  %6103 = vmatpush1.bf16.msra.mxu1 %v6070_v36  ;;  %v6559_v36 = vmov 0.0|0.0  }
 0x357   :  { %6073 = vmatprep.subr.bf16.mxu0 %v6072_v1  ;;  %6105 = vmatprep.subr.bf16.mxu1 %v6072_v1  ;;  %v4919_v1 = vld [vmem:[%s8650_s5 + $0x98] sm:$0xff] }
 0x358   :  { %v6176_v40 = vpack.c.bf16 %v4919_v1, %v4918_v35 }
 0x35a   :  { %6075 = vmatpush1.bf16.msra.mxu0 %v6074_v41  ;;  %6107 = vmatpush1.bf16.msra.mxu1 %v6074_v41  ;;  %v6200_v41 = vpack.c.bf16 %v3836_v38, %v3835_v37  ;;  %v4934_v37 = vld [vmem:[%s8650_s5 + $0x110] sm:$0xff]  ;;  %v4935_v38 = vld [vmem:[%s8650_s5 + $0x118] sm:$0xff] }
 0x35b   :  { %6109 = vmatprep.subr.bf16.mxu0 %v6108_v21  ;;  %6141 = vmatprep.subr.bf16.mxu1 %v6108_v21  ;;  %v4920_v21 = vld [vmem:[%s8650_s5 + $0xa0] sm:$0xff] }
 0x35c   :  { %v6179_v23 = vpack.c.bf16 %v4921_v42, %v4920_v21  ;;  %v6224_v42 = vpack.c.bf16 %v4935_v38, %v4934_v37  ;;  %v4975_v37 = vld [vmem:[%s8650_s5 + $0x258] sm:$0xff] }
 0x35d   :  { %3559 = vmatmul.mubr.f32.vlgmr.msra.gmra.mrb[14].mxu0 %v8059_v59  ;;  %3631 = vmatmul.mubr.f32.vlgmr.msra.gmra.mrb[10].mxu1 %v8161_v48  ;;  %v4898_v59 = vld [vmem:[%s8648_s3 + $0x470] sm:$0xff] }
 0x35e   :  { %6111 = vmatpush1.bf16.msra.mxu0 %v6110_v44  ;;  %6143 = vmatpush1.bf16.msra.mxu1 %v6110_v44  ;;  %v6122_v2 = vpack.c.bf16 %v4898_v59, %v4896_v58  ;;  %v6203_v44 = vpack.c.bf16 %v3838_v16, %v3837_v43  ;;  %v3843_v58 = vld [vmem:[%s8650_s5 + $0x50] sm:$0xff]  ;;  %v4936_v16 = vld [vmem:[%s8650_s5 + $0x120] sm:$0xff] }
 0x35f   :  { %6113 = vmatprep.subr.bf16.mxu0 %v6112_v45  ;;  %6145 = vmatprep.subr.bf16.mxu1 %v6112_v45  ;;  %v4922_v45 = vld [vmem:[%s8650_s5 + $0xb0] sm:$0xff]  ;;  %v6212_v61 = vpack.c.bf16 %v3844_v60, %v3843_v58  ;;  %v4943_v60 = vld [vmem:[%s8650_s5 + $0x158] sm:$0xff] }
 0x360   :  { %3737 = vmatprep.mubr.f32.mxu0 %v6557_v0  ;;  %3809 = vmatprep.mubr.f32.mxu1 %v6557_v0  ;;  %v6182_v49 = vpack.c.bf16 %v4923_v46, %v4922_v45  ;;  %v4953_v45 = vld [vmem:[%s8650_s5 + $0x1a8] sm:$0xff] }
 0x362   :  { %6115 = vmatpush1.bf16.msra.mxu0 %v6114_v51  ;;  %6147 = vmatpush1.bf16.msra.mxu1 %v6114_v51  ;;  %v4924_v51 = vld [vmem:[%s8650_s5 + $0xc0] sm:$0xff] }
 0x363   :  { %6117 = vmatprep.subr.bf16.mxu0 %v6116_v52  ;;  %6149 = vmatprep.subr.bf16.mxu1 %v6116_v52  ;;  %v4925_v52 = vld [vmem:[%s8650_s5 + $0xc8] sm:$0xff] }
 0x364   :  { %v6185_v54 = vpack.c.bf16 %v4925_v52, %v4924_v51  ;;  %v4955_v51 = vld [vmem:[%s8650_s5 + $0x1b8] sm:$0xff] }
 0x366   :  { %6119 = vmatpush1.bf16.msra.mxu0 %v6118_v56  ;;  %6151 = vmatpush1.bf16.msra.mxu1 %v6118_v56  ;;  %v4926_v56 = vld [vmem:[%s8650_s5 + $0xd0] sm:$0xff] }
 0x367   :  { %6121 = vmatprep.subr.bf16.mxu0 %v6120_v57  ;;  %6153 = vmatprep.subr.bf16.mxu1 %v6120_v57  ;;  %v4927_v57 = vld [vmem:[%s8650_s5 + $0xd8] sm:$0xff] }
 0x368   :  { %v6188_v59 = vpack.c.bf16 %v4927_v57, %v4926_v56  ;;  %v4957_v56 = vld [vmem:[%s8650_s5 + $0x1c8] sm:$0xff] }
 0x36a   :  { %6123 = vmatpush1.bf16.msra.mxu0 %v6122_v2  ;;  %6155 = vmatpush1.bf16.msra.mxu1 %v6122_v2  ;;  %v4928_v2 = vld [vmem:[%s8650_s5 + $0xe0] sm:$0xff] }
 0x36b   :  { %6125 = vmatprep.subr.bf16.mxu0 %v6124_v62  ;;  %6157 = vmatprep.subr.bf16.mxu1 %v6124_v62  ;;  %v4929_v62 = vld [vmem:[%s8650_s5 + $0xe8] sm:$0xff] }
 0x36c   :  { %v6191_v4 = vpack.c.bf16 %v4929_v62, %v4928_v2  ;;  %v4959_v2 = vld [vmem:[%s8650_s5 + $0x1d8] sm:$0xff] }
 0x36e   :  { %6127 = vmatpush1.bf16.msra.mxu0 %v6126_v6  ;;  %6159 = vmatpush1.bf16.msra.mxu1 %v6126_v6  ;;  %v4930_v6 = vld [vmem:[%s8650_s5 + $0xf0] sm:$0xff] }
 0x36f   :  { %6129 = vmatprep.subr.bf16.mxu0 %v6128_v7  ;;  %6161 = vmatprep.subr.bf16.mxu1 %v6128_v7  ;;  %v4931_v7 = vld [vmem:[%s8650_s5 + $0xf8] sm:$0xff] }
 0x370   :  { %v6194_v9 = vpack.c.bf16 %v4931_v7, %v4930_v6  ;;  %v4961_v6 = vld [vmem:[%s8650_s5 + $0x1e8] sm:$0xff] }
 0x372   :  { %6131 = vmatpush1.bf16.msra.mxu0 %v6130_v24  ;;  %6163 = vmatpush1.bf16.msra.mxu1 %v6130_v24 }
 0x373   :  { %6133 = vmatprep.subr.bf16.mxu0 %v6132_v12  ;;  %6165 = vmatprep.subr.bf16.mxu1 %v6132_v12 }
 0x376   :  { %6135 = vmatpush1.bf16.msra.mxu0 %v6134_v17  ;;  %6167 = vmatpush1.bf16.msra.mxu1 %v6134_v17 }
 0x377   :  { %6137 = vmatprep.subr.bf16.mxu0 %v6136_v18  ;;  %6169 = vmatprep.subr.bf16.mxu1 %v6136_v18 }
 0x37a   :  { %6139 = vmatpush1.bf16.msra.mxu0 %v6138_v22  ;;  %6171 = vmatpush1.bf16.msra.mxu1 %v6138_v22 }
 0x37b   :  { %6172 = vmatprep.subr.bf16.mxu0 %v6559_v36  ;;  %6196 = vmatprep.subr.bf16.mxu1 %v6559_v36 }
 0x37d   :  { %3738 = vmatmul.mubr.f32.vlgmr.msra.gmra.mrb[14].mxu0 %v8161_v48  ;;  %3810 = vmatmul.mubr.f32.vlgmr.msra.gmra.mrb[10].mxu1 %v3744_v39  ;;  %v3840_v48 = vld [vmem:[%s8650_s5 + $0x38] sm:$0xff]  ;;  %v4950_v39 = vld [vmem:[%s8650_s5 + $0x190] sm:$0xff] }
 0x37e   :  { %6174 = vmatpush3.bf16.msra.mxu0 %v6173_v33  ;;  %6198 = vmatpush3.bf16.msra.mxu1 %v6197_v34  ;;  %v6206_v50 = vpack.c.bf16 %v3840_v48, %v3839_v47  ;;  %v4932_v33 = vld [vmem:[%s8650_s5 + $0x100] sm:$0xff]  ;;  %v4949_v34 = vld [vmem:[%s8650_s5 + $0x188] sm:$0xff]  ;;  %v4938_v48 = vld [vmem:[%s8650_s5 + $0x130] sm:$0xff] }
 0x37f   :  { %6175 = vmatprep.subr.bf16.mxu0 %v6559_v36  ;;  %6199 = vmatprep.subr.bf16.mxu1 %v6559_v36 }
 0x380   :  { %5131 = vmatprep.mubr.msk.f32.mxu0 %vm6560_vm5, %v6557_v0  ;;  %5166 = vmatprep.mubr.msk.f32.mxu1 %vm6560_vm5, %v6557_v0 }
 0x382   :  { %6177 = vmatpush3.bf16.msra.mxu0 %v6176_v40  ;;  %6201 = vmatpush3.bf16.msra.mxu1 %v6200_v41  ;;  %v4951_v40 = vld [vmem:[%s8650_s5 + $0x198] sm:$0xff] }
 0x383   :  { %6178 = vmatprep.subr.bf16.mxu0 %v6559_v36  ;;  %6202 = vmatprep.subr.bf16.mxu1 %v6559_v36  ;;  %v6248_v43 = vpack.c.bf16 %v4951_v40, %v4950_v39  ;;  %v4976_v39 = vld [vmem:[%s8650_s5 + $0x260] sm:$0xff]  ;;  %v4977_v40 = vld [vmem:[%s8650_s5 + $0x268] sm:$0xff] }
 0x386   :  { %6180 = vmatpush3.bf16.msra.mxu0 %v6179_v23  ;;  %6204 = vmatpush3.bf16.msra.mxu1 %v6203_v44  ;;  %v4937_v23 = vld [vmem:[%s8650_s5 + $0x128] sm:$0xff]  ;;  %v4952_v44 = vld [vmem:[%s8650_s5 + $0x1a0] sm:$0xff] }
 0x387   :  { %6181 = vmatprep.subr.bf16.mxu0 %v6559_v36  ;;  %6205 = vmatprep.subr.bf16.mxu1 %v6559_v36  ;;  %v6227_v46 = vpack.c.bf16 %v4937_v23, %v4936_v16  ;;  %v6251_v47 = vpack.c.bf16 %v4953_v45, %v4952_v44  ;;  %v4287_v23 = vld [vmem:[%s8652_s7] sm:$0xff]  ;;  %v4288_v44 = vld [vmem:[%s8652_s7 + $0x8] sm:$0xff]  ;;  %v4289_v45 = vld [vmem:[%s8652_s7 + $0x10] sm:$0xff] }
 0x38a   :  { %6183 = vmatpush3.bf16.msra.mxu0 %v6182_v49  ;;  %6207 = vmatpush3.bf16.msra.mxu1 %v6206_v50  ;;  %v4939_v49 = vld [vmem:[%s8650_s5 + $0x138] sm:$0xff]  ;;  %v4954_v50 = vld [vmem:[%s8650_s5 + $0x1b0] sm:$0xff] }
 0x38b   :  { %6184 = vmatprep.subr.bf16.mxu0 %v6559_v36  ;;  %6208 = vmatprep.subr.bf16.mxu1 %v6559_v36  ;;  %v6230_v52 = vpack.c.bf16 %v4939_v49, %v4938_v48  ;;  %v6254_v53 = vpack.c.bf16 %v4955_v51, %v4954_v50  ;;  %v4291_v49 = vld [vmem:[%s8652_s7 + $0x20] sm:$0xff]  ;;  %v4292_v50 = vld [vmem:[%s8652_s7 + $0x28] sm:$0xff] }
 0x38c   :  { %v6299_v51 = vpack.c.bf16 %v4292_v50, %v4291_v49 }
 0x38e   :  { %6186 = vmatpush3.bf16.msra.mxu0 %v6185_v54  ;;  %6210 = vmatpush3.bf16.msra.mxu1 %v6209_v55  ;;  %v4940_v54 = vld [vmem:[%s8650_s5 + $0x140] sm:$0xff] }
 0x38f   :  { %6187 = vmatprep.subr.bf16.mxu0 %v6559_v36  ;;  %6211 = vmatprep.subr.bf16.mxu1 %v6559_v36  ;;  %v4956_v55 = vld [vmem:[%s8650_s5 + $0x1c0] sm:$0xff]  ;;  %v6233_v57 = vpack.c.bf16 %v4941_v63, %v4940_v54 }
 0x390   :  { %v6257_v58 = vpack.c.bf16 %v4957_v56, %v4956_v55  ;;  %v4295_v63 = vld [vmem:[%s8652_s7 + $0x40] sm:$0xff]  ;;  %v4296_v55 = vld [vmem:[%s8652_s7 + $0x48] sm:$0xff] }
 0x391   :  { %v6305_v56 = vpack.c.bf16 %v4296_v55, %v4295_v63 }
 0x392   :  { %6189 = vmatpush3.bf16.msra.mxu0 %v6188_v59  ;;  %6213 = vmatpush3.bf16.msra.mxu1 %v6212_v61  ;;  %v4942_v59 = vld [vmem:[%s8650_s5 + $0x150] sm:$0xff] }
 0x393   :  { %6190 = vmatprep.subr.bf16.mxu0 %v6559_v36  ;;  %6214 = vmatprep.subr.bf16.mxu1 %v6559_v36  ;;  %v4958_v61 = vld [vmem:[%s8650_s5 + $0x1d0] sm:$0xff]  ;;  %v6236_v62 = vpack.c.bf16 %v4943_v60, %v4942_v59  ;;  %v4299_v60 = vld [vmem:[%s8652_s7 + $0x60] sm:$0xff] }
 0x394   :  { %v6260_v3 = vpack.c.bf16 %v4959_v2, %v4958_v61  ;;  %v4300_v61 = vld [vmem:[%s8652_s7 + $0x68] sm:$0xff] }
 0x395   :  { %v6311_v2 = vpack.c.bf16 %v4300_v61, %v4299_v60 }
 0x396   :  { %6192 = vmatpush3.bf16.msra.mxu0 %v6191_v4  ;;  %6216 = vmatpush3.bf16.msra.mxu1 %v6215_v5  ;;  %v4944_v4 = vld [vmem:[%s8650_s5 + $0x160] sm:$0xff] }
 0x397   :  { %6193 = vmatprep.subr.bf16.mxu0 %v6559_v36  ;;  %6217 = vmatprep.subr.bf16.mxu1 %v6559_v36  ;;  %v4960_v5 = vld [vmem:[%s8650_s5 + $0x1e0] sm:$0xff]  ;;  %v6239_v7 = vpack.c.bf16 %v4945_v26, %v4944_v4 }
 0x398   :  { %v6263_v8 = vpack.c.bf16 %v4961_v6, %v4960_v5 }
 0x39a   :  { %6195 = vmatpush3.bf16.msra.mxu0 %v6194_v9  ;;  %6219 = vmatpush3.bf16.msra.mxu1 %v6218_v11  ;;  %v4946_v9 = vld [vmem:[%s8650_s5 + $0x170] sm:$0xff] }
 0x39b   :  { %6220 = vmatprep.subr.bf16.mxu0 %v6559_v36  ;;  %6244 = vmatprep.subr.bf16.mxu1 %v6559_v36  ;;  %v4962_v11 = vld [vmem:[%s8650_s5 + $0x1f0] sm:$0xff] }
 0x450   :  { %v3739_v24 = vpop.f32.mrb[14].mxu0  ;;  %v3811_v12 = vpop.f32.mrb[10].mxu1 }
 0x451   :  { %v3820_v25 = vadd.f32 %v3739_v24, %v7820_v31  ;;  %v3824_v13 = vadd.f32 %v3811_v12, %v7820_v31  ;;  %v3741_v14 = vpop.f32.mrb[15].mxu0  ;;  %v3813_v15 = vpop.f32.mrb[11].mxu1  ;;  %v4933_v31 = vld [vmem:[%s8650_s5 + $0x108] sm:$0xff]  ;;  %v4963_v24 = vld [vmem:[%s8650_s5 + $0x1f8] sm:$0xff]  ;;  %v6242_v12 = vpack.c.bf16 %v4947_v10, %v4946_v9 }
 0x452   :  { %v3821_v17 = vadd.f32 %v3741_v14, %v7824_v32  ;;  %v3825_v18 = vadd.f32 %v3813_v15, %v7824_v32  ;;  %v4948_v32 = vld [vmem:[%s8650_s5 + $0x180] sm:$0xff]  ;;  %v6221_v35 = vpack.c.bf16 %v4933_v31, %v4932_v33  ;;  %v4965_v14 = vld [vmem:[%s8650_s5 + $0x208] sm:$0xff]  ;;  %v4971_v33 = vld [vmem:[%s8650_s5 + $0x238] sm:$0xff] }
 0x453   :  { %v3822_v19 = vmax.f32 %v3820_v25, 0.0  ;;  %v3826_v20 = vmax.f32 %v3824_v13, 0.0  ;;  %v6245_v1 = vpack.c.bf16 %v4949_v34, %v4948_v32  ;;  %v6266_v25 = vpack.c.bf16 %v4963_v24, %v4962_v11  ;;  %v4964_v13 = vld [vmem:[%s8650_s5 + $0x200] sm:$0xff]  ;;  %v4973_v34 = vld [vmem:[%s8650_s5 + $0x248] sm:$0xff] }
 0x454   :  { %v3823_v22 = vmax.f32 %v3821_v17, 0.0  ;;  %v3827_v27 = vmax.f32 %v3825_v18, 0.0  ;;  %v6269_v15 = vpack.c.bf16 %v4965_v14, %v4964_v13  ;;  %v4966_v17 = vld [vmem:[%s8650_s5 + $0x210] sm:$0xff]  ;;  %v4967_v18 = vld [vmem:[%s8650_s5 + $0x218] sm:$0xff]  ;;  %v4972_v32 = vld [vmem:[%s8650_s5 + $0x240] sm:$0xff] }
 0x455   :  { %v3828_v28 = vmax.f32 %v3822_v19, %v3826_v20 }
 0x456   :  { %v3829_v29 = vmax.f32 %v3823_v22, %v3827_v27  ;;  %v6272_v22 = vpack.c.bf16 %v4967_v18, %v4966_v17  ;;  %v4968_v27 = vld [vmem:[%s8650_s5 + $0x220] sm:$0xff]  ;;  %v4385_v17 = vld [vmem:[%s8654_s9 + $0x8] sm:$0xff] }
 0x458   :  { %v3830_v30 = vmax.f32 %v3828_v28, %v3829_v29  ;;  %v4969_v28 = vld [vmem:[%s8650_s5 + $0x228] sm:$0xff] }
 0x459   :  { %v6275_v29 = vpack.c.bf16 %v4969_v28, %v4968_v27  ;;  %v4387_v27 = vld [vmem:[%s8654_s9 + $0x18] sm:$0xff] }
 0x45a   :  { %3831 = vst [vmem:[#allocation4 + $0x8] sm:$0x1f] %v3830_v30  ;;  %v4970_v30 = vld [vmem:[%s8650_s5 + $0x230] sm:$0xff] }
 0x45b   :  { %v6278_v31 = vpack.c.bf16 %v4971_v33, %v4970_v30  ;;  %v4389_v30 = vld [vmem:[%s8654_s9 + $0x28] sm:$0xff] }
 0x461   :  { %v3850_v41 = vld [vmem:[#allocation4 + $0x1] ss:$8 sm:$0x3]  ;;  %v3832_v21 = vld [vmem:[#allocation4] ss:$8 sm:$0x3] }
 0x462   :  { %5132 = vmatmul.mubr.f32.vlgmr.msra.gmra.mrb[16].mxu0 %v3850_v41  ;;  %5167 = vmatmul.mubr.f32.vlgmr.msra.gmra.mrb[12].mxu1 %v3832_v21  ;;  %v4009_v19 = vld [vmem:[#allocation4 + $0x2] ss:$8 sm:$0x3]  ;;  %v4099_v20 = vld [vmem:[#allocation4 + $0x3] ss:$8 sm:$0x3]  ;;  %v6287_v41 = vpack.c.bf16 %v4977_v40, %v4976_v39 }
 0x463   :  { %6222 = vmatpush3.bf16.msra.mxu0 %v6221_v35  ;;  %6246 = vmatpush3.bf16.msra.mxu1 %v6245_v1  ;;  %v6281_v35 = vpack.c.bf16 %v4973_v34, %v4972_v32  ;;  %v4974_v1 = vld [vmem:[%s8650_s5 + $0x250] sm:$0xff]  ;;  %v4391_v32 = vld [vmem:[%s8654_s9 + $0x38] sm:$0xff]  ;;  %v4981_v39 = vld [vmem:[#allocation10] ss:$0 sm:$0xff] }
 0x464   :  { %6223 = vmatprep.subr.bf16.mxu0 %v6559_v36  ;;  %6247 = vmatprep.subr.bf16.mxu1 %v6559_v36  ;;  %v6284_v38 = vpack.c.bf16 %v4975_v37, %v4974_v1  ;;  %v4978_v21 = vld [vmem:[%s8650_s5 + $0x270] sm:$0xff]  ;;  %v4393_v1 = vld [vmem:[%s8654_s9 + $0x48] sm:$0xff] }
 0x465   :  { %5201 = vmatprep.mubr.msk.f32.mxu0 %vm6560_vm5, %v6557_v0  ;;  %5236 = vmatprep.mubr.msk.f32.mxu1 %vm6560_vm5, %v6557_v0  ;;  %v4189_v16 = vld [vmem:[#allocation4 + $0x4] ss:$8 sm:$0x3] }
 0x467   :  { %6225 = vmatpush3.bf16.msra.mxu0 %v6224_v42  ;;  %6249 = vmatpush3.bf16.msra.mxu1 %v6248_v43  ;;  %v4979_v42 = vld [vmem:[%s8650_s5 + $0x278] sm:$0xff] }
 0x468   :  { %6226 = vmatprep.subr.bf16.mxu0 %v6559_v36  ;;  %6250 = vmatprep.subr.bf16.mxu1 %v6559_v36  ;;  %v6290_v43 = vpack.c.bf16 %v4979_v42, %v4978_v21  ;;  %v4983_v42 = vld [vmem:[#allocation11] ss:$0 sm:$0xff] }
 0x46b   :  { %6228 = vmatpush3.bf16.msra.mxu0 %v6227_v46  ;;  %6252 = vmatpush3.bf16.msra.mxu1 %v6251_v47  ;;  %v6293_v46 = vpack.c.bf16 %v4288_v44, %v4287_v23  ;;  %v4290_v47 = vld [vmem:[%s8652_s7 + $0x18] sm:$0xff] }
 0x46c   :  { %6229 = vmatprep.subr.bf16.mxu0 %v6559_v36  ;;  %6253 = vmatprep.subr.bf16.mxu1 %v6559_v36  ;;  %v6296_v48 = vpack.c.bf16 %v4290_v47, %v4289_v45 }
 0x46f   :  { %6231 = vmatpush3.bf16.msra.mxu0 %v6230_v52  ;;  %6255 = vmatpush3.bf16.msra.mxu1 %v6254_v53  ;;  %v4293_v52 = vld [vmem:[%s8652_s7 + $0x30] sm:$0xff]  ;;  %v4294_v53 = vld [vmem:[%s8652_s7 + $0x38] sm:$0xff] }
 0x470   :  { %6232 = vmatprep.subr.bf16.mxu0 %v6559_v36  ;;  %6256 = vmatprep.subr.bf16.mxu1 %v6559_v36  ;;  %v6302_v54 = vpack.c.bf16 %v4294_v53, %v4293_v52 }
 0x473   :  { %6234 = vmatpush3.bf16.msra.mxu0 %v6233_v57  ;;  %6258 = vmatpush3.bf16.msra.mxu1 %v6257_v58  ;;  %v4297_v57 = vld [vmem:[%s8652_s7 + $0x50] sm:$0xff]  ;;  %v4298_v58 = vld [vmem:[%s8652_s7 + $0x58] sm:$0xff] }
 0x474   :  { %6235 = vmatprep.subr.bf16.mxu0 %v6559_v36  ;;  %6259 = vmatprep.subr.bf16.mxu1 %v6559_v36  ;;  %v6308_v59 = vpack.c.bf16 %v4298_v58, %v4297_v57 }
 0x477   :  { %6237 = vmatpush3.bf16.msra.mxu0 %v6236_v62  ;;  %6261 = vmatpush3.bf16.msra.mxu1 %v6260_v3  ;;  %v4301_v62 = vld [vmem:[%s8652_s7 + $0x70] sm:$0xff] }
 0x478   :  { %6238 = vmatprep.subr.bf16.mxu0 %v6559_v36  ;;  %6262 = vmatprep.subr.bf16.mxu1 %v6559_v36 }
 0x47b   :  { %6240 = vmatpush3.bf16.msra.mxu0 %v6239_v7  ;;  %6264 = vmatpush3.bf16.msra.mxu1 %v6263_v8 }
 0x47c   :  { %6241 = vmatprep.subr.bf16.mxu0 %v6559_v36  ;;  %6265 = vmatprep.subr.bf16.mxu1 %v6559_v36 }
 0x47f   :  { %6243 = vmatpush3.bf16.msra.mxu0 %v6242_v12  ;;  %6267 = vmatpush3.bf16.msra.mxu1 %v6266_v25  ;;  %v4980_v25 = vld [vmem:[#allocation8] ss:$0 sm:$0xff] }
 0x480   :  { %6268 = vmatprep.subr.bf16.mxu0 %v6559_v36  ;;  %6292 = vmatprep.subr.bf16.mxu1 %v6559_v36 }
 0x482   :  { %5202 = vmatmul.mubr.f32.vlgmr.msra.gmra.mrb[18].mxu0 %v4009_v19  ;;  %5237 = vmatmul.mubr.f32.vlgmr.msra.gmra.mrb[14].mxu1 %v4099_v20 }
 0x483   :  { %6270 = vmatpush3.bf16.msra.mxu0 %v6269_v15  ;;  %5271 = vmatprep.mubr.msk.f32.mxu0 %vm6560_vm5, %v6557_v0  ;;  %v4384_v15 = vld [vmem:[%s8654_s9] sm:$0xff] }
 0x484   :  { %6271 = vmatprep.subr.bf16.mxu0 %v6559_v36  ;;  %5304 = vmatprep.mubr.msk.f32.mxu1 %vm6560_vm5, %v6557_v0  ;;  %v6314_v19 = vpack.c.bf16 %v4385_v17, %v4384_v15 }
 0x485   :  { %6294 = vmatpush3.bf16.msra.mxu1 %v6293_v46 }
 0x486   :  { %6295 = vmatprep.subr.bf16.mxu1 %v6559_v36 }
 0x487   :  { %6273 = vmatpush3.bf16.msra.mxu0 %v6272_v22  ;;  %v4386_v22 = vld [vmem:[%s8654_s9 + $0x10] sm:$0xff] }
 0x488   :  { %6274 = vmatprep.subr.bf16.mxu0 %v6559_v36  ;;  %v6317_v28 = vpack.c.bf16 %v4387_v27, %v4386_v22 }
 0x489   :  { %6297 = vmatpush3.bf16.msra.mxu1 %v6296_v48 }
 0x48a   :  { %6298 = vmatprep.subr.bf16.mxu1 %v6559_v36 }
 0x48b   :  { %6276 = vmatpush3.bf16.msra.mxu0 %v6275_v29  ;;  %v4388_v29 = vld [vmem:[%s8654_s9 + $0x20] sm:$0xff] }
 0x48c   :  { %6277 = vmatprep.subr.bf16.mxu0 %v6559_v36  ;;  %v6320_v33 = vpack.c.bf16 %v4389_v30, %v4388_v29 }
 0x48d   :  { %6300 = vmatpush3.bf16.msra.mxu1 %v6299_v51 }
 0x48e   :  { %6301 = vmatprep.subr.bf16.mxu1 %v6559_v36 }
 0x48f   :  { %6279 = vmatpush3.bf16.msra.mxu0 %v6278_v31  ;;  %v4390_v31 = vld [vmem:[%s8654_s9 + $0x30] sm:$0xff] }
 0x490   :  { %6280 = vmatprep.subr.bf16.mxu0 %v6559_v36  ;;  %v6323_v34 = vpack.c.bf16 %v4391_v32, %v4390_v31 }
 0x491   :  { %6303 = vmatpush3.bf16.msra.mxu1 %v6302_v54 }
 0x492   :  { %6304 = vmatprep.subr.bf16.mxu1 %v6559_v36 }
 0x493   :  { %6282 = vmatpush3.bf16.msra.mxu0 %v6281_v35  ;;  %v4392_v35 = vld [vmem:[%s8654_s9 + $0x40] sm:$0xff] }
 0x494   :  { %6283 = vmatprep.subr.bf16.mxu0 %v6559_v36  ;;  %v6326_v37 = vpack.c.bf16 %v4393_v1, %v4392_v35 }
 0x495   :  { %6306 = vmatpush3.bf16.msra.mxu1 %v6305_v56 }
 0x496   :  { %6307 = vmatprep.subr.bf16.mxu1 %v6559_v36 }
 0x497   :  { %6285 = vmatpush3.bf16.msra.mxu0 %v6284_v38  ;;  %v4394_v38 = vld [vmem:[%s8654_s9 + $0x50] sm:$0xf] }
 0x498   :  { %6286 = vmatprep.subr.bf16.mxu0 %v6559_v36 }
 0x499   :  { %6309 = vmatpush3.bf16.msra.mxu1 %v6308_v59 }
 0x49a   :  { %6310 = vmatprep.subr.bf16.mxu1 %v6559_v36 }
 0x49b   :  { %6288 = vmatpush3.bf16.msra.mxu0 %v6287_v41 }
 0x49c   :  { %6289 = vmatprep.subr.bf16.mxu0 %v6559_v36 }
 0x49d   :  { %6312 = vmatpush3.bf16.msra.mxu1 %v6311_v2 }
 0x49e   :  { %5302 = vmatprep.subr.mxu1 %v6557_v0 }
 0x49f   :  { %6291 = vmatpush3.bf16.msra.mxu0 %v6290_v43 }
 0x4a1   :  { %5303 = vmatpush3.msra.mxu1 %v4301_v62 }
 0x4a2   :  { %5272 = vmatmul.mubr.f32.vlgmr.msra.gmra.mrb[20].mxu0 %v4189_v16  ;;  %6313 = vmatprep.subr.bf16.mxu1 %v6559_v36 }
 0x535   :  { %v3934_v3 = vpop.f32.mrb[16].mxu0  ;;  %v4004_v4 = vpop.f32.mrb[12].mxu1 }
 0x536   :  { %v4005_v26 = vadd.f32 %v4004_v4, %v3934_v3  ;;  %v5133_v5 = vpop.f32.mrb[17].mxu0  ;;  %v5168_v6 = vpop.f32.mrb[13].mxu1 }
 0x555   :  { %v4093_v7 = vpop.f32.mrb[18].mxu0  ;;  %v4183_v8 = vpop.f32.mrb[14].mxu1 }
 0x556   :  { %v4097_v9 = vadd.f32 %v4093_v7, %v4005_v26  ;;  %v5203_v10 = vpop.f32.mrb[19].mxu0  ;;  %v5238_v11 = vpop.f32.mrb[15].mxu1 }
 0x558   :  { %v4187_v24 = vadd.f32 %v4183_v8, %v4097_v9 }
 0x575   :  { %v4273_v12 = vpop.f32.mrb[20].mxu0 }
 0x576   :  { %v4277_v13 = vadd.f32 %v4273_v12, %v4187_v24  ;;  %v5273_v14 = vpop.f32.mrb[21].mxu0 }
 0x578   :  { %v4285_v18 = vadd.f32 %v4980_v25, %v4277_v13 }
 0x57a   :  { %v4286_v20 = vmax.f32 %v4285_v18, 0.0 }
 0x57c   :  { %5305 = vmatmul.mubr.msk.f32.vlgmr.msra.gmra.mrb[16].mxu1 %vm4309_vm6, %v4286_v20 }
 0x57d   :  { %6315 = vmatpush3.bf16.msra.mxu1 %v6314_v19  ;;  %5329 = vmatprep.mubr.msk.f32.mxu1 %vm6560_vm5, %v6557_v0 }
 0x57e   :  { %6316 = vmatprep.subr.bf16.mxu1 %v6559_v36 }
 0x581   :  { %6318 = vmatpush3.bf16.msra.mxu1 %v6317_v28 }
 0x582   :  { %6319 = vmatprep.subr.bf16.mxu1 %v6559_v36 }
 0x585   :  { %6321 = vmatpush3.bf16.msra.mxu1 %v6320_v33 }
 0x586   :  { %6322 = vmatprep.subr.bf16.mxu1 %v6559_v36 }
 0x589   :  { %6324 = vmatpush3.bf16.msra.mxu1 %v6323_v34 }
 0x58a   :  { %6325 = vmatprep.subr.bf16.mxu1 %v6559_v36 }
 0x58d   :  { %6327 = vmatpush3.bf16.msra.mxu1 %v6326_v37 }
 0x58e   :  { %5327 = vmatprep.subr.mxu1 %v6557_v0 }
 0x591   :  { %5328 = vmatpush3.msk.msra.mxu1 %vm134_vm1, %v4394_v38 }
 0x64f   :  { %v4379_v36 = vpop.f32.mrb[16].mxu1 }
 0x650   :  { %v4380_v40 = vadd.f32 %v4981_v39, %v4379_v36  ;;  %v5306_v41 = vpop.f32.mrb[17].mxu1 }
 0x652   :  { %v4383_v21 = vmax.f32 %v4380_v40, 0.0 }
 0x654   :  { %5330 = vmatmul.mubr.msk.f32.vlgmr.msra.gmra.mrb[18].mxu1 %vm4402_vm7, %v4383_v21 }
 0x727   :  { %v4475_v43 = vpop.f32.mrb[18].mxu1 }
 0x728   :  { %v4476_v16 = vadd.f32 %v4983_v42, %v4475_v43  ;;  %v5331_v23 = vpop.f32.mrb[19].mxu1 }
 0x72a   :  { %v4480_v0 = vsel %vm4479_vm8, %v4476_v16, 0.0 }
 0x72b   :  { %4481 = vadd.xlane.f32.xlu0 %v4480_v0 }
 0x7b8   :  { %v4482_v44 = vpop.xlane.xlu0 %4481 }
 0x7b9   :  { %v4483_v45 = vrot.slane %v4482_v44, 4 }
 0x7bb   :  { %v4484_v46 = vadd.f32 %v4483_v45, %v4482_v44 }
 0x7bd   :  { %v4485_v47 = vrot.slane %v4484_v46, 2 }
 0x7bf   :  { %v4486_v48 = vadd.f32 %v4485_v47, %v4484_v46 }
 0x7c1   :  { %v4487_v49 = vrot.slane %v4486_v48, 1 }
 0x7c3   :  { %v4488_v50 = vadd.f32 %v4487_v49, %v4486_v48 }
 0x7c5   :  { %6424 = vpush %v4488_v50 }
 0x7f6   :  { %s6425_s9 = spop %6424 }
 0x7f7   :  { %p4490_p4 = scmp.gt.f32.partialorder %s6425_s9, 0.0 }
 0x7f9   :  { %s4491_s19 = scalar_select %p4490_p4, 1.0, -1.0 }
 0x7fb   :  { %v4492_v51 = vstv %s4491_s19 }
 0x7fc   :  { %v4493_v52 = vmul.f32 %v4492_v51, %v4476_v16 }
 0x7fe   :  { %4494 = vst.msk [vmem:[#allocation13] sm:$0x3] %vm4479_vm8, %v4493_v52 }
 0x7ff   :  { %6534 = shalt.err (!%p6531_p9)
}
 0x800   :  { %s6535_s18 = scalar_lea.hbm %s8656_s11, 32 }
 0x801   :  { %p6536_p10 = scmp.ne.s32.totalorder %s8656_s11, %s6535_s18  ;;  %p6539_p11 = scmp.lt.u32.totalorder %s6535_s18, %s8656_s11 }
 0x803   :  { %p6541_p12 = pnand %p6539_p11, %p6536_p10 }
 0x805   :  { %6544 = shalt.err (!%p6541_p12)
}
 0x806   :  { %4504 = dma.vmem_to_hbm [thread:$0]  %s4502_s17, 32, %s8656_s11, [#allocation7]  }
 0x807   :  { %6551 = dma.done.wait [#allocation7], 32  }
 0x808   :  { %6552 = vsyncadd [#allocation7], 4294967264 }
 0x809   :  { %4508 = vsyncpa [#allocation6], 1 }
 0x80a   :  { %4509 = vsyncpa [#allocation9], 1 }
 0x80b   :  { %4510 = vsyncpa [#allocation12], 1 }
 0x80c   :  { %4511 = vsyncpa [#allocation7], 1 }

</bundles_post_ra>
